<compile_context>
chip_gen: v5e
topology: v5e:2x2
jax: 0.10.0
libtpu: 0.0.40
codegen_flags: <defaults>
</compile_context>

<pallas_src>
import functools

import jax
import jax.numpy as jnp
from jax.experimental import pallas as pl
from jax.experimental.pallas import tpu as pltpu

_LANE = 128
_MIN_PALLAS_M = 512   # below this a pallas_call is launch overhead and the M
                      # axis could not be split >= 2 ways for v7x megacore
_MIN_PALLAS_N = 32    # tiny-N layers stay in XLA (no 8->128 lane-pad waste)
_MAX_TM = 4096        # row-tile cap (dec4 GEMM -> 3 grid steps, ~2 MB/step)


def _round_up(x, m):
    return ((x + m - 1) // m) * m


def _apply_act(y, activation):
    if activation == "relu":
        return jnp.maximum(y, 0.0)
    if activation == "sigmoid":
        return jax.nn.sigmoid(y)
    return y


# ----------------------------------------------------------------------------
# Pallas kernel: (tm, K) @ (K, Np)bf16 -> f32 accumulate + bias + act, bf16 out.
# Np is a multiple of 128 so the output store is lane-dense (no masked vst).
# ----------------------------------------------------------------------------
def _matmul_bias_act_kernel(x_ref, w_ref, b_ref, o_ref, *, activation):
    x = x_ref[...]
    if x.dtype != jnp.bfloat16:
        x = x.astype(jnp.bfloat16)          # cast in-register; no HBM bf16 copy
    acc = jnp.dot(x, w_ref[...], preferred_element_type=jnp.float32)
    acc = acc + b_ref[...]                  # (1, Np) f32 broadcast over rows
    if activation == "relu":
        acc = jnp.maximum(acc, 0.0)
    elif activation == "sigmoid":
        acc = jax.nn.sigmoid(acc)           # exp/recip land on the EUP slot
    o_ref[...] = acc.astype(o_ref.dtype)    # bf16 store: halves HBM/vst bytes


def matmul_bias_act(x, w, b, activation="none", out_dtype=jnp.bfloat16):
    """y = act(x @ w + b), returned in out_dtype.

    Hot path: Pallas GEMM (bf16 MXU inputs cast in-register, f32
    accumulate/epilogue, lane-dense bf16 stores).  Tiny-M or tiny-N layers
    fall back to plain jnp so XLA fuses them (a Pallas call plus lane padding
    would be pure overhead there)."""
    M, K = x.shape
    K2, N = w.shape
    assert K == K2
    b = b.astype(jnp.float32)

    if M < _MIN_PALLAS_M or N < _MIN_PALLAS_N:
        y = jnp.dot(x, w.astype(x.dtype), preferred_element_type=jnp.float32) + b
        return _apply_act(y, activation).astype(out_dtype)

    # Lane-dense output: pad N to a multiple of 128, slice back afterwards.
    n_pad = _round_up(N, _LANE)
    wb = w.astype(jnp.bfloat16)
    if n_pad != N:
        wb = jnp.pad(wb, ((0, 0), (0, n_pad - N)))
        b = jnp.pad(b, (0, n_pad - N))
    b2 = b.reshape(1, n_pad)

    # Row tile: guarantee >= 2 grid steps (v7x megacore shards the parallel M
    # axis across both TensorCores), capped at _MAX_TM.  Worst-case block is a
    # few MB double-buffered -> safe under v7x's 32 MiB scoped VMEM.
    tm = min(_MAX_TM, _round_up((M + 1) // 2, 256))
    m_pad = _round_up(M, tm)
    xb = x if m_pad == M else jnp.pad(x, ((0, m_pad - M), (0, 0)))

    flops = 2 * m_pad * K * n_pad
    bytes_accessed = (m_pad * K * xb.dtype.itemsize + K * n_pad * 2 + n_pad * 4
                      + m_pad * n_pad * jnp.dtype(out_dtype).itemsize)
    transcendentals = m_pad * n_pad if activation == "sigmoid" else 0

    out = pl.pallas_call(
        functools.partial(_matmul_bias_act_kernel, activation=activation),
        out_shape=jax.ShapeDtypeStruct((m_pad, n_pad), out_dtype),
        grid_spec=pltpu.PrefetchScalarGridSpec(
            num_scalar_prefetch=0,
            grid=(m_pad // tm,),
            in_specs=[
                pl.BlockSpec((tm, K), lambda i: (i, 0)),
                pl.BlockSpec((K, n_pad), lambda i: (0, 0)),
                pl.BlockSpec((1, n_pad), lambda i: (0, 0)),
            ],
            out_specs=pl.BlockSpec((tm, n_pad), lambda i: (i, 0)),
        ),
        compiler_params=pltpu.CompilerParams(
            dimension_semantics=("parallel",),
            vmem_limit_bytes=32 * 1024 * 1024,
        ),
        cost_estimate=pl.CostEstimate(
            flops=flops,
            transcendentals=transcendentals,
            bytes_accessed=bytes_accessed),
    )(xb, wb, b2)

    out = out[:M]
    if n_pad != N:
        out = out[:, :N]
    return out


# ----------------------------------------------------------------------------
# Conv2d (encoder): im2col (XLA strided-slice glue, cast to bf16 in the patch
# assembly) + GEMM with fused bias + ReLU.
# ----------------------------------------------------------------------------
def conv2d(x, w, b, stride, padding, activation):
    """x: NHWC, w: (C_out, C_in, kH, kW) (PyTorch Conv2d layout), b: (C_out,)."""
    B, H, W, C_in = x.shape
    C_out, _, kH, kW = w.shape
    if padding > 0:
        x = jnp.pad(x, ((0, 0), (padding, padding), (padding, padding), (0, 0)))
    Hp, Wp = x.shape[1], x.shape[2]
    H_out = (Hp - kH) // stride + 1
    W_out = (Wp - kW) // stride + 1

    # im2col as strided slices; cast to bf16 here so the cast fuses into the
    # patch assembly instead of being a standalone HBM round trip.
    patches = [
        x[:, kh:kh + (H_out - 1) * stride + 1:stride,
             kw:kw + (W_out - 1) * stride + 1:stride, :].astype(jnp.bfloat16)
        for kh in range(kH) for kw in range(kW)]
    patches = jnp.concatenate(patches, axis=-1)            # (B, Ho, Wo, k*k*C_in)
    patches = patches.reshape(B * H_out * W_out, kH * kW * C_in)

    w_mat = jnp.transpose(w, (2, 3, 1, 0)).reshape(kH * kW * C_in, C_out)
    y = matmul_bias_act(patches, w_mat, b, activation, out_dtype=jnp.bfloat16)
    return y.reshape(B, H_out, W_out, C_out)


# ----------------------------------------------------------------------------
# ConvTranspose2d (decoder): direct col2im GEMM -- no zero-insertion.
# ----------------------------------------------------------------------------
def _col2im_overlap(cols, b, stride, output_padding, activation):
    """col2im for stride < k <= 2*stride (pairwise tap overlap, e.g. dec4).

    Taps kh/kw >= stride land on the same output pixel as tap kh-stride /
    kw-stride of the next input pixel, so they are folded by shifted adds in
    the small (B,H,W,...) cols domain (f32 accumulation), followed by a single
    depth-to-space rearrangement; only 1-pixel boundary strips are handled
    separately.  Bias + activation are applied once at the end, so the
    output_padding fringe gets act(bias), matching PyTorch."""
    B, H, W, kH, kW, C = cols.shape
    s = stride
    ov_h, ov_w = kH - s, kW - s
    cols = cols.astype(jnp.float32)                          # accumulate in f32

    # Fold overlapping kw taps into the next input column.
    d = cols[:, :, :, :, :s, :]                              # (B,H,W,kH,s,C)
    d = d.at[:, :, 1:, :, :ov_w, :].add(cols[:, :, :-1, :, s:, :])
    right = cols[:, :, W - 1, :, s:, :]                      # (B,H,kH,ov_w,C)

    # Fold overlapping kh taps into the next input row.
    e = d[:, :, :, :s, :, :]                                 # (B,H,W,s,s,C)
    e = e.at[:, 1:, :, :ov_h, :, :].add(d[:, :-1, :, s:, :, :])
    bottom = d[:, H - 1, :, s:, :, :]                        # (B,W,ov_h,s,C)

    # The right boundary strip also needs its kh-overlap folded.
    r_main = right[:, :, :s, :, :]                           # (B,H,s,ov_w,C)
    r_main = r_main.at[:, 1:, :ov_h, :, :].add(right[:, :-1, s:, :, :])
    r_corner = right[:, H - 1, s:, :, :]                     # (B,ov_h,ov_w,C)

    Hs, Ws = H * s, W * s
    H_out = (H - 1) * s + kH + output_padding
    W_out = (W - 1) * s + kW + output_padding
    pad_h = H_out - Hs - ov_h
    pad_w = W_out - Ws - ov_w

    y_main = jnp.transpose(e, (0, 1, 3, 2, 4, 5)).reshape(B, Hs, Ws, C)
    r_main = r_main.reshape(B, Hs, ov_w, C)
    bottom = jnp.transpose(bottom, (0, 2, 1, 3, 4)).reshape(B, ov_h, Ws, C)

    def zeros(h, w):
        return jnp.zeros((B, h, w, C), jnp.float32)

    top = [y_main, r_main] + ([zeros(Hs, pad_w)] if pad_w else [])
    mid = [bottom, r_corner] + ([zeros(ov_h, pad_w)] if pad_w else [])
    rows = [jnp.concatenate(top, axis=2), jnp.concatenate(mid, axis=2)]
    if pad_h:
        rows.append(zeros(pad_h, W_out))
    y = jnp.concatenate(rows, axis=1)                        # (B,H_out,W_out,C)
    y = y + b.reshape(1, 1, 1, C).astype(jnp.float32)
    return _apply_act(y, activation)


def conv_transpose2d(x, w_t, b, stride, output_padding, activation):
    """x: NHWC, w_t: (C_in, C_out, kH, kW) (PyTorch ConvTranspose2d layout)."""
    B, H, W, C_in = x.shape
    _, C_out, kH, kW = w_t.shape
    # GEMM producing per-input-pixel tap columns (only the necessary MACs).
    w_mat = jnp.transpose(w_t, (0, 2, 3, 1)).reshape(C_in, kH * kW * C_out)

    if stride == kH and stride == kW:
        # No tap overlap: fuse (tiled) bias + activation into the GEMM so the
        # col2im is a pure sub-pixel (depth-to-space) rearrangement.
        b_tiled = jnp.tile(b, kH * kW)
        cols = matmul_bias_act(x.reshape(B * H * W, C_in), w_mat, b_tiled,
                               activation, out_dtype=jnp.bfloat16)
        cols = cols.reshape(B, H, W, kH, kW, C_out)
        y = jnp.transpose(cols, (0, 1, 3, 2, 4, 5)).reshape(
            B, H * kH, W * kW, C_out)
        if output_padding > 0:
            # output_padding fringe gets act(bias), matching PyTorch.
            fv = _apply_act(b.reshape(1, 1, 1, C_out), activation).astype(y.dtype)
            op = output_padding
            y = jnp.concatenate(
                [y, jnp.broadcast_to(fv, (B, H * kH, op, C_out))], axis=2)
            y = jnp.concatenate(
                [y, jnp.broadcast_to(fv, (B, op, W * kW + op, C_out))], axis=1)
        return y

    # Overlapping taps (dec4: kernel 4, stride 3): fold in the cols domain.
    assert stride < kH <= 2 * stride and stride < kW <= 2 * stride
    zero_b = jnp.zeros((kH * kW * C_out,), jnp.float32)
    cols = matmul_bias_act(x.reshape(B * H * W, C_in), w_mat, zero_b, "none",
                           out_dtype=jnp.bfloat16)
    cols = cols.reshape(B, H, W, kH, kW, C_out)
    return _col2im_overlap(cols, b, stride, output_padding, activation)


# ----------------------------------------------------------------------------
# Deterministic parameter initialization (shapes from VAE224.__init__).
# ----------------------------------------------------------------------------
def init_params(key, kernel_size=4, init_channels=8, image_channels=3, latent_dim=3):
    ks = list(jax.random.split(key, 24))

    def conv_p(k, c_out, c_in):
        scale = 1.0 / jnp.sqrt(c_in * kernel_size * kernel_size)
        kw, kb = jax.random.split(k)
        return (scale * jax.random.normal(kw, (c_out, c_in, kernel_size, kernel_size), jnp.float32),
                scale * jax.random.normal(kb, (c_out,), jnp.float32))

    def convT_p(k, c_in, c_out):
        scale = 1.0 / jnp.sqrt(c_in * kernel_size * kernel_size)
        kw, kb = jax.random.split(k)
        return (scale * jax.random.normal(kw, (c_in, c_out, kernel_size, kernel_size), jnp.float32),
                scale * jax.random.normal(kb, (c_out,), jnp.float32))

    def lin_p(k, d_in, d_out):
        scale = 1.0 / jnp.sqrt(d_in)
        kw, kb = jax.random.split(k)
        return (scale * jax.random.normal(kw, (d_in, d_out), jnp.float32),
                scale * jax.random.normal(kb, (d_out,), jnp.float32))

    ic = init_channels
    p = {}
    p["enc1"] = conv_p(ks[0], ic, image_channels)
    p["enc2"] = conv_p(ks[1], ic * 2, ic)
    p["enc3"] = conv_p(ks[2], ic * 4, ic * 2)
    p["enc4"] = conv_p(ks[3], 64, ic * 4)
    p["fc1"] = lin_p(ks[4], 64, 128)
    p["fc_mu"] = lin_p(ks[5], 128, latent_dim)
    p["fc_log_var"] = lin_p(ks[6], 128, latent_dim)
    p["fc2"] = lin_p(ks[7], latent_dim, 64)
    p["dec1"] = convT_p(ks[8], 64, ic * 8)
    p["dec2"] = convT_p(ks[9], ic * 8, ic * 4)
    p["dec3"] = convT_p(ks[10], ic * 4, ic * 2)
    p["dec4"] = convT_p(ks[11], ic * 2, image_channels)
    return p


# ----------------------------------------------------------------------------
# Forward pass (mirrors VAE224.forward).
# ----------------------------------------------------------------------------
def vae224_forward(params, x_nchw, eps_key):
    # NCHW (PyTorch) -> NHWC (kernel layout)
    x = jnp.transpose(x_nchw, (0, 2, 3, 1)).astype(jnp.float32)

    # ---- encode ----
    x = conv2d(x, *params["enc1"], stride=2, padding=1, activation="relu")
    x = conv2d(x, *params["enc2"], stride=2, padding=1, activation="relu")
    x = conv2d(x, *params["enc3"], stride=2, padding=1, activation="relu")
    x = conv2d(x, *params["enc4"], stride=2, padding=0, activation="relu")
    batch = x.shape[0]
    x = jnp.mean(x.astype(jnp.float32), axis=(1, 2)).reshape(batch, -1)  # adaptive_avg_pool2d(., 1)

    # Tiny FC layers: plain jnp (f32) so XLA fuses them (M == batch == 2).
    hidden = x @ params["fc1"][0] + params["fc1"][1]
    mu = hidden @ params["fc_mu"][0] + params["fc_mu"][1]
    log_var = hidden @ params["fc_log_var"][0] + params["fc_log_var"][1]

    # reparameterize (tiny elementwise op; plain JAX)
    std = jnp.exp(0.5 * log_var)
    eps = jax.random.normal(eps_key, std.shape, std.dtype)
    z = mu + eps * std

    # ---- decode ----
    z = z @ params["fc2"][0] + params["fc2"][1]
    x = z.reshape(-1, 1, 1, 64).astype(jnp.bfloat16)          # NHWC view of (-1, 64, 1, 1)
    x = conv_transpose2d(x, *params["dec1"], stride=4, output_padding=0, activation="relu")
    x = conv_transpose2d(x, *params["dec2"], stride=4, output_padding=2, activation="relu")
    x = conv_transpose2d(x, *params["dec3"], stride=4, output_padding=2, activation="relu")
    x = conv_transpose2d(x, *params["dec4"], stride=3, output_padding=1, activation="sigmoid")

    reconstruction = jnp.transpose(x, (0, 3, 1, 2)).astype(jnp.float32)   # back to NCHW
    return reconstruction, mu, log_var


if __name__ == "__main__":
    key = jax.random.PRNGKey(0)
    k_x, k_params, k_eps = jax.random.split(key, 3)

    # Smallest spatial size consistent with the encoder (32 -> 16 -> 8 -> 4 -> 1).
    B, C, H, W = 2, 3, 32, 32
    x = jax.random.normal(k_x, (B, C, H, W), jnp.float32)

    params = init_params(k_params)

    fwd = jax.jit(vae224_forward)
    recon, mu, log_var = fwd(params, x, k_eps)
    jax.block_until_ready((recon, mu, log_var))

    assert recon.shape == (B, 3, 224, 224), recon.shape   # decoder always emits 224x224
    assert mu.shape == (B, 3) and log_var.shape == (B, 3)
    assert bool(jnp.all(jnp.isfinite(recon)))
    assert bool(jnp.all((recon >= 0.0) & (recon <= 1.0)))

    print("KERNEL_OK")
</pallas_src>

<mosaic_0001>
module attributes {stable_mosaic.version = 11 : i64} {
  func.func @_matmul_bias_act_kernel(%arg0: i32, %arg1: memref<512x32xbf16, #tpu.memory_space<vmem>>, %arg2: memref<32x256xbf16, #tpu.memory_space<vmem>>, %arg3: memref<1x256xf32, #tpu.memory_space<vmem>>, %arg4: memref<512x256xbf16, #tpu.memory_space<vmem>>) attributes {dimension_semantics = [#tpu.dimension_semantics<parallel>], iteration_bounds = array<i64: 2>, scalar_prefetch = 0 : i64, scratch_operands = 0 : i64, tpu.core_type = #tpu.core_type<tc>, window_params = [{transform_indices = @transform_0, window_bounds = array<i64: 512, 32>}, {pipeline_mode = #tpu.pipeline_mode<synchronous>, transform_indices = @transform_1, window_bounds = array<i64: 32, 256>}, {pipeline_mode = #tpu.pipeline_mode<synchronous>, transform_indices = @transform_2, window_bounds = array<i64: 1, 256>}, {transform_indices = @transform_3, window_bounds = array<i64: 512, 256>}]} {
    %c0 = arith.constant 0 : index
    %c0_0 = arith.constant 0 : index
    %0 = vector.load %arg1[%c0, %c0_0] : memref<512x32xbf16, #tpu.memory_space<vmem>>, vector<512x32xbf16>
    %c0_1 = arith.constant 0 : index
    %c0_2 = arith.constant 0 : index
    %1 = vector.load %arg2[%c0_1, %c0_2] : memref<32x256xbf16, #tpu.memory_space<vmem>>, vector<32x256xbf16>
    %cst = arith.constant dense<0.000000e+00> : vector<512x256xf32>
    %2 = tpu.matmul %0, %1, %cst {dimension_numbers = #tpu.dot_dimension_numbers<[1], [0], [0], [1], [0, 0, 1, 1], [], []>} : vector<512x32xbf16>, vector<32x256xbf16>, vector<512x256xf32> -> vector<512x256xf32>
    %c0_3 = arith.constant 0 : index
    %c0_4 = arith.constant 0 : index
    %3 = vector.load %arg3[%c0_3, %c0_4] : memref<1x256xf32, #tpu.memory_space<vmem>>, vector<1x256xf32>
    %4 = vector.broadcast %3 : vector<1x256xf32> to vector<512x256xf32>
    %5 = arith.addf %2, %4 : vector<512x256xf32>
    %cst_5 = arith.constant 0.000000e+00 : f32
    %6 = vector.broadcast %cst_5 : f32 to vector<512x256xf32>
    %7 = arith.maximumf %5, %6 : vector<512x256xf32>
    %8 = arith.truncf %7 : vector<512x256xf32> to vector<512x256xbf16>
    %c0_6 = arith.constant 0 : index
    %c0_7 = arith.constant 0 : index
    %9 = vector.load %arg4[%c0_6, %c0_7] : memref<512x256xbf16, #tpu.memory_space<vmem>>, vector<512x256xbf16>
    tpu.vector_store %arg4[%c0_6, %c0_7], %8 {strides = array<i32>} : memref<512x256xbf16, #tpu.memory_space<vmem>>, vector<512x256xbf16>,
    return
  }
  func.func @transform_0(%arg0: i32) -> (i32, i32) {
    %c0_i32 = arith.constant 0 : i32
    %c0_i32_0 = arith.constant 0 : i32
    return %arg0, %c0_i32 : i32, i32
  }
  func.func @transform_1(%arg0: i32) -> (i32, i32) {
    %c0_i32 = arith.constant 0 : i32
    %c0_i32_0 = arith.constant 0 : i32
    %c0_i32_1 = arith.constant 0 : i32
    return %c0_i32, %c0_i32_0 : i32, i32
  }
  func.func @transform_2(%arg0: i32) -> (i32, i32) {
    %c0_i32 = arith.constant 0 : i32
    %c0_i32_0 = arith.constant 0 : i32
    %c0_i32_1 = arith.constant 0 : i32
    return %c0_i32, %c0_i32_0 : i32, i32
  }
  func.func @transform_3(%arg0: i32) -> (i32, i32) {
    %c0_i32 = arith.constant 0 : i32
    %c0_i32_0 = arith.constant 0 : i32
    return %arg0, %c0_i32 : i32, i32
  }
}

module attributes {stable_mosaic.version = 11 : i64} {
  func.func @_matmul_bias_act_kernel(%arg0: i32, %arg1: memref<4096x16xbf16, #tpu.memory_space<vmem>>, %arg2: memref<16x128xbf16, #tpu.memory_space<vmem>>, %arg3: memref<1x128xf32, #tpu.memory_space<vmem>>, %arg4: memref<4096x128xbf16, #tpu.memory_space<vmem>>) attributes {dimension_semantics = [#tpu.dimension_semantics<parallel>], iteration_bounds = array<i64: 3>, scalar_prefetch = 0 : i64, scratch_operands = 0 : i64, tpu.core_type = #tpu.core_type<tc>, window_params = [{transform_indices = @transform_0, window_bounds = array<i64: 4096, 16>}, {pipeline_mode = #tpu.pipeline_mode<synchronous>, transform_indices = @transform_1, window_bounds = array<i64: 16, 128>}, {pipeline_mode = #tpu.pipeline_mode<synchronous>, transform_indices = @transform_2, window_bounds = array<i64: 1, 128>}, {transform_indices = @transform_3, window_bounds = array<i64: 4096, 128>}]} {
    %c0 = arith.constant 0 : index
    %c0_0 = arith.constant 0 : index
    %0 = vector.load %arg1[%c0, %c0_0] : memref<4096x16xbf16, #tpu.memory_space<vmem>>, vector<4096x16xbf16>
    %c0_1 = arith.constant 0 : index
    %c0_2 = arith.constant 0 : index
    %1 = vector.load %arg2[%c0_1, %c0_2] : memref<16x128xbf16, #tpu.memory_space<vmem>>, vector<16x128xbf16>
    %cst = arith.constant dense<0.000000e+00> : vector<4096x128xf32>
    %2 = tpu.matmul %0, %1, %cst {dimension_numbers = #tpu.dot_dimension_numbers<[1], [0], [0], [1], [0, 0, 1, 1], [], []>} : vector<4096x16xbf16>, vector<16x128xbf16>, vector<4096x128xf32> -> vector<4096x128xf32>
    %c0_3 = arith.constant 0 : index
    %c0_4 = arith.constant 0 : index
    %3 = vector.load %arg3[%c0_3, %c0_4] : memref<1x128xf32, #tpu.memory_space<vmem>>, vector<1x128xf32>
    %4 = vector.broadcast %3 : vector<1x128xf32> to vector<4096x128xf32>
    %5 = arith.addf %2, %4 : vector<4096x128xf32>
    %6 = arith.truncf %5 : vector<4096x128xf32> to vector<4096x128xbf16>
    %c0_5 = arith.constant 0 : index
    %c0_6 = arith.constant 0 : index
    %7 = vector.load %arg4[%c0_5, %c0_6] : memref<4096x128xbf16, #tpu.memory_space<vmem>>, vector<4096x128xbf16>
    tpu.vector_store %arg4[%c0_5, %c0_6], %6 {strides = array<i32>} : memref<4096x128xbf16, #tpu.memory_space<vmem>>, vector<4096x128xbf16>,
    return
  }
  func.func @transform_0(%arg0: i32) -> (i32, i32) {
    %c0_i32 = arith.constant 0 : i32
    %c0_i32_0 = arith.constant 0 : i32
    return %arg0, %c0_i32 : i32, i32
  }
  func.func @transform_1(%arg0: i32) -> (i32, i32) {
    %c0_i32 = arith.constant 0 : i32
    %c0_i32_0 = arith.constant 0 : i32
    %c0_i32_1 = arith.constant 0 : i32
    return %c0_i32, %c0_i32_0 : i32, i32
  }
  func.func @transform_2(%arg0: i32) -> (i32, i32) {
    %c0_i32 = arith.constant 0 : i32
    %c0_i32_0 = arith.constant 0 : i32
    %c0_i32_1 = arith.constant 0 : i32
    return %c0_i32, %c0_i32_0 : i32, i32
  }
  func.func @transform_3(%arg0: i32) -> (i32, i32) {
    %c0_i32 = arith.constant 0 : i32
    %c0_i32_0 = arith.constant 0 : i32
    return %arg0, %c0_i32 : i32, i32
  }
}

</mosaic_0001>

<bundles_post_ra>
// kernel: tile.18
= control target key start
LH: loop header
LB: loop body
LE: loop exit
PB: predicated region body
PF: predicated region fallthrough
CT: control target
= control target key end

     0   :  { %s28_s0 = inlined_call_operand.vmem [shape: f32[64], index: 0, kind: input, shape index: {}]   ;;  %s29_s1 = inlined_call_operand.vmem [shape: f32[16,64], index: 1, kind: output, shape index: {}]  }
   0x1   :  { %v4_v0 = vld [vmem:[%s28_s0] ss:$0 sm:$0xff] }
   0x2   :  { %5 = vst [vmem:[%s29_s1] sm:$0xff] %v4_v0 }
   0x3   :  { %8 = vst [vmem:[%s29_s1 + $0x8] sm:$0xff] %v4_v0 }

// kernel: tile.23
= control target key start
LH: loop header
LB: loop body
LE: loop exit
PB: predicated region body
PF: predicated region fallthrough
CT: control target
= control target key end

     0   :  { %s28_s0 = inlined_call_operand.vmem [shape: f32[32], index: 0, kind: input, shape index: {}]   ;;  %s29_s1 = inlined_call_operand.vmem [shape: f32[16,32], index: 1, kind: output, shape index: {}]  }
   0x1   :  { %v4_v0 = vld [vmem:[%s28_s0] ss:$0 sm:$0xff] }
   0x2   :  { %5 = vst [vmem:[%s29_s1] sm:$0xff] %v4_v0 }
   0x3   :  { %8 = vst [vmem:[%s29_s1 + $0x8] sm:$0xff] %v4_v0 }

// kernel: tile.28
= control target key start
LH: loop header
LB: loop body
LE: loop exit
PB: predicated region body
PF: predicated region fallthrough
CT: control target
= control target key end

     0   :  { %s28_s0 = inlined_call_operand.vmem [shape: f32[16], index: 0, kind: input, shape index: {}]   ;;  %s29_s1 = inlined_call_operand.vmem [shape: f32[16,16], index: 1, kind: output, shape index: {}]  }
   0x1   :  { %v4_v0 = vld [vmem:[%s28_s0] ss:$0 sm:$0xff] }
   0x2   :  { %5 = vst [vmem:[%s29_s1] sm:$0xff] %v4_v0 }
   0x3   :  { %8 = vst [vmem:[%s29_s1 + $0x8] sm:$0xff] %v4_v0 }

// kernel: tile.29
= control target key start
LH: loop header
LB: loop body
LE: loop exit
PB: predicated region body
PF: predicated region fallthrough
CT: control target
= control target key end

     0   :  { %s7_s6 = smov 3  ;;  %s21_s9 = smov 3  ;;  %vm4_vm0 = vcmask 130048   ;;  %vm11_vm1 = vcmask 1048448   ;;  %vm18_vm2 = vcmask 917248   ;;  %vm25_vm3 = vcmask 786048   ;;  %s129_s0 = inlined_call_operand.vmem [shape: f32[16,16], index: 0, kind: input, shape index: {}]   ;;  %s130_s1 = inlined_call_operand.vmem [shape: f32[1,256], index: 1, kind: output, shape index: {}]  }
   0x1   :  { %v67_v0 = vld [vmem:[%s129_s0 + $0x7] ss:$8 sm:%s7_s6]   ;;  %s82_s10 = smov 112   ;;  %v69_v1 = vld [vmem:[%s129_s0 + $0x5] ss:$8 sm:%s21_s9]   ;;  %s83_s13 = smov 80  }
   0x2   :  { %9 = vrot.lane.b32.xlu0 %v67_v0, %s82_s10  ;;  %23 = vrot.lane.b32.xlu1 %v69_v1, %s83_s13  ;;  %s14_s14 = smov 3  ;;  %s28_s15 = smov 3  ;;  %vm32_vm4 = vcmask 654848   ;;  %vm39_vm5 = vcmask 523648   ;;  %vm46_vm6 = vcmask 392448   ;;  %vm53_vm7 = vcmask 261248  }
   0x3   :  { %s35_s16 = smov 3  ;;  %v68_v3 = vld [vmem:[%s129_s0 + $0x6] ss:$8 sm:%s14_s14]   ;;  %s84_s21 = smov 48   ;;  %v70_v4 = vld [vmem:[%s129_s0 + $0x4] ss:$8 sm:%s28_s15]  }
   0x4   :  { %v71_v2 = vld [vmem:[%s129_s0 + $0x3] ss:$8 sm:%s35_s16]   ;;  %s42_s24 = smov 3  ;;  %s85_s25 = smov 96  }
   0x5   :  { %37 = vrot.lane.b32.xlu2 %v71_v2, %s84_s21  ;;  %s86_s26 = smov 64   ;;  %s49_s27 = smov 3  ;;  %v72_v5 = vld [vmem:[%s129_s0 + $0x2] ss:$8 sm:%s42_s24]  }
   0x6   :  { %v73_v6 = vld [vmem:[%s129_s0 + $0x1] ss:$8 sm:%s49_s27]   ;;  %s87_s3 = smov 32   ;;  %s88_s4 = smov 16  }
   0x7   :  { %s2_s5 = smov 3 }
   0x8   :  { %v3_v7 = vld [vmem:[%s129_s0] ss:$8 sm:%s2_s5]  }
   0x9   :  { %5 = vst.msk [vmem:[#allocation0] ss:$8 sm:$0x3] %vm4_vm0, %v3_v7  }
   0xa   :  { %16 = vrot.lane.b32.xlu0 %v68_v3, %s85_s25  ;;  %30 = vrot.lane.b32.xlu1 %v70_v4, %s86_s26 }
   0xd   :  { %44 = vrot.lane.b32.xlu2 %v72_v5, %s87_s3 }
  0x12   :  { %51 = vrot.lane.b32.xlu0 %v73_v6, %s88_s4 }
  0x5f   :  { %v38_v8 = vpop.permute.xlu2 %37  }
  0x67   :  { %v45_v9 = vpop.permute.xlu2 %44  }
  0x74   :  { %v10_v10 = vpop.permute.xlu0 %9   ;;  %v24_v11 = vpop.permute.xlu1 %23  }
  0x75   :  { %12 = vst.msk [vmem:[#allocation0] ss:$8 sm:$0x3] %vm11_vm1, %v10_v10  }
  0x7c   :  { %v17_v12 = vpop.permute.xlu0 %16   ;;  %v31_v13 = vpop.permute.xlu1 %30  }
  0x7d   :  { %19 = vst.msk [vmem:[#allocation0] ss:$8 sm:$0x3] %vm18_vm2, %v17_v12  }
  0x7e   :  { %26 = vst.msk [vmem:[#allocation0] ss:$8 sm:$0x3] %vm25_vm3, %v24_v11  }
  0x7f   :  { %33 = vst.msk [vmem:[#allocation0] ss:$8 sm:$0x3] %vm32_vm4, %v31_v13  }
  0x80   :  { %40 = vst.msk [vmem:[#allocation0] ss:$8 sm:$0x3] %vm39_vm5, %v38_v8  }
  0x81   :  { %47 = vst.msk [vmem:[#allocation0] ss:$8 sm:$0x3] %vm46_vm6, %v45_v9  }
  0x84   :  { %v52_v14 = vpop.permute.xlu0 %51  }
  0x85   :  { %54 = vst.msk [vmem:[#allocation0] ss:$8 sm:$0x3] %vm53_vm7, %v52_v14  }
  0x8c   :  { %v57_v15 = vld [vmem:[#allocation0] sm:$0x1]  ;;  %v62_v16 = vld [vmem:[#allocation0 + $0x8] sm:$0x1] }
  0x8d   :  { %60 = vst [vmem:[%s130_s1] sm:$0x1] %v57_v15 }
  0x8e   :  { %74 = vst [vmem:[%s130_s1 + $0x1] sm:$0x1] %v62_v16 }

// kernel: vae224_forward.2
= control target key start
LH: loop header
LB: loop body
LE: loop exit
PB: predicated region body
PF: predicated region fallthrough
CT: control target
= control target key end

     0   :  { %s1477_s12 = smov 0   ;;  %s1821_s0 = inlined_call_operand.vmem [shape: bf16[1024,32], index: 0, kind: input, shape index: {}]   ;;  %s1822_s1 = inlined_call_operand.vmem [shape: bf16[32,256], index: 1, kind: input, shape index: {}]   ;;  %s1823_s2 = inlined_call_operand.vmem [shape: f32[1,256], index: 2, kind: input, shape index: {}]   ;;  %s1824_s3 = inlined_call_operand.vmem [shape: bf16[1024,256], index: 3, kind: output, shape index: {}]  }
   0x1 LB: > { %s1180_s13 = sadd.s32 4294967295, %s1455_s12   ;;  %p1184_p0 = scmp.ge.s32.totalorder %s1455_s12, 1  ;;  %s1455_s12 = sphi %s1477_s12, %s13_s12  }
   0x2   : > { %p138_p1 = scmp.lt.s32.totalorder %s1455_s12, 3 }
   0x4   : > { %p139_p2 = pnand %p1184_p0, %p138_p1 }
   0x5   : > { %s1185_s30 = sshll.u32 (!%p139_p2), %s1180_s13, 6 }
   0x6   : > { %142 = sbr.rel (%p139_p2) target bundleno = 409 (0x199), region = 32  ;;  %p164_p3 = scmp.lt.s32.totalorder (!%p139_p2), %s1185_s30, 127 }
   0xb   : > { %v1328_v0 = vld [vmem:[%s1822_s1 + $0x10] sm:$0xf]  ;;  %v1436_v1 = vld [vmem:[%s1822_s1 + $0x14] sm:$0xf0]  ;;  %v1435_v2 = vld [vmem:[%s1822_s1 + $0x14] sm:$0xf] }
   0xc   : > { %v1329_v3 = vor.u32 %v1436_v1, %v1328_v0  ;;  %v1330_v4 = vld [vmem:[%s1822_s1 + $0x18] sm:$0xf0]  ;;  %v1320_v5 = vld [vmem:[%s1822_s1] sm:$0xf]  ;;  %v1434_v6 = vld [vmem:[%s1822_s1 + $0x4] sm:$0xf0] }
   0xd   : > { %v1333_v7 = vor.u32 %v1435_v2, %v1330_v4  ;;  %v1433_v8 = vld [vmem:[%s1822_s1 + $0x4] sm:$0xf]  ;;  %v1322_v9 = vld [vmem:[%s1822_s1 + $0x8] sm:$0xf0]  ;;  %v1321_v10 = vor.u32 %v1434_v6, %v1320_v5  ;;  %s1826_s30 = smov (!%p164_p3, %s1185_s30), 127  ;;  %vm431_vm0 = vcmask 261120  }
   0xe   : > { %534 = vmatpush.bf16.msra.mxu0 %v1329_v3  ;;  %1437 = vmatpush.bf16.msra.mxu2 %v1329_v3  ;;  %v1325_v11 = vor.u32 %v1433_v8, %v1322_v9  ;;  %s1186_s4 = sshll.u32 %s1826_s30, 2  ;;  %v245_v28 = vld [vmem:[%s1823_s2] sm:$0x3]  ;;  %s1400_s10 = sshll.u32 %s1826_s30, 3 }
   0xf   : > { %703 = vmatpush.bf16.msra.mxu1 %v1333_v7  ;;  %1439 = vmatpush.bf16.msra.mxu3 %v1333_v7  ;;  %s1515_s7 = scalar_lea.vmem %s1821_s0, %s1186_s4  ;;  %v1568_v29 = vperm.slane %v245_v28, 0  ;;  %v1570_v30 = vperm.slane %v245_v28, 1  ;;  %s1584_s14 = scalar_lea.vmem %s1824_s3, %s1400_s10 }
  0x10   : > { %v1401_v12 = vld [vmem:[%s1515_s7] sm:$0xff]  ;;  %v1402_v14 = vld [vmem:[%s1515_s7 + $0x8] sm:$0xff]  ;;  %v1403_v16 = vld [vmem:[%s1515_s7 + $0x10] sm:$0xff] }
  0x11   : > { %v1417_v13 = vld [vmem:[%s1515_s7 + $0x80] sm:$0xff]  ;;  %v1418_v15 = vld [vmem:[%s1515_s7 + $0x88] sm:$0xff]  ;;  %v1419_v17 = vld [vmem:[%s1515_s7 + $0x90] sm:$0xff] }
  0x12   : > { %535 = vmatpush.bf16.msra.mxu0 %v1321_v10  ;;  %1438 = vmatpush.bf16.msra.mxu2 %v1321_v10  ;;  %v1404_v18 = vld [vmem:[%s1515_s7 + $0x18] sm:$0xff]  ;;  %v1405_v20 = vld [vmem:[%s1515_s7 + $0x20] sm:$0xff]  ;;  %v1406_v22 = vld [vmem:[%s1515_s7 + $0x28] sm:$0xff] }
  0x13   : > { %704 = vmatpush.bf16.msra.mxu1 %v1325_v11  ;;  %1440 = vmatpush.bf16.msra.mxu3 %v1325_v11  ;;  %v1420_v19 = vld [vmem:[%s1515_s7 + $0x98] sm:$0xff]  ;;  %v1421_v21 = vld [vmem:[%s1515_s7 + $0xa0] sm:$0xff]  ;;  %v1422_v23 = vld [vmem:[%s1515_s7 + $0xa8] sm:$0xff] }
  0x14   : > { %v1407_v24 = vld [vmem:[%s1515_s7 + $0x30] sm:$0xff]  ;;  %v1408_v26 = vld [vmem:[%s1515_s7 + $0x38] sm:$0xff]  ;;  %v1409_v31 = vld [vmem:[%s1515_s7 + $0x40] sm:$0xff] }
  0x15   : > { %1334 = vmatmul.msk.bf16.vlgmr.msra.gmra.mxu0 %vm431_vm0, %v1401_v12  ;;  %1350 = vmatmul.msk.bf16.vlgmr.msra.gmra.mxu2 %vm431_vm0, %v1417_v13  ;;  %v1423_v25 = vld [vmem:[%s1515_s7 + $0xb0] sm:$0xff]  ;;  %v1424_v27 = vld [vmem:[%s1515_s7 + $0xb8] sm:$0xff]  ;;  %v1425_v32 = vld [vmem:[%s1515_s7 + $0xc0] sm:$0xff] }
  0x16   : > { %1366 = vmatmul.msk.bf16.vlgmr.msra.gmra.mxu1 %vm431_vm0, %v1401_v12  ;;  %1382 = vmatmul.msk.bf16.vlgmr.msra.gmra.mxu3 %vm431_vm0, %v1417_v13  ;;  %v1410_v57 = vld [vmem:[%s1515_s7 + $0x48] sm:$0xff] }
  0x17   : > { %v1426_v58 = vld [vmem:[%s1515_s7 + $0xc8] sm:$0xff] }
  0x25   : > { %1335 = vmatmul.msk.bf16.gmra.mxu0 %vm431_vm0, %v1402_v14  ;;  %1351 = vmatmul.msk.bf16.gmra.mxu2 %vm431_vm0, %v1418_v15 }
  0x26   : > { %1367 = vmatmul.msk.bf16.gmra.mxu1 %vm431_vm0, %v1402_v14  ;;  %1383 = vmatmul.msk.bf16.gmra.mxu3 %vm431_vm0, %v1418_v15 }
  0x35   : > { %1336 = vmatmul.msk.bf16.gmra.mxu0 %vm431_vm0, %v1403_v16  ;;  %1352 = vmatmul.msk.bf16.gmra.mxu2 %vm431_vm0, %v1419_v17 }
  0x36   : > { %1368 = vmatmul.msk.bf16.gmra.mxu1 %vm431_vm0, %v1403_v16  ;;  %1384 = vmatmul.msk.bf16.gmra.mxu3 %vm431_vm0, %v1419_v17 }
  0x45   : > { %1337 = vmatmul.msk.bf16.gmra.mxu0 %vm431_vm0, %v1404_v18  ;;  %1353 = vmatmul.msk.bf16.gmra.mxu2 %vm431_vm0, %v1420_v19 }
  0x46   : > { %1369 = vmatmul.msk.bf16.gmra.mxu1 %vm431_vm0, %v1404_v18  ;;  %1385 = vmatmul.msk.bf16.gmra.mxu3 %vm431_vm0, %v1420_v19 }
  0x55   : > { %1338 = vmatmul.msk.bf16.gmra.mxu0 %vm431_vm0, %v1405_v20  ;;  %1354 = vmatmul.msk.bf16.gmra.mxu2 %vm431_vm0, %v1421_v21 }
  0x56   : > { %1370 = vmatmul.msk.bf16.gmra.mxu1 %vm431_vm0, %v1405_v20  ;;  %1386 = vmatmul.msk.bf16.gmra.mxu3 %vm431_vm0, %v1421_v21 }
  0x65   : > { %1339 = vmatmul.msk.bf16.gmra.mxu0 %vm431_vm0, %v1406_v22  ;;  %1355 = vmatmul.msk.bf16.gmra.mxu2 %vm431_vm0, %v1422_v23 }
  0x66   : > { %1371 = vmatmul.msk.bf16.gmra.mxu1 %vm431_vm0, %v1406_v22  ;;  %1387 = vmatmul.msk.bf16.gmra.mxu3 %vm431_vm0, %v1422_v23  ;;  %v1411_v23 = vld [vmem:[%s1515_s7 + $0x50] sm:$0xff] }
  0x75   : > { %1340 = vmatmul.msk.bf16.gmra.mxu0 %vm431_vm0, %v1407_v24  ;;  %1356 = vmatmul.msk.bf16.gmra.mxu2 %vm431_vm0, %v1423_v25 }
  0x76   : > { %1372 = vmatmul.msk.bf16.gmra.mxu1 %vm431_vm0, %v1407_v24  ;;  %1388 = vmatmul.msk.bf16.gmra.mxu3 %vm431_vm0, %v1423_v25  ;;  %v1427_v24 = vld [vmem:[%s1515_s7 + $0xd0] sm:$0xff] }
  0x85   : > { %1341 = vmatmul.msk.bf16.gmra.mxu0 %vm431_vm0, %v1408_v26  ;;  %1357 = vmatmul.msk.bf16.gmra.mxu2 %vm431_vm0, %v1424_v27 }
  0x86   : > { %1373 = vmatmul.msk.bf16.gmra.mxu1 %vm431_vm0, %v1408_v26  ;;  %1389 = vmatmul.msk.bf16.gmra.mxu3 %vm431_vm0, %v1424_v27 }
  0x92   : > { %v537_v33 = vpop.f32.mrf.mxu0 }
  0x93   : > { %v538_v34 = vadd.f32 %v537_v33, %v1568_v29  ;;  %v706_v35 = vpop.f32.mrf.mxu1 }
  0x94   : > { %v707_v36 = vadd.f32 %v706_v35, %v1570_v30 }
  0x95   : > { %v866_v37 = vmax.f32 %v538_v34, 0.0  ;;  %1342 = vmatmul.msk.bf16.gmra.mxu0 %vm431_vm0, %v1409_v31  ;;  %1358 = vmatmul.msk.bf16.gmra.mxu2 %vm431_vm0, %v1425_v32 }
  0x96   : > { %v867_v38 = vmax.f32 %v707_v36, 0.0  ;;  %1374 = vmatmul.msk.bf16.gmra.mxu1 %vm431_vm0, %v1409_v31  ;;  %1390 = vmatmul.msk.bf16.gmra.mxu3 %vm431_vm0, %v1425_v32 }
  0x98   : > { %v994_v39 = vpack.c.bf16 %v867_v38, %v866_v37  ;;  %v617_v40 = vpop.f32.mrf.mxu2 }
  0x99   : > { %v618_v41 = vadd.f32 %v617_v40, %v1568_v29  ;;  %v786_v42 = vpop.f32.mrf.mxu3 }
  0x9a   : > { %1058 = vst [vmem:[%s1584_s14] sm:$0xff] %v994_v39  ;;  %v787_v43 = vadd.f32 %v786_v42, %v1570_v30  ;;  %v539_v44 = vpop.f32.mrf.mxu0 }
  0x9b   : > { %v930_v45 = vmax.f32 %v618_v41, 0.0  ;;  %v540_v46 = vadd.f32 %v539_v44, %v1568_v29  ;;  %v708_v47 = vpop.f32.mrf.mxu1 }
  0x9c   : > { %v931_v48 = vmax.f32 %v787_v43, 0.0  ;;  %v709_v49 = vadd.f32 %v708_v47, %v1570_v30 }
  0x9d   : > { %v868_v50 = vmax.f32 %v540_v46, 0.0 }
  0x9e   : > { %v1026_v51 = vpack.c.bf16 %v931_v48, %v930_v45  ;;  %v869_v52 = vmax.f32 %v709_v49, 0.0 }
  0xa0   : > { %1090 = vst [vmem:[%s1584_s14 + $0x100] sm:$0xff] %v1026_v51  ;;  %v995_v53 = vpack.c.bf16 %v869_v52, %v868_v50  ;;  %v619_v54 = vpop.f32.mrf.mxu2 }
  0xa1   : > { %v620_v55 = vadd.f32 %v619_v54, %v1568_v29  ;;  %v788_v56 = vpop.f32.mrf.mxu3 }
  0xa2   : > { %1059 = vst [vmem:[%s1584_s14 + $0x8] sm:$0xff] %v995_v53  ;;  %v789_v59 = vadd.f32 %v788_v56, %v1570_v30  ;;  %v542_v60 = vpop.f32.mrf.mxu0  ;;  %v1428_v56 = vld [vmem:[%s1515_s7 + $0xd8] sm:$0xff] }
  0xa3   : > { %v932_v61 = vmax.f32 %v620_v55, 0.0  ;;  %v543_v62 = vadd.f32 %v542_v60, %v1568_v29  ;;  %v711_v63 = vpop.f32.mrf.mxu1  ;;  %v1412_v55 = vld [vmem:[%s1515_s7 + $0x58] sm:$0xff] }
  0xa4   : > { %v933_v0 = vmax.f32 %v789_v59, 0.0  ;;  %v712_v1 = vadd.f32 %v711_v63, %v1570_v30 }
  0xa5   : > { %v870_v2 = vmax.f32 %v543_v62, 0.0  ;;  %1343 = vmatmul.msk.bf16.gmra.mxu0 %vm431_vm0, %v1410_v57  ;;  %1359 = vmatmul.msk.bf16.gmra.mxu2 %vm431_vm0, %v1426_v58 }
  0xa6   : > { %v1027_v3 = vpack.c.bf16 %v933_v0, %v932_v61  ;;  %v871_v4 = vmax.f32 %v712_v1, 0.0  ;;  %1375 = vmatmul.msk.bf16.gmra.mxu1 %vm431_vm0, %v1410_v57  ;;  %1391 = vmatmul.msk.bf16.gmra.mxu3 %vm431_vm0, %v1426_v58 }
  0xa8   : > { %1091 = vst [vmem:[%s1584_s14 + $0x108] sm:$0xff] %v1027_v3  ;;  %v996_v5 = vpack.c.bf16 %v871_v4, %v870_v2  ;;  %v622_v6 = vpop.f32.mrf.mxu2 }
  0xa9   : > { %v623_v7 = vadd.f32 %v622_v6, %v1568_v29  ;;  %v791_v8 = vpop.f32.mrf.mxu3 }
  0xaa   : > { %1060 = vst [vmem:[%s1584_s14 + $0x10] sm:$0xff] %v996_v5  ;;  %v792_v9 = vadd.f32 %v791_v8, %v1570_v30  ;;  %v544_v10 = vpop.f32.mrf.mxu0 }
  0xab   : > { %v934_v11 = vmax.f32 %v623_v7, 0.0  ;;  %v545_v12 = vadd.f32 %v544_v10, %v1568_v29  ;;  %v713_v13 = vpop.f32.mrf.mxu1 }
  0xac   : > { %v935_v14 = vmax.f32 %v792_v9, 0.0  ;;  %v714_v15 = vadd.f32 %v713_v13, %v1570_v30 }
  0xad   : > { %v872_v16 = vmax.f32 %v545_v12, 0.0 }
  0xae   : > { %v1028_v17 = vpack.c.bf16 %v935_v14, %v934_v11  ;;  %v873_v18 = vmax.f32 %v714_v15, 0.0 }
  0xb0   : > { %1092 = vst [vmem:[%s1584_s14 + $0x110] sm:$0xff] %v1028_v17  ;;  %v997_v19 = vpack.c.bf16 %v873_v18, %v872_v16  ;;  %v624_v20 = vpop.f32.mrf.mxu2 }
  0xb1   : > { %v625_v21 = vadd.f32 %v624_v20, %v1568_v29  ;;  %v793_v22 = vpop.f32.mrf.mxu3 }
  0xb2   : > { %1061 = vst [vmem:[%s1584_s14 + $0x18] sm:$0xff] %v997_v19  ;;  %v794_v25 = vadd.f32 %v793_v22, %v1570_v30  ;;  %v547_v26 = vpop.f32.mrf.mxu0  ;;  %v1429_v22 = vld [vmem:[%s1515_s7 + $0xe0] sm:$0xff] }
  0xb3   : > { %v936_v27 = vmax.f32 %v625_v21, 0.0  ;;  %v548_v28 = vadd.f32 %v547_v26, %v1568_v29  ;;  %v716_v31 = vpop.f32.mrf.mxu1  ;;  %v1413_v21 = vld [vmem:[%s1515_s7 + $0x60] sm:$0xff] }
  0xb4   : > { %v937_v32 = vmax.f32 %v794_v25, 0.0  ;;  %v717_v33 = vadd.f32 %v716_v31, %v1570_v30 }
  0xb5   : > { %v874_v34 = vmax.f32 %v548_v28, 0.0  ;;  %1344 = vmatmul.msk.bf16.gmra.mxu0 %vm431_vm0, %v1411_v23  ;;  %1360 = vmatmul.msk.bf16.gmra.mxu2 %vm431_vm0, %v1427_v24 }
  0xb6   : > { %v1029_v35 = vpack.c.bf16 %v937_v32, %v936_v27  ;;  %v875_v36 = vmax.f32 %v717_v33, 0.0  ;;  %1376 = vmatmul.msk.bf16.gmra.mxu1 %vm431_vm0, %v1411_v23  ;;  %1392 = vmatmul.msk.bf16.gmra.mxu3 %vm431_vm0, %v1427_v24 }
  0xb8   : > { %1093 = vst [vmem:[%s1584_s14 + $0x118] sm:$0xff] %v1029_v35  ;;  %v998_v37 = vpack.c.bf16 %v875_v36, %v874_v34  ;;  %v627_v38 = vpop.f32.mrf.mxu2 }
  0xb9   : > { %v628_v39 = vadd.f32 %v627_v38, %v1568_v29  ;;  %v796_v40 = vpop.f32.mrf.mxu3 }
  0xba   : > { %1062 = vst [vmem:[%s1584_s14 + $0x20] sm:$0xff] %v998_v37  ;;  %v797_v41 = vadd.f32 %v796_v40, %v1570_v30  ;;  %v549_v42 = vpop.f32.mrf.mxu0 }
  0xbb   : > { %v938_v43 = vmax.f32 %v628_v39, 0.0  ;;  %v550_v44 = vadd.f32 %v549_v42, %v1568_v29  ;;  %v718_v45 = vpop.f32.mrf.mxu1 }
  0xbc   : > { %v939_v46 = vmax.f32 %v797_v41, 0.0  ;;  %v719_v47 = vadd.f32 %v718_v45, %v1570_v30 }
  0xbd   : > { %v876_v48 = vmax.f32 %v550_v44, 0.0 }
  0xbe   : > { %v1030_v49 = vpack.c.bf16 %v939_v46, %v938_v43  ;;  %v877_v50 = vmax.f32 %v719_v47, 0.0 }
  0xc0   : > { %1094 = vst [vmem:[%s1584_s14 + $0x120] sm:$0xff] %v1030_v49  ;;  %v999_v51 = vpack.c.bf16 %v877_v50, %v876_v48  ;;  %v629_v52 = vpop.f32.mrf.mxu2 }
  0xc1   : > { %v630_v53 = vadd.f32 %v629_v52, %v1568_v29  ;;  %v798_v54 = vpop.f32.mrf.mxu3 }
  0xc2   : > { %1063 = vst [vmem:[%s1584_s14 + $0x28] sm:$0xff] %v999_v51  ;;  %v799_v57 = vadd.f32 %v798_v54, %v1570_v30  ;;  %v552_v58 = vpop.f32.mrf.mxu0  ;;  %v1430_v54 = vld [vmem:[%s1515_s7 + $0xe8] sm:$0xff] }
  0xc3   : > { %v940_v59 = vmax.f32 %v630_v53, 0.0  ;;  %v553_v60 = vadd.f32 %v552_v58, %v1568_v29  ;;  %v721_v61 = vpop.f32.mrf.mxu1  ;;  %v1414_v53 = vld [vmem:[%s1515_s7 + $0x68] sm:$0xff] }
  0xc4   : > { %v941_v62 = vmax.f32 %v799_v57, 0.0  ;;  %v722_v63 = vadd.f32 %v721_v61, %v1570_v30 }
  0xc5   : > { %v878_v0 = vmax.f32 %v553_v60, 0.0  ;;  %1345 = vmatmul.msk.bf16.gmra.mxu0 %vm431_vm0, %v1412_v55  ;;  %1361 = vmatmul.msk.bf16.gmra.mxu2 %vm431_vm0, %v1428_v56 }
  0xc6   : > { %v1031_v1 = vpack.c.bf16 %v941_v62, %v940_v59  ;;  %v879_v2 = vmax.f32 %v722_v63, 0.0  ;;  %1377 = vmatmul.msk.bf16.gmra.mxu1 %vm431_vm0, %v1412_v55  ;;  %1393 = vmatmul.msk.bf16.gmra.mxu3 %vm431_vm0, %v1428_v56 }
  0xc8   : > { %1095 = vst [vmem:[%s1584_s14 + $0x128] sm:$0xff] %v1031_v1  ;;  %v1000_v3 = vpack.c.bf16 %v879_v2, %v878_v0  ;;  %v632_v4 = vpop.f32.mrf.mxu2 }
  0xc9   : > { %v633_v5 = vadd.f32 %v632_v4, %v1568_v29  ;;  %v801_v6 = vpop.f32.mrf.mxu3 }
  0xca   : > { %1064 = vst [vmem:[%s1584_s14 + $0x30] sm:$0xff] %v1000_v3  ;;  %v802_v7 = vadd.f32 %v801_v6, %v1570_v30  ;;  %v554_v8 = vpop.f32.mrf.mxu0 }
  0xcb   : > { %v942_v9 = vmax.f32 %v633_v5, 0.0  ;;  %v555_v10 = vadd.f32 %v554_v8, %v1568_v29  ;;  %v723_v11 = vpop.f32.mrf.mxu1 }
  0xcc   : > { %v943_v12 = vmax.f32 %v802_v7, 0.0  ;;  %v724_v13 = vadd.f32 %v723_v11, %v1570_v30 }
  0xcd   : > { %v880_v14 = vmax.f32 %v555_v10, 0.0 }
  0xce   : > { %v1032_v15 = vpack.c.bf16 %v943_v12, %v942_v9  ;;  %v881_v16 = vmax.f32 %v724_v13, 0.0 }
  0xd0   : > { %1096 = vst [vmem:[%s1584_s14 + $0x130] sm:$0xff] %v1032_v15  ;;  %v1001_v17 = vpack.c.bf16 %v881_v16, %v880_v14  ;;  %v634_v18 = vpop.f32.mrf.mxu2 }
  0xd1   : > { %v635_v19 = vadd.f32 %v634_v18, %v1568_v29  ;;  %v803_v20 = vpop.f32.mrf.mxu3 }
  0xd2   : > { %1065 = vst [vmem:[%s1584_s14 + $0x38] sm:$0xff] %v1001_v17  ;;  %v804_v23 = vadd.f32 %v803_v20, %v1570_v30  ;;  %v557_v24 = vpop.f32.mrf.mxu0  ;;  %v1431_v20 = vld [vmem:[%s1515_s7 + $0xf0] sm:$0xff] }
  0xd3   : > { %v944_v25 = vmax.f32 %v635_v19, 0.0  ;;  %v558_v26 = vadd.f32 %v557_v24, %v1568_v29  ;;  %v726_v27 = vpop.f32.mrf.mxu1  ;;  %v1415_v19 = vld [vmem:[%s1515_s7 + $0x70] sm:$0xff] }
  0xd4   : > { %v945_v28 = vmax.f32 %v804_v23, 0.0  ;;  %v727_v31 = vadd.f32 %v726_v27, %v1570_v30 }
  0xd5   : > { %v882_v32 = vmax.f32 %v558_v26, 0.0  ;;  %1346 = vmatmul.msk.bf16.gmra.mxu0 %vm431_vm0, %v1413_v21  ;;  %1362 = vmatmul.msk.bf16.gmra.mxu2 %vm431_vm0, %v1429_v22 }
  0xd6   : > { %v1033_v33 = vpack.c.bf16 %v945_v28, %v944_v25  ;;  %v883_v34 = vmax.f32 %v727_v31, 0.0  ;;  %1378 = vmatmul.msk.bf16.gmra.mxu1 %vm431_vm0, %v1413_v21  ;;  %1394 = vmatmul.msk.bf16.gmra.mxu3 %vm431_vm0, %v1429_v22 }
  0xd8   : > { %1097 = vst [vmem:[%s1584_s14 + $0x138] sm:$0xff] %v1033_v33  ;;  %v1002_v35 = vpack.c.bf16 %v883_v34, %v882_v32  ;;  %v637_v36 = vpop.f32.mrf.mxu2 }
  0xd9   : > { %v638_v37 = vadd.f32 %v637_v36, %v1568_v29  ;;  %v806_v38 = vpop.f32.mrf.mxu3 }
  0xda   : > { %1066 = vst [vmem:[%s1584_s14 + $0x40] sm:$0xff] %v1002_v35  ;;  %v807_v39 = vadd.f32 %v806_v38, %v1570_v30  ;;  %v559_v40 = vpop.f32.mrf.mxu0 }
  0xdb   : > { %v946_v41 = vmax.f32 %v638_v37, 0.0  ;;  %v560_v42 = vadd.f32 %v559_v40, %v1568_v29  ;;  %v728_v43 = vpop.f32.mrf.mxu1 }
  0xdc   : > { %v947_v44 = vmax.f32 %v807_v39, 0.0  ;;  %v729_v45 = vadd.f32 %v728_v43, %v1570_v30 }
  0xdd   : > { %v884_v46 = vmax.f32 %v560_v42, 0.0 }
  0xde   : > { %v1034_v47 = vpack.c.bf16 %v947_v44, %v946_v41  ;;  %v885_v48 = vmax.f32 %v729_v45, 0.0 }
  0xe0   : > { %1098 = vst [vmem:[%s1584_s14 + $0x140] sm:$0xff] %v1034_v47  ;;  %v1003_v49 = vpack.c.bf16 %v885_v48, %v884_v46  ;;  %v639_v50 = vpop.f32.mrf.mxu2 }
  0xe1   : > { %v640_v51 = vadd.f32 %v639_v50, %v1568_v29  ;;  %v808_v52 = vpop.f32.mrf.mxu3 }
  0xe2   : > { %1067 = vst [vmem:[%s1584_s14 + $0x48] sm:$0xff] %v1003_v49  ;;  %v809_v55 = vadd.f32 %v808_v52, %v1570_v30  ;;  %v562_v56 = vpop.f32.mrf.mxu0  ;;  %v1432_v52 = vld [vmem:[%s1515_s7 + $0xf8] sm:$0xff] }
  0xe3   : > { %v948_v57 = vmax.f32 %v640_v51, 0.0  ;;  %v563_v58 = vadd.f32 %v562_v56, %v1568_v29  ;;  %v731_v59 = vpop.f32.mrf.mxu1  ;;  %v1416_v51 = vld [vmem:[%s1515_s7 + $0x78] sm:$0xff] }
  0xe4   : > { %v949_v60 = vmax.f32 %v809_v55, 0.0  ;;  %v732_v61 = vadd.f32 %v731_v59, %v1570_v30 }
  0xe5   : > { %v886_v62 = vmax.f32 %v563_v58, 0.0  ;;  %1347 = vmatmul.msk.bf16.gmra.mxu0 %vm431_vm0, %v1414_v53  ;;  %1363 = vmatmul.msk.bf16.gmra.mxu2 %vm431_vm0, %v1430_v54 }
  0xe6   : > { %v1035_v63 = vpack.c.bf16 %v949_v60, %v948_v57  ;;  %v887_v0 = vmax.f32 %v732_v61, 0.0  ;;  %1379 = vmatmul.msk.bf16.gmra.mxu1 %vm431_vm0, %v1414_v53  ;;  %1395 = vmatmul.msk.bf16.gmra.mxu3 %vm431_vm0, %v1430_v54 }
  0xe8   : > { %1099 = vst [vmem:[%s1584_s14 + $0x148] sm:$0xff] %v1035_v63  ;;  %v1004_v1 = vpack.c.bf16 %v887_v0, %v886_v62  ;;  %v642_v2 = vpop.f32.mrf.mxu2 }
  0xe9   : > { %v643_v3 = vadd.f32 %v642_v2, %v1568_v29  ;;  %v811_v4 = vpop.f32.mrf.mxu3 }
  0xea   : > { %1068 = vst [vmem:[%s1584_s14 + $0x50] sm:$0xff] %v1004_v1  ;;  %v812_v5 = vadd.f32 %v811_v4, %v1570_v30  ;;  %v564_v6 = vpop.f32.mrf.mxu0 }
  0xeb   : > { %v950_v7 = vmax.f32 %v643_v3, 0.0  ;;  %v565_v8 = vadd.f32 %v564_v6, %v1568_v29  ;;  %v733_v9 = vpop.f32.mrf.mxu1 }
  0xec   : > { %v951_v10 = vmax.f32 %v812_v5, 0.0  ;;  %v734_v11 = vadd.f32 %v733_v9, %v1570_v30 }
  0xed   : > { %v888_v12 = vmax.f32 %v565_v8, 0.0 }
  0xee   : > { %v1036_v13 = vpack.c.bf16 %v951_v10, %v950_v7  ;;  %v889_v14 = vmax.f32 %v734_v11, 0.0 }
  0xf0   : > { %1100 = vst [vmem:[%s1584_s14 + $0x150] sm:$0xff] %v1036_v13  ;;  %v1005_v15 = vpack.c.bf16 %v889_v14, %v888_v12  ;;  %v644_v16 = vpop.f32.mrf.mxu2 }
  0xf1   : > { %v645_v17 = vadd.f32 %v644_v16, %v1568_v29  ;;  %v813_v18 = vpop.f32.mrf.mxu3 }
  0xf2   : > { %1069 = vst [vmem:[%s1584_s14 + $0x58] sm:$0xff] %v1005_v15  ;;  %v814_v21 = vadd.f32 %v813_v18, %v1570_v30  ;;  %v567_v22 = vpop.f32.mrf.mxu0 }
  0xf3   : > { %v952_v23 = vmax.f32 %v645_v17, 0.0  ;;  %v568_v24 = vadd.f32 %v567_v22, %v1568_v29  ;;  %v736_v25 = vpop.f32.mrf.mxu1 }
  0xf4   : > { %v953_v26 = vmax.f32 %v814_v21, 0.0  ;;  %v737_v27 = vadd.f32 %v736_v25, %v1570_v30 }
  0xf5   : > { %v890_v28 = vmax.f32 %v568_v24, 0.0  ;;  %1348 = vmatmul.msk.bf16.gmra.mxu0 %vm431_vm0, %v1415_v19  ;;  %1364 = vmatmul.msk.bf16.gmra.mxu2 %vm431_vm0, %v1431_v20 }
  0xf6   : > { %v1037_v31 = vpack.c.bf16 %v953_v26, %v952_v23  ;;  %v891_v32 = vmax.f32 %v737_v27, 0.0  ;;  %1380 = vmatmul.msk.bf16.gmra.mxu1 %vm431_vm0, %v1415_v19  ;;  %1396 = vmatmul.msk.bf16.gmra.mxu3 %vm431_vm0, %v1431_v20 }
  0xf8   : > { %1101 = vst [vmem:[%s1584_s14 + $0x158] sm:$0xff] %v1037_v31  ;;  %v1006_v33 = vpack.c.bf16 %v891_v32, %v890_v28  ;;  %v647_v34 = vpop.f32.mrf.mxu2 }
  0xf9   : > { %v648_v35 = vadd.f32 %v647_v34, %v1568_v29  ;;  %v816_v36 = vpop.f32.mrf.mxu3 }
  0xfa   : > { %1070 = vst [vmem:[%s1584_s14 + $0x60] sm:$0xff] %v1006_v33  ;;  %v817_v37 = vadd.f32 %v816_v36, %v1570_v30  ;;  %v569_v38 = vpop.f32.mrf.mxu0 }
  0xfb   : > { %v954_v39 = vmax.f32 %v648_v35, 0.0  ;;  %v570_v40 = vadd.f32 %v569_v38, %v1568_v29  ;;  %v738_v41 = vpop.f32.mrf.mxu1 }
  0xfc   : > { %v955_v42 = vmax.f32 %v817_v37, 0.0  ;;  %v739_v43 = vadd.f32 %v738_v41, %v1570_v30 }
  0xfd   : > { %v892_v44 = vmax.f32 %v570_v40, 0.0 }
  0xfe   : > { %v1038_v45 = vpack.c.bf16 %v955_v42, %v954_v39  ;;  %v893_v46 = vmax.f32 %v739_v43, 0.0 }
 0x100   : > { %1102 = vst [vmem:[%s1584_s14 + $0x160] sm:$0xff] %v1038_v45  ;;  %v1007_v47 = vpack.c.bf16 %v893_v46, %v892_v44  ;;  %v649_v48 = vpop.f32.mrf.mxu2 }
 0x101   : > { %v650_v49 = vadd.f32 %v649_v48, %v1568_v29  ;;  %v818_v50 = vpop.f32.mrf.mxu3 }
 0x102   : > { %1071 = vst [vmem:[%s1584_s14 + $0x68] sm:$0xff] %v1007_v47  ;;  %v819_v53 = vadd.f32 %v818_v50, %v1570_v30  ;;  %v572_v54 = vpop.f32.mrf.mxu0 }
 0x103   : > { %v956_v55 = vmax.f32 %v650_v49, 0.0  ;;  %v573_v56 = vadd.f32 %v572_v54, %v1568_v29  ;;  %v741_v57 = vpop.f32.mrf.mxu1 }
 0x104   : > { %v957_v58 = vmax.f32 %v819_v53, 0.0  ;;  %v742_v59 = vadd.f32 %v741_v57, %v1570_v30 }
 0x105   : > { %v894_v60 = vmax.f32 %v573_v56, 0.0  ;;  %1349 = vmatmul.msk.bf16.gmra.mxu0 %vm431_vm0, %v1416_v51  ;;  %1365 = vmatmul.msk.bf16.gmra.mxu2 %vm431_vm0, %v1432_v52 }
 0x106   : > { %v1039_v61 = vpack.c.bf16 %v957_v58, %v956_v55  ;;  %v895_v62 = vmax.f32 %v742_v59, 0.0  ;;  %1381 = vmatmul.msk.bf16.gmra.mxu1 %vm431_vm0, %v1416_v51  ;;  %1397 = vmatmul.msk.bf16.gmra.mxu3 %vm431_vm0, %v1432_v52 }
 0x108   : > { %1103 = vst [vmem:[%s1584_s14 + $0x168] sm:$0xff] %v1039_v61  ;;  %v1008_v63 = vpack.c.bf16 %v895_v62, %v894_v60  ;;  %v652_v0 = vpop.f32.mrf.mxu2 }
 0x109   : > { %v653_v1 = vadd.f32 %v652_v0, %v1568_v29  ;;  %v821_v2 = vpop.f32.mrf.mxu3 }
 0x10a   : > { %1072 = vst [vmem:[%s1584_s14 + $0x70] sm:$0xff] %v1008_v63  ;;  %v822_v3 = vadd.f32 %v821_v2, %v1570_v30  ;;  %v574_v4 = vpop.f32.mrf.mxu0 }
 0x10b   : > { %v958_v5 = vmax.f32 %v653_v1, 0.0  ;;  %v575_v6 = vadd.f32 %v574_v4, %v1568_v29  ;;  %v743_v7 = vpop.f32.mrf.mxu1 }
 0x10c   : > { %v959_v8 = vmax.f32 %v822_v3, 0.0  ;;  %v744_v9 = vadd.f32 %v743_v7, %v1570_v30 }
 0x10d   : > { %v896_v10 = vmax.f32 %v575_v6, 0.0 }
 0x10e   : > { %v1040_v11 = vpack.c.bf16 %v959_v8, %v958_v5  ;;  %v897_v12 = vmax.f32 %v744_v9, 0.0 }
 0x110   : > { %1104 = vst [vmem:[%s1584_s14 + $0x170] sm:$0xff] %v1040_v11  ;;  %v1009_v13 = vpack.c.bf16 %v897_v12, %v896_v10  ;;  %v654_v14 = vpop.f32.mrf.mxu2 }
 0x111   : > { %v655_v15 = vadd.f32 %v654_v14, %v1568_v29  ;;  %v823_v16 = vpop.f32.mrf.mxu3 }
 0x112   : > { %1073 = vst [vmem:[%s1584_s14 + $0x78] sm:$0xff] %v1009_v13  ;;  %v824_v17 = vadd.f32 %v823_v16, %v1570_v30  ;;  %v577_v18 = vpop.f32.mrf.mxu0 }
 0x113   : > { %v960_v19 = vmax.f32 %v655_v15, 0.0  ;;  %v578_v20 = vadd.f32 %v577_v18, %v1568_v29  ;;  %v746_v21 = vpop.f32.mrf.mxu1 }
 0x114   : > { %v961_v22 = vmax.f32 %v824_v17, 0.0  ;;  %v747_v23 = vadd.f32 %v746_v21, %v1570_v30 }
 0x115   : > { %v898_v24 = vmax.f32 %v578_v20, 0.0 }
 0x116   : > { %v1041_v25 = vpack.c.bf16 %v961_v22, %v960_v19  ;;  %v899_v26 = vmax.f32 %v747_v23, 0.0 }
 0x118   : > { %1105 = vst [vmem:[%s1584_s14 + $0x178] sm:$0xff] %v1041_v25  ;;  %v1010_v27 = vpack.c.bf16 %v899_v26, %v898_v24  ;;  %v657_v28 = vpop.f32.mrf.mxu2 }
 0x119   : > { %v658_v31 = vadd.f32 %v657_v28, %v1568_v29  ;;  %v826_v32 = vpop.f32.mrf.mxu3 }
 0x11a   : > { %1074 = vst [vmem:[%s1584_s14 + $0x80] sm:$0xff] %v1010_v27  ;;  %v827_v33 = vadd.f32 %v826_v32, %v1570_v30  ;;  %v579_v34 = vpop.f32.mrf.mxu0 }
 0x11b   : > { %v962_v35 = vmax.f32 %v658_v31, 0.0  ;;  %v580_v36 = vadd.f32 %v579_v34, %v1568_v29  ;;  %v748_v37 = vpop.f32.mrf.mxu1 }
 0x11c   : > { %v963_v38 = vmax.f32 %v827_v33, 0.0  ;;  %v749_v39 = vadd.f32 %v748_v37, %v1570_v30 }
 0x11d   : > { %v900_v40 = vmax.f32 %v580_v36, 0.0 }
 0x11e   : > { %v1042_v41 = vpack.c.bf16 %v963_v38, %v962_v35  ;;  %v901_v42 = vmax.f32 %v749_v39, 0.0 }
 0x120   : > { %1106 = vst [vmem:[%s1584_s14 + $0x180] sm:$0xff] %v1042_v41  ;;  %v1011_v43 = vpack.c.bf16 %v901_v42, %v900_v40  ;;  %v659_v44 = vpop.f32.mrf.mxu2 }
 0x121   : > { %v660_v45 = vadd.f32 %v659_v44, %v1568_v29  ;;  %v828_v46 = vpop.f32.mrf.mxu3 }
 0x122   : > { %1075 = vst [vmem:[%s1584_s14 + $0x88] sm:$0xff] %v1011_v43  ;;  %v829_v47 = vadd.f32 %v828_v46, %v1570_v30  ;;  %v582_v48 = vpop.f32.mrf.mxu0 }
 0x123   : > { %v964_v49 = vmax.f32 %v660_v45, 0.0  ;;  %v583_v50 = vadd.f32 %v582_v48, %v1568_v29  ;;  %v751_v51 = vpop.f32.mrf.mxu1 }
 0x124   : > { %v965_v52 = vmax.f32 %v829_v47, 0.0  ;;  %v752_v53 = vadd.f32 %v751_v51, %v1570_v30 }
 0x125   : > { %v902_v54 = vmax.f32 %v583_v50, 0.0 }
 0x126   : > { %v1043_v55 = vpack.c.bf16 %v965_v52, %v964_v49  ;;  %v903_v56 = vmax.f32 %v752_v53, 0.0 }
 0x128   : > { %1107 = vst [vmem:[%s1584_s14 + $0x188] sm:$0xff] %v1043_v55  ;;  %v1012_v57 = vpack.c.bf16 %v903_v56, %v902_v54  ;;  %v662_v58 = vpop.f32.mrf.mxu2 }
 0x129   : > { %v663_v59 = vadd.f32 %v662_v58, %v1568_v29  ;;  %v831_v60 = vpop.f32.mrf.mxu3 }
 0x12a   : > { %1076 = vst [vmem:[%s1584_s14 + $0x90] sm:$0xff] %v1012_v57  ;;  %v832_v61 = vadd.f32 %v831_v60, %v1570_v30  ;;  %v584_v62 = vpop.f32.mrf.mxu0 }
 0x12b   : > { %v966_v63 = vmax.f32 %v663_v59, 0.0  ;;  %v585_v0 = vadd.f32 %v584_v62, %v1568_v29  ;;  %v753_v1 = vpop.f32.mrf.mxu1 }
 0x12c   : > { %v967_v2 = vmax.f32 %v832_v61, 0.0  ;;  %v754_v3 = vadd.f32 %v753_v1, %v1570_v30 }
 0x12d   : > { %v904_v4 = vmax.f32 %v585_v0, 0.0 }
 0x12e   : > { %v1044_v5 = vpack.c.bf16 %v967_v2, %v966_v63  ;;  %v905_v6 = vmax.f32 %v754_v3, 0.0 }
 0x130   : > { %1108 = vst [vmem:[%s1584_s14 + $0x190] sm:$0xff] %v1044_v5  ;;  %v1013_v7 = vpack.c.bf16 %v905_v6, %v904_v4  ;;  %v664_v8 = vpop.f32.mrf.mxu2 }
 0x131   : > { %v665_v9 = vadd.f32 %v664_v8, %v1568_v29  ;;  %v833_v10 = vpop.f32.mrf.mxu3 }
 0x132   : > { %1077 = vst [vmem:[%s1584_s14 + $0x98] sm:$0xff] %v1013_v7  ;;  %v834_v11 = vadd.f32 %v833_v10, %v1570_v30  ;;  %v587_v12 = vpop.f32.mrf.mxu0 }
 0x133   : > { %v968_v13 = vmax.f32 %v665_v9, 0.0  ;;  %v588_v14 = vadd.f32 %v587_v12, %v1568_v29  ;;  %v756_v15 = vpop.f32.mrf.mxu1 }
 0x134   : > { %v969_v16 = vmax.f32 %v834_v11, 0.0  ;;  %v757_v17 = vadd.f32 %v756_v15, %v1570_v30 }
 0x135   : > { %v906_v18 = vmax.f32 %v588_v14, 0.0 }
 0x136   : > { %v1045_v19 = vpack.c.bf16 %v969_v16, %v968_v13  ;;  %v907_v20 = vmax.f32 %v757_v17, 0.0 }
 0x138   : > { %1109 = vst [vmem:[%s1584_s14 + $0x198] sm:$0xff] %v1045_v19  ;;  %v1014_v21 = vpack.c.bf16 %v907_v20, %v906_v18  ;;  %v667_v22 = vpop.f32.mrf.mxu2 }
 0x139   : > { %v668_v23 = vadd.f32 %v667_v22, %v1568_v29  ;;  %v836_v24 = vpop.f32.mrf.mxu3 }
 0x13a   : > { %1078 = vst [vmem:[%s1584_s14 + $0xa0] sm:$0xff] %v1014_v21  ;;  %v837_v25 = vadd.f32 %v836_v24, %v1570_v30  ;;  %v589_v26 = vpop.f32.mrf.mxu0 }
 0x13b   : > { %v970_v27 = vmax.f32 %v668_v23, 0.0  ;;  %v590_v28 = vadd.f32 %v589_v26, %v1568_v29  ;;  %v758_v31 = vpop.f32.mrf.mxu1 }
 0x13c   : > { %v971_v32 = vmax.f32 %v837_v25, 0.0  ;;  %v759_v33 = vadd.f32 %v758_v31, %v1570_v30 }
 0x13d   : > { %v908_v34 = vmax.f32 %v590_v28, 0.0 }
 0x13e   : > { %v1046_v35 = vpack.c.bf16 %v971_v32, %v970_v27  ;;  %v909_v36 = vmax.f32 %v759_v33, 0.0 }
 0x140   : > { %1110 = vst [vmem:[%s1584_s14 + $0x1a0] sm:$0xff] %v1046_v35  ;;  %v1015_v37 = vpack.c.bf16 %v909_v36, %v908_v34  ;;  %v669_v38 = vpop.f32.mrf.mxu2 }
 0x141   : > { %v670_v39 = vadd.f32 %v669_v38, %v1568_v29  ;;  %v838_v40 = vpop.f32.mrf.mxu3 }
 0x142   : > { %1079 = vst [vmem:[%s1584_s14 + $0xa8] sm:$0xff] %v1015_v37  ;;  %v839_v41 = vadd.f32 %v838_v40, %v1570_v30  ;;  %v592_v42 = vpop.f32.mrf.mxu0 }
 0x143   : > { %v972_v43 = vmax.f32 %v670_v39, 0.0  ;;  %v593_v44 = vadd.f32 %v592_v42, %v1568_v29  ;;  %v761_v45 = vpop.f32.mrf.mxu1 }
 0x144   : > { %v973_v46 = vmax.f32 %v839_v41, 0.0  ;;  %v762_v47 = vadd.f32 %v761_v45, %v1570_v30 }
 0x145   : > { %v910_v48 = vmax.f32 %v593_v44, 0.0 }
 0x146   : > { %v1047_v49 = vpack.c.bf16 %v973_v46, %v972_v43  ;;  %v911_v50 = vmax.f32 %v762_v47, 0.0 }
 0x148   : > { %1111 = vst [vmem:[%s1584_s14 + $0x1a8] sm:$0xff] %v1047_v49  ;;  %v1016_v51 = vpack.c.bf16 %v911_v50, %v910_v48  ;;  %v672_v52 = vpop.f32.mrf.mxu2 }
 0x149   : > { %v673_v53 = vadd.f32 %v672_v52, %v1568_v29  ;;  %v841_v54 = vpop.f32.mrf.mxu3 }
 0x14a   : > { %1080 = vst [vmem:[%s1584_s14 + $0xb0] sm:$0xff] %v1016_v51  ;;  %v842_v55 = vadd.f32 %v841_v54, %v1570_v30  ;;  %v594_v56 = vpop.f32.mrf.mxu0 }
 0x14b   : > { %v974_v57 = vmax.f32 %v673_v53, 0.0  ;;  %v595_v58 = vadd.f32 %v594_v56, %v1568_v29  ;;  %v763_v59 = vpop.f32.mrf.mxu1 }
 0x14c   : > { %v975_v60 = vmax.f32 %v842_v55, 0.0  ;;  %v764_v61 = vadd.f32 %v763_v59, %v1570_v30 }
 0x14d   : > { %v912_v62 = vmax.f32 %v595_v58, 0.0 }
 0x14e   : > { %v1048_v63 = vpack.c.bf16 %v975_v60, %v974_v57  ;;  %v913_v0 = vmax.f32 %v764_v61, 0.0 }
 0x150   : > { %1112 = vst [vmem:[%s1584_s14 + $0x1b0] sm:$0xff] %v1048_v63  ;;  %v1017_v1 = vpack.c.bf16 %v913_v0, %v912_v62  ;;  %v674_v2 = vpop.f32.mrf.mxu2 }
 0x151   : > { %v675_v3 = vadd.f32 %v674_v2, %v1568_v29  ;;  %v843_v4 = vpop.f32.mrf.mxu3 }
 0x152   : > { %1081 = vst [vmem:[%s1584_s14 + $0xb8] sm:$0xff] %v1017_v1  ;;  %v844_v5 = vadd.f32 %v843_v4, %v1570_v30  ;;  %v597_v6 = vpop.f32.mrf.mxu0 }
 0x153   : > { %v976_v7 = vmax.f32 %v675_v3, 0.0  ;;  %v598_v8 = vadd.f32 %v597_v6, %v1568_v29  ;;  %v766_v9 = vpop.f32.mrf.mxu1 }
 0x154   : > { %v977_v10 = vmax.f32 %v844_v5, 0.0  ;;  %v767_v11 = vadd.f32 %v766_v9, %v1570_v30 }
 0x155   : > { %v914_v12 = vmax.f32 %v598_v8, 0.0 }
 0x156   : > { %v1049_v13 = vpack.c.bf16 %v977_v10, %v976_v7  ;;  %v915_v14 = vmax.f32 %v767_v11, 0.0 }
 0x158   : > { %1113 = vst [vmem:[%s1584_s14 + $0x1b8] sm:$0xff] %v1049_v13  ;;  %v1018_v15 = vpack.c.bf16 %v915_v14, %v914_v12  ;;  %v677_v16 = vpop.f32.mrf.mxu2 }
 0x159   : > { %v678_v17 = vadd.f32 %v677_v16, %v1568_v29  ;;  %v846_v18 = vpop.f32.mrf.mxu3 }
 0x15a   : > { %1082 = vst [vmem:[%s1584_s14 + $0xc0] sm:$0xff] %v1018_v15  ;;  %v847_v19 = vadd.f32 %v846_v18, %v1570_v30  ;;  %v599_v20 = vpop.f32.mrf.mxu0 }
 0x15b   : > { %v978_v21 = vmax.f32 %v678_v17, 0.0  ;;  %v600_v22 = vadd.f32 %v599_v20, %v1568_v29  ;;  %v768_v23 = vpop.f32.mrf.mxu1 }
 0x15c   : > { %v979_v24 = vmax.f32 %v847_v19, 0.0  ;;  %v769_v25 = vadd.f32 %v768_v23, %v1570_v30 }
 0x15d   : > { %v916_v26 = vmax.f32 %v600_v22, 0.0 }
 0x15e   : > { %v1050_v27 = vpack.c.bf16 %v979_v24, %v978_v21  ;;  %v917_v28 = vmax.f32 %v769_v25, 0.0 }
 0x160   : > { %1114 = vst [vmem:[%s1584_s14 + $0x1c0] sm:$0xff] %v1050_v27  ;;  %v1019_v31 = vpack.c.bf16 %v917_v28, %v916_v26  ;;  %v679_v32 = vpop.f32.mrf.mxu2 }
 0x161   : > { %v680_v33 = vadd.f32 %v679_v32, %v1568_v29  ;;  %v848_v34 = vpop.f32.mrf.mxu3 }
 0x162   : > { %1083 = vst [vmem:[%s1584_s14 + $0xc8] sm:$0xff] %v1019_v31  ;;  %v849_v35 = vadd.f32 %v848_v34, %v1570_v30  ;;  %v602_v36 = vpop.f32.mrf.mxu0 }
 0x163   : > { %v980_v37 = vmax.f32 %v680_v33, 0.0  ;;  %v603_v38 = vadd.f32 %v602_v36, %v1568_v29  ;;  %v771_v39 = vpop.f32.mrf.mxu1 }
 0x164   : > { %v981_v40 = vmax.f32 %v849_v35, 0.0  ;;  %v772_v41 = vadd.f32 %v771_v39, %v1570_v30 }
 0x165   : > { %v918_v42 = vmax.f32 %v603_v38, 0.0 }
 0x166   : > { %v1051_v43 = vpack.c.bf16 %v981_v40, %v980_v37  ;;  %v919_v44 = vmax.f32 %v772_v41, 0.0 }
 0x168   : > { %1115 = vst [vmem:[%s1584_s14 + $0x1c8] sm:$0xff] %v1051_v43  ;;  %v1020_v45 = vpack.c.bf16 %v919_v44, %v918_v42  ;;  %v682_v46 = vpop.f32.mrf.mxu2 }
 0x169   : > { %v683_v47 = vadd.f32 %v682_v46, %v1568_v29  ;;  %v851_v48 = vpop.f32.mrf.mxu3 }
 0x16a   : > { %1084 = vst [vmem:[%s1584_s14 + $0xd0] sm:$0xff] %v1020_v45  ;;  %v852_v49 = vadd.f32 %v851_v48, %v1570_v30  ;;  %v604_v50 = vpop.f32.mrf.mxu0 }
 0x16b   : > { %v982_v51 = vmax.f32 %v683_v47, 0.0  ;;  %v605_v52 = vadd.f32 %v604_v50, %v1568_v29  ;;  %v773_v53 = vpop.f32.mrf.mxu1 }
 0x16c   : > { %v983_v54 = vmax.f32 %v852_v49, 0.0  ;;  %v774_v55 = vadd.f32 %v773_v53, %v1570_v30 }
 0x16d   : > { %v920_v56 = vmax.f32 %v605_v52, 0.0 }
 0x16e   : > { %v1052_v57 = vpack.c.bf16 %v983_v54, %v982_v51  ;;  %v921_v58 = vmax.f32 %v774_v55, 0.0 }
 0x170   : > { %1116 = vst [vmem:[%s1584_s14 + $0x1d0] sm:$0xff] %v1052_v57  ;;  %v1021_v59 = vpack.c.bf16 %v921_v58, %v920_v56  ;;  %v684_v60 = vpop.f32.mrf.mxu2 }
 0x171   : > { %v685_v61 = vadd.f32 %v684_v60, %v1568_v29  ;;  %v853_v62 = vpop.f32.mrf.mxu3 }
 0x172   : > { %1085 = vst [vmem:[%s1584_s14 + $0xd8] sm:$0xff] %v1021_v59  ;;  %v854_v63 = vadd.f32 %v853_v62, %v1570_v30  ;;  %v607_v0 = vpop.f32.mrf.mxu0 }
 0x173   : > { %v984_v1 = vmax.f32 %v685_v61, 0.0  ;;  %v608_v2 = vadd.f32 %v607_v0, %v1568_v29  ;;  %v776_v3 = vpop.f32.mrf.mxu1 }
 0x174   : > { %v985_v4 = vmax.f32 %v854_v63, 0.0  ;;  %v777_v5 = vadd.f32 %v776_v3, %v1570_v30 }
 0x175   : > { %v922_v6 = vmax.f32 %v608_v2, 0.0 }
 0x176   : > { %v1053_v7 = vpack.c.bf16 %v985_v4, %v984_v1  ;;  %v923_v8 = vmax.f32 %v777_v5, 0.0 }
 0x178   : > { %1117 = vst [vmem:[%s1584_s14 + $0x1d8] sm:$0xff] %v1053_v7  ;;  %v1022_v9 = vpack.c.bf16 %v923_v8, %v922_v6  ;;  %v687_v10 = vpop.f32.mrf.mxu2 }
 0x179   : > { %v688_v11 = vadd.f32 %v687_v10, %v1568_v29  ;;  %v856_v12 = vpop.f32.mrf.mxu3 }
 0x17a   : > { %1086 = vst [vmem:[%s1584_s14 + $0xe0] sm:$0xff] %v1022_v9  ;;  %v857_v13 = vadd.f32 %v856_v12, %v1570_v30  ;;  %v609_v14 = vpop.f32.mrf.mxu0 }
 0x17b   : > { %v986_v15 = vmax.f32 %v688_v11, 0.0  ;;  %v610_v16 = vadd.f32 %v609_v14, %v1568_v29  ;;  %v778_v17 = vpop.f32.mrf.mxu1 }
 0x17c   : > { %v987_v18 = vmax.f32 %v857_v13, 0.0  ;;  %v779_v19 = vadd.f32 %v778_v17, %v1570_v30 }
 0x17d   : > { %v924_v20 = vmax.f32 %v610_v16, 0.0 }
 0x17e   : > { %v1054_v21 = vpack.c.bf16 %v987_v18, %v986_v15  ;;  %v925_v22 = vmax.f32 %v779_v19, 0.0 }
 0x180   : > { %1118 = vst [vmem:[%s1584_s14 + $0x1e0] sm:$0xff] %v1054_v21  ;;  %v1023_v23 = vpack.c.bf16 %v925_v22, %v924_v20  ;;  %v689_v24 = vpop.f32.mrf.mxu2 }
 0x181   : > { %v690_v25 = vadd.f32 %v689_v24, %v1568_v29  ;;  %v858_v26 = vpop.f32.mrf.mxu3 }
 0x182   : > { %1087 = vst [vmem:[%s1584_s14 + $0xe8] sm:$0xff] %v1023_v23  ;;  %v859_v27 = vadd.f32 %v858_v26, %v1570_v30  ;;  %v612_v28 = vpop.f32.mrf.mxu0 }
 0x183   : > { %v988_v31 = vmax.f32 %v690_v25, 0.0  ;;  %v613_v32 = vadd.f32 %v612_v28, %v1568_v29  ;;  %v781_v33 = vpop.f32.mrf.mxu1 }
 0x184   : > { %v989_v34 = vmax.f32 %v859_v27, 0.0  ;;  %v782_v35 = vadd.f32 %v781_v33, %v1570_v30 }
 0x185   : > { %v926_v36 = vmax.f32 %v613_v32, 0.0 }
 0x186   : > { %v1055_v37 = vpack.c.bf16 %v989_v34, %v988_v31  ;;  %v927_v38 = vmax.f32 %v782_v35, 0.0 }
 0x188   : > { %1119 = vst [vmem:[%s1584_s14 + $0x1e8] sm:$0xff] %v1055_v37  ;;  %v1024_v39 = vpack.c.bf16 %v927_v38, %v926_v36  ;;  %v692_v40 = vpop.f32.mrf.mxu2 }
 0x189   : > { %v693_v41 = vadd.f32 %v692_v40, %v1568_v29  ;;  %v861_v42 = vpop.f32.mrf.mxu3 }
 0x18a   : > { %1088 = vst [vmem:[%s1584_s14 + $0xf0] sm:$0xff] %v1024_v39  ;;  %v862_v43 = vadd.f32 %v861_v42, %v1570_v30  ;;  %v614_v44 = vpop.f32.mrf.mxu0 }
 0x18b   : > { %v990_v45 = vmax.f32 %v693_v41, 0.0  ;;  %v615_v46 = vadd.f32 %v614_v44, %v1568_v29  ;;  %v783_v47 = vpop.f32.mrf.mxu1 }
 0x18c   : > { %v991_v48 = vmax.f32 %v862_v43, 0.0  ;;  %v784_v49 = vadd.f32 %v783_v47, %v1570_v30 }
 0x18d   : > { %v928_v50 = vmax.f32 %v615_v46, 0.0 }
 0x18e   : > { %v1056_v51 = vpack.c.bf16 %v991_v48, %v990_v45  ;;  %v929_v52 = vmax.f32 %v784_v49, 0.0 }
 0x190   : > { %1120 = vst [vmem:[%s1584_s14 + $0x1f0] sm:$0xff] %v1056_v51  ;;  %v1025_v53 = vpack.c.bf16 %v929_v52, %v928_v50  ;;  %v694_v54 = vpop.f32.mrf.mxu2 }
 0x191   : > { %v695_v55 = vadd.f32 %v694_v54, %v1568_v29  ;;  %v863_v56 = vpop.f32.mrf.mxu3 }
 0x192   : > { %1089 = vst [vmem:[%s1584_s14 + $0xf8] sm:$0xff] %v1025_v53  ;;  %v864_v57 = vadd.f32 %v863_v56, %v1570_v30 }
 0x193   : > { %v992_v58 = vmax.f32 %v695_v55, 0.0 }
 0x194   : > { %v993_v59 = vmax.f32 %v864_v57, 0.0 }
 0x196   : > { %v1057_v60 = vpack.c.bf16 %v993_v59, %v992_v58 }
 0x198   : > { %1121 = vst [vmem:[%s1584_s14 + $0x1f8] sm:$0xff] %v1057_v60 }
 0x199 PF: > { %s13_s12 = sadd.s32 1, %s1455_s12  }
 0x19a   : > { %p10_p4 = scmp.ge.s32.totalorder %s13_s12, 4  }
 0x19c   :  { %12 = sbr.rel (!%p10_p4) target bundleno = 1 (0x1), region = 62 }

// kernel: vae224_forward.3
= control target key start
LH: loop header
LB: loop body
LE: loop exit
PB: predicated region body
PF: predicated region fallthrough
CT: control target
= control target key end

     0   :  { %s8247_s12 = smov 0   ;;  %s9578_s0 = inlined_call_operand.vmem [shape: bf16[12288,16], index: 0, kind: input, shape index: {}]   ;;  %s9579_s1 = inlined_call_operand.vmem [shape: bf16[16,128], index: 1, kind: input, shape index: {}]   ;;  %s9580_s2 = inlined_call_operand.vmem [shape: f32[1,128], index: 2, kind: input, shape index: {}]   ;;  %s9581_s3 = inlined_call_operand.vmem [shape: bf16[12288,128], index: 3, kind: output, shape index: {}]  }
   0x1 LB: > { %s5117_s13 = sadd.s32 4294967295, %s8225_s12   ;;  %p5121_p0 = scmp.ge.s32.totalorder %s8225_s12, 1  ;;  %s8225_s12 = sphi %s8247_s12, %s13_s12  }
   0x2   : > { %p138_p1 = scmp.lt.s32.totalorder %s8225_s12, 4 }
   0x4   : > { %p139_p2 = pnand %p5121_p0, %p138_p1 }
   0x5   : > { %s5122_s16 = sshll.u32 (!%p139_p2), %s5117_s13, 9 }
   0x6   : > { %142 = sbr.rel (%p139_p2) target bundleno = 1171 (0x493), region = 32  ;;  %p163_p3 = scmp.lt.s32.totalorder (!%p139_p2), %s5122_s16, 1535 }
   0xb   : > { %v6668_v0 = vld [vmem:[%s9579_s1] sm:$0xff]  ;;  %s9583_s16 = smov (!%p163_p3, %s5122_s16), 1535  ;;  %vm1979_vm0 = vcmask 130048  }
   0xc   : > { %2755 = vmatpush.bf16.msra.mxu0 %v6668_v0  ;;  %8204 = vmatpush.bf16.msra.mxu1 %v6668_v0  ;;  %s5123_s17 = sshll.u32 %s9583_s16, 2  ;;  %v8343_v39 = vld [vmem:[%s9580_s2] ss:$0 sm:$0xff] }
   0xd   : > { %8205 = vmatpush.bf16.msra.mxu2 %v6668_v0  ;;  %8206 = vmatpush.bf16.msra.mxu3 %v6668_v0  ;;  %s8266_s20 = scalar_lea.vmem %s9578_s0, %s5123_s17  ;;  %s8354_s25 = scalar_lea.vmem %s9581_s3, %s5123_s17 }
   0xe   : > { %v6412_v1 = vld [vmem:[%s8266_s20] sm:$0xff]  ;;  %v6413_v5 = vld [vmem:[%s8266_s20 + $0x8] sm:$0xff]  ;;  %v6414_v9 = vld [vmem:[%s8266_s20 + $0x10] sm:$0xff] }
   0xf   : > { %v6476_v2 = vld [vmem:[%s8266_s20 + $0x200] sm:$0xff]  ;;  %6154 = vmatmul.msk.bf16.vlgmr.msra.gmra.mxu0 %vm1979_vm0, %v6412_v1  ;;  %v6477_v6 = vld [vmem:[%s8266_s20 + $0x208] sm:$0xff]  ;;  %v6478_v10 = vld [vmem:[%s8266_s20 + $0x210] sm:$0xff] }
  0x10   : > { %v6540_v3 = vld [vmem:[%s8266_s20 + $0x400] sm:$0xff]  ;;  %6218 = vmatmul.msk.bf16.vlgmr.msra.gmra.mxu1 %vm1979_vm0, %v6476_v2  ;;  %v6541_v7 = vld [vmem:[%s8266_s20 + $0x408] sm:$0xff]  ;;  %v6542_v11 = vld [vmem:[%s8266_s20 + $0x410] sm:$0xff] }
  0x11   : > { %v6604_v4 = vld [vmem:[%s8266_s20 + $0x600] sm:$0xff]  ;;  %6282 = vmatmul.msk.bf16.vlgmr.msra.gmra.mxu2 %vm1979_vm0, %v6540_v3  ;;  %v6605_v8 = vld [vmem:[%s8266_s20 + $0x608] sm:$0xff]  ;;  %v6606_v12 = vld [vmem:[%s8266_s20 + $0x610] sm:$0xff] }
  0x12   : > { %6346 = vmatmul.msk.bf16.vlgmr.msra.gmra.mxu3 %vm1979_vm0, %v6604_v4  ;;  %v6415_v13 = vld [vmem:[%s8266_s20 + $0x18] sm:$0xff]  ;;  %v6416_v17 = vld [vmem:[%s8266_s20 + $0x20] sm:$0xff]  ;;  %v6417_v21 = vld [vmem:[%s8266_s20 + $0x28] sm:$0xff] }
  0x13   : > { %v6479_v14 = vld [vmem:[%s8266_s20 + $0x218] sm:$0xff]  ;;  %v6480_v18 = vld [vmem:[%s8266_s20 + $0x220] sm:$0xff]  ;;  %v6481_v22 = vld [vmem:[%s8266_s20 + $0x228] sm:$0xff] }
  0x14   : > { %v6543_v15 = vld [vmem:[%s8266_s20 + $0x418] sm:$0xff]  ;;  %v6544_v19 = vld [vmem:[%s8266_s20 + $0x420] sm:$0xff]  ;;  %v6545_v23 = vld [vmem:[%s8266_s20 + $0x428] sm:$0xff] }
  0x15   : > { %v6607_v16 = vld [vmem:[%s8266_s20 + $0x618] sm:$0xff]  ;;  %v6608_v20 = vld [vmem:[%s8266_s20 + $0x620] sm:$0xff]  ;;  %v6609_v24 = vld [vmem:[%s8266_s20 + $0x628] sm:$0xff] }
  0x16   : > { %v6418_v25 = vld [vmem:[%s8266_s20 + $0x30] sm:$0xff]  ;;  %v6419_v29 = vld [vmem:[%s8266_s20 + $0x38] sm:$0xff]  ;;  %v6420_v33 = vld [vmem:[%s8266_s20 + $0x40] sm:$0xff] }
  0x17   : > { %v6482_v26 = vld [vmem:[%s8266_s20 + $0x230] sm:$0xff]  ;;  %v6483_v30 = vld [vmem:[%s8266_s20 + $0x238] sm:$0xff]  ;;  %v6484_v34 = vld [vmem:[%s8266_s20 + $0x240] sm:$0xff] }
  0x18   : > { %v6546_v27 = vld [vmem:[%s8266_s20 + $0x430] sm:$0xff]  ;;  %v6547_v31 = vld [vmem:[%s8266_s20 + $0x438] sm:$0xff]  ;;  %v6548_v37 = vld [vmem:[%s8266_s20 + $0x440] sm:$0xff] }
  0x19   : > { %v6610_v28 = vld [vmem:[%s8266_s20 + $0x630] sm:$0xff]  ;;  %v6611_v32 = vld [vmem:[%s8266_s20 + $0x638] sm:$0xff]  ;;  %v6612_v38 = vld [vmem:[%s8266_s20 + $0x640] sm:$0xff] }
  0x1a   : > { %v6421_v52 = vld [vmem:[%s8266_s20 + $0x48] sm:$0xff] }
  0x1b   : > { %v6485_v53 = vld [vmem:[%s8266_s20 + $0x248] sm:$0xff] }
  0x1c   : > { %v6549_v60 = vld [vmem:[%s8266_s20 + $0x448] sm:$0xff] }
  0x1d   : > { %v6613_v61 = vld [vmem:[%s8266_s20 + $0x648] sm:$0xff] }
  0x1f   : > { %6155 = vmatmul.msk.bf16.gmra.mxu0 %vm1979_vm0, %v6413_v5 }
  0x20   : > { %6219 = vmatmul.msk.bf16.gmra.mxu1 %vm1979_vm0, %v6477_v6 }
  0x21   : > { %6283 = vmatmul.msk.bf16.gmra.mxu2 %vm1979_vm0, %v6541_v7 }
  0x22   : > { %6347 = vmatmul.msk.bf16.gmra.mxu3 %vm1979_vm0, %v6605_v8 }
  0x2f   : > { %6156 = vmatmul.msk.bf16.gmra.mxu0 %vm1979_vm0, %v6414_v9 }
  0x30   : > { %6220 = vmatmul.msk.bf16.gmra.mxu1 %vm1979_vm0, %v6478_v10 }
  0x31   : > { %6284 = vmatmul.msk.bf16.gmra.mxu2 %vm1979_vm0, %v6542_v11 }
  0x32   : > { %6348 = vmatmul.msk.bf16.gmra.mxu3 %vm1979_vm0, %v6606_v12  ;;  %v6422_v12 = vld [vmem:[%s8266_s20 + $0x50] sm:$0xff] }
  0x3f   : > { %6157 = vmatmul.msk.bf16.gmra.mxu0 %vm1979_vm0, %v6415_v13  ;;  %v6486_v13 = vld [vmem:[%s8266_s20 + $0x250] sm:$0xff] }
  0x40   : > { %6221 = vmatmul.msk.bf16.gmra.mxu1 %vm1979_vm0, %v6479_v14 }
  0x41   : > { %6285 = vmatmul.msk.bf16.gmra.mxu2 %vm1979_vm0, %v6543_v15 }
  0x42   : > { %6349 = vmatmul.msk.bf16.gmra.mxu3 %vm1979_vm0, %v6607_v16 }
  0x4f   : > { %6158 = vmatmul.msk.bf16.gmra.mxu0 %vm1979_vm0, %v6416_v17 }
  0x50   : > { %6222 = vmatmul.msk.bf16.gmra.mxu1 %vm1979_vm0, %v6480_v18 }
  0x51   : > { %6286 = vmatmul.msk.bf16.gmra.mxu2 %vm1979_vm0, %v6544_v19 }
  0x52   : > { %6350 = vmatmul.msk.bf16.gmra.mxu3 %vm1979_vm0, %v6608_v20  ;;  %v6550_v20 = vld [vmem:[%s8266_s20 + $0x450] sm:$0xff] }
  0x5f   : > { %6159 = vmatmul.msk.bf16.gmra.mxu0 %vm1979_vm0, %v6417_v21  ;;  %v6614_v21 = vld [vmem:[%s8266_s20 + $0x650] sm:$0xff] }
  0x60   : > { %6223 = vmatmul.msk.bf16.gmra.mxu1 %vm1979_vm0, %v6481_v22 }
  0x61   : > { %6287 = vmatmul.msk.bf16.gmra.mxu2 %vm1979_vm0, %v6545_v23 }
  0x62   : > { %6351 = vmatmul.msk.bf16.gmra.mxu3 %vm1979_vm0, %v6609_v24 }
  0x6f   : > { %6160 = vmatmul.msk.bf16.gmra.mxu0 %vm1979_vm0, %v6418_v25 }
  0x70   : > { %6224 = vmatmul.msk.bf16.gmra.mxu1 %vm1979_vm0, %v6482_v26 }
  0x71   : > { %6288 = vmatmul.msk.bf16.gmra.mxu2 %vm1979_vm0, %v6546_v27 }
  0x72   : > { %6352 = vmatmul.msk.bf16.gmra.mxu3 %vm1979_vm0, %v6610_v28 }
  0x7f   : > { %6161 = vmatmul.msk.bf16.gmra.mxu0 %vm1979_vm0, %v6419_v29 }
  0x80   : > { %6225 = vmatmul.msk.bf16.gmra.mxu1 %vm1979_vm0, %v6483_v30 }
  0x81   : > { %6289 = vmatmul.msk.bf16.gmra.mxu2 %vm1979_vm0, %v6547_v31 }
  0x82   : > { %6353 = vmatmul.msk.bf16.gmra.mxu3 %vm1979_vm0, %v6611_v32 }
  0x8c   : > { %v2757_v35 = vpop.f32.mrf.mxu0 }
  0x8d   : > { %v3077_v36 = vpop.f32.mrf.mxu1  ;;  %v2758_v44 = vadd.f32 %v8343_v39, %v2757_v35 }
  0x8e   : > { %v3078_v45 = vadd.f32 %v8343_v39, %v3077_v36  ;;  %v6423_v36 = vld [vmem:[%s8266_s20 + $0x58] sm:$0xff] }
  0x8f   : > { %6162 = vmatmul.msk.bf16.gmra.mxu0 %vm1979_vm0, %v6420_v33 }
  0x90   : > { %6226 = vmatmul.msk.bf16.gmra.mxu1 %vm1979_vm0, %v6484_v34 }
  0x91   : > { %6290 = vmatmul.msk.bf16.gmra.mxu2 %vm1979_vm0, %v6548_v37  ;;  %v6487_v37 = vld [vmem:[%s8266_s20 + $0x258] sm:$0xff] }
  0x92   : > { %6354 = vmatmul.msk.bf16.gmra.mxu3 %vm1979_vm0, %v6612_v38 }
  0x94   : > { %v3397_v40 = vpop.f32.mrf.mxu2  ;;  %v2759_v42 = vpop.f32.mrf.mxu0 }
  0x95   : > { %v3717_v41 = vpop.f32.mrf.mxu3  ;;  %v3079_v43 = vpop.f32.mrf.mxu1  ;;  %v2760_v46 = vadd.f32 %v8343_v39, %v2759_v42  ;;  %v3398_v54 = vadd.f32 %v8343_v39, %v3397_v40 }
  0x96   : > { %v3080_v47 = vadd.f32 %v8343_v39, %v3079_v43  ;;  %v3718_v55 = vadd.f32 %v8343_v39, %v3717_v41 }
  0x97   : > { %v6672_v48 = vpack.c.bf16 %v2760_v46, %v2758_v44  ;;  %v6615_v46 = vld [vmem:[%s8266_s20 + $0x658] sm:$0xff] }
  0x98   : > { %v6992_v49 = vpack.c.bf16 %v3080_v47, %v3078_v45  ;;  %v6551_v45 = vld [vmem:[%s8266_s20 + $0x458] sm:$0xff] }
  0x99   : > { %6673 = vst [vmem:[%s8354_s25] sm:$0xff] %v6672_v48  }
  0x9a   : > { %8012 = vst [vmem:[%s8354_s25 + $0x200] sm:$0xff] %v6992_v49  }
  0x9c   : > { %v3399_v50 = vpop.f32.mrf.mxu2  ;;  %v2762_v58 = vpop.f32.mrf.mxu0 }
  0x9d   : > { %v3719_v51 = vpop.f32.mrf.mxu3  ;;  %v3400_v56 = vadd.f32 %v8343_v39, %v3399_v50  ;;  %v3082_v59 = vpop.f32.mrf.mxu1  ;;  %v2763_v4 = vadd.f32 %v8343_v39, %v2762_v58 }
  0x9e   : > { %v3720_v57 = vadd.f32 %v8343_v39, %v3719_v51  ;;  %v3083_v5 = vadd.f32 %v8343_v39, %v3082_v59 }
  0x9f   : > { %v7312_v62 = vpack.c.bf16 %v3400_v56, %v3398_v54  ;;  %6163 = vmatmul.msk.bf16.gmra.mxu0 %vm1979_vm0, %v6421_v52 }
  0xa0   : > { %v7632_v63 = vpack.c.bf16 %v3720_v57, %v3718_v55  ;;  %6227 = vmatmul.msk.bf16.gmra.mxu1 %vm1979_vm0, %v6485_v53 }
  0xa1   : > { %8076 = vst [vmem:[%s8354_s25 + $0x400] sm:$0xff] %v7312_v62   ;;  %6291 = vmatmul.msk.bf16.gmra.mxu2 %vm1979_vm0, %v6549_v60  ;;  %v6488_v62 = vld [vmem:[%s8266_s20 + $0x260] sm:$0xff] }
  0xa2   : > { %6355 = vmatmul.msk.bf16.gmra.mxu3 %vm1979_vm0, %v6613_v61  ;;  %8140 = vst [vmem:[%s8354_s25 + $0x600] sm:$0xff] %v7632_v63   ;;  %v6424_v61 = vld [vmem:[%s8266_s20 + $0x60] sm:$0xff] }
  0xa4   : > { %v3402_v0 = vpop.f32.mrf.mxu2  ;;  %v2764_v2 = vpop.f32.mrf.mxu0 }
  0xa5   : > { %v3722_v1 = vpop.f32.mrf.mxu3  ;;  %v3084_v3 = vpop.f32.mrf.mxu1  ;;  %v2765_v6 = vadd.f32 %v8343_v39, %v2764_v2  ;;  %v3403_v14 = vadd.f32 %v8343_v39, %v3402_v0 }
  0xa6   : > { %v3085_v7 = vadd.f32 %v8343_v39, %v3084_v3  ;;  %v3723_v15 = vadd.f32 %v8343_v39, %v3722_v1 }
  0xa7   : > { %v6677_v8 = vpack.c.bf16 %v2765_v6, %v2763_v4  ;;  %v6616_v6 = vld [vmem:[%s8266_s20 + $0x660] sm:$0xff] }
  0xa8   : > { %v6997_v9 = vpack.c.bf16 %v3085_v7, %v3083_v5  ;;  %v6552_v5 = vld [vmem:[%s8266_s20 + $0x460] sm:$0xff] }
  0xa9   : > { %7949 = vst [vmem:[%s8354_s25 + $0x8] sm:$0xff] %v6677_v8  }
  0xaa   : > { %8013 = vst [vmem:[%s8354_s25 + $0x208] sm:$0xff] %v6997_v9  }
  0xac   : > { %v3404_v10 = vpop.f32.mrf.mxu2  ;;  %v2767_v18 = vpop.f32.mrf.mxu0 }
  0xad   : > { %v3724_v11 = vpop.f32.mrf.mxu3  ;;  %v3405_v16 = vadd.f32 %v8343_v39, %v3404_v10  ;;  %v3087_v19 = vpop.f32.mrf.mxu1  ;;  %v2768_v28 = vadd.f32 %v8343_v39, %v2767_v18 }
  0xae   : > { %v3725_v17 = vadd.f32 %v8343_v39, %v3724_v11  ;;  %v3088_v29 = vadd.f32 %v8343_v39, %v3087_v19 }
  0xaf   : > { %v7317_v22 = vpack.c.bf16 %v3405_v16, %v3403_v14  ;;  %6164 = vmatmul.msk.bf16.gmra.mxu0 %vm1979_vm0, %v6422_v12 }
  0xb0   : > { %v7637_v23 = vpack.c.bf16 %v3725_v17, %v3723_v15  ;;  %6228 = vmatmul.msk.bf16.gmra.mxu1 %vm1979_vm0, %v6486_v13 }
  0xb1   : > { %8077 = vst [vmem:[%s8354_s25 + $0x408] sm:$0xff] %v7317_v22   ;;  %6292 = vmatmul.msk.bf16.gmra.mxu2 %vm1979_vm0, %v6550_v20  ;;  %v6489_v22 = vld [vmem:[%s8266_s20 + $0x268] sm:$0xff] }
  0xb2   : > { %6356 = vmatmul.msk.bf16.gmra.mxu3 %vm1979_vm0, %v6614_v21  ;;  %8141 = vst [vmem:[%s8354_s25 + $0x608] sm:$0xff] %v7637_v23   ;;  %v6425_v21 = vld [vmem:[%s8266_s20 + $0x68] sm:$0xff] }
  0xb4   : > { %v3407_v24 = vpop.f32.mrf.mxu2  ;;  %v2769_v26 = vpop.f32.mrf.mxu0 }
  0xb5   : > { %v3727_v25 = vpop.f32.mrf.mxu3  ;;  %v3089_v27 = vpop.f32.mrf.mxu1  ;;  %v2770_v30 = vadd.f32 %v8343_v39, %v2769_v26  ;;  %v3408_v38 = vadd.f32 %v8343_v39, %v3407_v24 }
  0xb6   : > { %v3090_v31 = vadd.f32 %v8343_v39, %v3089_v27  ;;  %v3728_v40 = vadd.f32 %v8343_v39, %v3727_v25 }
  0xb7   : > { %v6682_v32 = vpack.c.bf16 %v2770_v30, %v2768_v28  ;;  %v6617_v30 = vld [vmem:[%s8266_s20 + $0x668] sm:$0xff] }
  0xb8   : > { %v7002_v33 = vpack.c.bf16 %v3090_v31, %v3088_v29  ;;  %v6553_v29 = vld [vmem:[%s8266_s20 + $0x468] sm:$0xff] }
  0xb9   : > { %7950 = vst [vmem:[%s8354_s25 + $0x10] sm:$0xff] %v6682_v32  }
  0xba   : > { %8014 = vst [vmem:[%s8354_s25 + $0x210] sm:$0xff] %v7002_v33  }
  0xbc   : > { %v3409_v34 = vpop.f32.mrf.mxu2  ;;  %v2772_v43 = vpop.f32.mrf.mxu0 }
  0xbd   : > { %v3729_v35 = vpop.f32.mrf.mxu3  ;;  %v3410_v41 = vadd.f32 %v8343_v39, %v3409_v34  ;;  %v3092_v44 = vpop.f32.mrf.mxu1  ;;  %v2773_v53 = vadd.f32 %v8343_v39, %v2772_v43 }
  0xbe   : > { %v3730_v42 = vadd.f32 %v8343_v39, %v3729_v35  ;;  %v3093_v54 = vadd.f32 %v8343_v39, %v3092_v44 }
  0xbf   : > { %v7322_v47 = vpack.c.bf16 %v3410_v41, %v3408_v38  ;;  %6165 = vmatmul.msk.bf16.gmra.mxu0 %vm1979_vm0, %v6423_v36 }
  0xc0   : > { %v7642_v48 = vpack.c.bf16 %v3730_v42, %v3728_v40  ;;  %6229 = vmatmul.msk.bf16.gmra.mxu1 %vm1979_vm0, %v6487_v37 }
  0xc1   : > { %8078 = vst [vmem:[%s8354_s25 + $0x410] sm:$0xff] %v7322_v47   ;;  %6293 = vmatmul.msk.bf16.gmra.mxu2 %vm1979_vm0, %v6551_v45  ;;  %v6490_v47 = vld [vmem:[%s8266_s20 + $0x270] sm:$0xff] }
  0xc2   : > { %6357 = vmatmul.msk.bf16.gmra.mxu3 %vm1979_vm0, %v6615_v46  ;;  %8142 = vst [vmem:[%s8354_s25 + $0x610] sm:$0xff] %v7642_v48   ;;  %v6426_v46 = vld [vmem:[%s8266_s20 + $0x70] sm:$0xff] }
  0xc4   : > { %v3412_v49 = vpop.f32.mrf.mxu2  ;;  %v2774_v51 = vpop.f32.mrf.mxu0 }
  0xc5   : > { %v3732_v50 = vpop.f32.mrf.mxu3  ;;  %v3094_v52 = vpop.f32.mrf.mxu1  ;;  %v2775_v55 = vadd.f32 %v8343_v39, %v2774_v51  ;;  %v3413_v63 = vadd.f32 %v8343_v39, %v3412_v49 }
  0xc6   : > { %v3095_v56 = vadd.f32 %v8343_v39, %v3094_v52  ;;  %v3733_v0 = vadd.f32 %v8343_v39, %v3732_v50 }
  0xc7   : > { %v6687_v57 = vpack.c.bf16 %v2775_v55, %v2773_v53  ;;  %v6618_v55 = vld [vmem:[%s8266_s20 + $0x670] sm:$0xff] }
  0xc8   : > { %v7007_v58 = vpack.c.bf16 %v3095_v56, %v3093_v54  ;;  %v6554_v54 = vld [vmem:[%s8266_s20 + $0x470] sm:$0xff] }
  0xc9   : > { %7951 = vst [vmem:[%s8354_s25 + $0x18] sm:$0xff] %v6687_v57  }
  0xca   : > { %8015 = vst [vmem:[%s8354_s25 + $0x218] sm:$0xff] %v7007_v58  }
  0xcc   : > { %v3414_v59 = vpop.f32.mrf.mxu2  ;;  %v2777_v3 = vpop.f32.mrf.mxu0 }
  0xcd   : > { %v3734_v60 = vpop.f32.mrf.mxu3  ;;  %v3415_v1 = vadd.f32 %v8343_v39, %v3414_v59  ;;  %v3097_v4 = vpop.f32.mrf.mxu1  ;;  %v2778_v13 = vadd.f32 %v8343_v39, %v2777_v3 }
  0xce   : > { %v3735_v2 = vadd.f32 %v8343_v39, %v3734_v60  ;;  %v3098_v14 = vadd.f32 %v8343_v39, %v3097_v4 }
  0xcf   : > { %v7327_v7 = vpack.c.bf16 %v3415_v1, %v3413_v63  ;;  %6166 = vmatmul.msk.bf16.gmra.mxu0 %vm1979_vm0, %v6424_v61 }
  0xd0   : > { %v7647_v8 = vpack.c.bf16 %v3735_v2, %v3733_v0  ;;  %6230 = vmatmul.msk.bf16.gmra.mxu1 %vm1979_vm0, %v6488_v62 }
  0xd1   : > { %8079 = vst [vmem:[%s8354_s25 + $0x418] sm:$0xff] %v7327_v7   ;;  %6294 = vmatmul.msk.bf16.gmra.mxu2 %vm1979_vm0, %v6552_v5  ;;  %v6491_v7 = vld [vmem:[%s8266_s20 + $0x278] sm:$0xff] }
  0xd2   : > { %6358 = vmatmul.msk.bf16.gmra.mxu3 %vm1979_vm0, %v6616_v6  ;;  %8143 = vst [vmem:[%s8354_s25 + $0x618] sm:$0xff] %v7647_v8   ;;  %v6427_v6 = vld [vmem:[%s8266_s20 + $0x78] sm:$0xff] }
  0xd4   : > { %v3417_v9 = vpop.f32.mrf.mxu2  ;;  %v2779_v11 = vpop.f32.mrf.mxu0 }
  0xd5   : > { %v3737_v10 = vpop.f32.mrf.mxu3  ;;  %v3099_v12 = vpop.f32.mrf.mxu1  ;;  %v2780_v15 = vadd.f32 %v8343_v39, %v2779_v11  ;;  %v3418_v23 = vadd.f32 %v8343_v39, %v3417_v9 }
  0xd6   : > { %v3100_v16 = vadd.f32 %v8343_v39, %v3099_v12  ;;  %v3738_v24 = vadd.f32 %v8343_v39, %v3737_v10 }
  0xd7   : > { %v6692_v17 = vpack.c.bf16 %v2780_v15, %v2778_v13  ;;  %v6619_v15 = vld [vmem:[%s8266_s20 + $0x678] sm:$0xff] }
  0xd8   : > { %v7012_v18 = vpack.c.bf16 %v3100_v16, %v3098_v14  ;;  %v6555_v14 = vld [vmem:[%s8266_s20 + $0x478] sm:$0xff] }
  0xd9   : > { %7952 = vst [vmem:[%s8354_s25 + $0x20] sm:$0xff] %v6692_v17  }
  0xda   : > { %8016 = vst [vmem:[%s8354_s25 + $0x220] sm:$0xff] %v7012_v18  }
  0xdc   : > { %v3419_v19 = vpop.f32.mrf.mxu2  ;;  %v2782_v27 = vpop.f32.mrf.mxu0 }
  0xdd   : > { %v3739_v20 = vpop.f32.mrf.mxu3  ;;  %v3420_v25 = vadd.f32 %v8343_v39, %v3419_v19  ;;  %v3102_v28 = vpop.f32.mrf.mxu1  ;;  %v2783_v37 = vadd.f32 %v8343_v39, %v2782_v27 }
  0xde   : > { %v3740_v26 = vadd.f32 %v8343_v39, %v3739_v20  ;;  %v3103_v38 = vadd.f32 %v8343_v39, %v3102_v28 }
  0xdf   : > { %v7332_v31 = vpack.c.bf16 %v3420_v25, %v3418_v23  ;;  %6167 = vmatmul.msk.bf16.gmra.mxu0 %vm1979_vm0, %v6425_v21 }
  0xe0   : > { %v7652_v32 = vpack.c.bf16 %v3740_v26, %v3738_v24  ;;  %6231 = vmatmul.msk.bf16.gmra.mxu1 %vm1979_vm0, %v6489_v22 }
  0xe1   : > { %8080 = vst [vmem:[%s8354_s25 + $0x420] sm:$0xff] %v7332_v31   ;;  %6295 = vmatmul.msk.bf16.gmra.mxu2 %vm1979_vm0, %v6553_v29  ;;  %v6492_v31 = vld [vmem:[%s8266_s20 + $0x280] sm:$0xff] }
  0xe2   : > { %6359 = vmatmul.msk.bf16.gmra.mxu3 %vm1979_vm0, %v6617_v30  ;;  %8144 = vst [vmem:[%s8354_s25 + $0x620] sm:$0xff] %v7652_v32   ;;  %v6428_v30 = vld [vmem:[%s8266_s20 + $0x80] sm:$0xff] }
  0xe4   : > { %v3422_v33 = vpop.f32.mrf.mxu2  ;;  %v2784_v35 = vpop.f32.mrf.mxu0 }
  0xe5   : > { %v3742_v34 = vpop.f32.mrf.mxu3  ;;  %v3104_v36 = vpop.f32.mrf.mxu1  ;;  %v2785_v40 = vadd.f32 %v8343_v39, %v2784_v35  ;;  %v3423_v48 = vadd.f32 %v8343_v39, %v3422_v33 }
  0xe6   : > { %v3105_v41 = vadd.f32 %v8343_v39, %v3104_v36  ;;  %v3743_v49 = vadd.f32 %v8343_v39, %v3742_v34 }
  0xe7   : > { %v6697_v42 = vpack.c.bf16 %v2785_v40, %v2783_v37  ;;  %v6620_v40 = vld [vmem:[%s8266_s20 + $0x680] sm:$0xff] }
  0xe8   : > { %v7017_v43 = vpack.c.bf16 %v3105_v41, %v3103_v38  ;;  %v6556_v38 = vld [vmem:[%s8266_s20 + $0x480] sm:$0xff] }
  0xe9   : > { %7953 = vst [vmem:[%s8354_s25 + $0x28] sm:$0xff] %v6697_v42  }
  0xea   : > { %8017 = vst [vmem:[%s8354_s25 + $0x228] sm:$0xff] %v7017_v43  }
  0xec   : > { %v3424_v44 = vpop.f32.mrf.mxu2  ;;  %v2787_v52 = vpop.f32.mrf.mxu0 }
  0xed   : > { %v3744_v45 = vpop.f32.mrf.mxu3  ;;  %v3425_v50 = vadd.f32 %v8343_v39, %v3424_v44  ;;  %v3107_v53 = vpop.f32.mrf.mxu1  ;;  %v2788_v62 = vadd.f32 %v8343_v39, %v2787_v52 }
  0xee   : > { %v3745_v51 = vadd.f32 %v8343_v39, %v3744_v45  ;;  %v3108_v63 = vadd.f32 %v8343_v39, %v3107_v53 }
  0xef   : > { %v7337_v56 = vpack.c.bf16 %v3425_v50, %v3423_v48  ;;  %6168 = vmatmul.msk.bf16.gmra.mxu0 %vm1979_vm0, %v6426_v46 }
  0xf0   : > { %v7657_v57 = vpack.c.bf16 %v3745_v51, %v3743_v49  ;;  %6232 = vmatmul.msk.bf16.gmra.mxu1 %vm1979_vm0, %v6490_v47 }
  0xf1   : > { %8081 = vst [vmem:[%s8354_s25 + $0x428] sm:$0xff] %v7337_v56   ;;  %6296 = vmatmul.msk.bf16.gmra.mxu2 %vm1979_vm0, %v6554_v54  ;;  %v6493_v56 = vld [vmem:[%s8266_s20 + $0x288] sm:$0xff] }
  0xf2   : > { %6360 = vmatmul.msk.bf16.gmra.mxu3 %vm1979_vm0, %v6618_v55  ;;  %8145 = vst [vmem:[%s8354_s25 + $0x628] sm:$0xff] %v7657_v57   ;;  %v6429_v55 = vld [vmem:[%s8266_s20 + $0x88] sm:$0xff] }
  0xf4   : > { %v3427_v58 = vpop.f32.mrf.mxu2  ;;  %v2789_v60 = vpop.f32.mrf.mxu0 }
  0xf5   : > { %v3747_v59 = vpop.f32.mrf.mxu3  ;;  %v3109_v61 = vpop.f32.mrf.mxu1  ;;  %v2790_v0 = vadd.f32 %v8343_v39, %v2789_v60  ;;  %v3428_v8 = vadd.f32 %v8343_v39, %v3427_v58 }
  0xf6   : > { %v3110_v1 = vadd.f32 %v8343_v39, %v3109_v61  ;;  %v3748_v9 = vadd.f32 %v8343_v39, %v3747_v59 }
  0xf7   : > { %v6702_v2 = vpack.c.bf16 %v2790_v0, %v2788_v62  ;;  %v6621_v0 = vld [vmem:[%s8266_s20 + $0x688] sm:$0xff] }
  0xf8   : > { %v7022_v3 = vpack.c.bf16 %v3110_v1, %v3108_v63  ;;  %v6557_v63 = vld [vmem:[%s8266_s20 + $0x488] sm:$0xff] }
  0xf9   : > { %7954 = vst [vmem:[%s8354_s25 + $0x30] sm:$0xff] %v6702_v2  }
  0xfa   : > { %8018 = vst [vmem:[%s8354_s25 + $0x230] sm:$0xff] %v7022_v3  }
  0xfc   : > { %v3429_v4 = vpop.f32.mrf.mxu2  ;;  %v2792_v12 = vpop.f32.mrf.mxu0 }
  0xfd   : > { %v3749_v5 = vpop.f32.mrf.mxu3  ;;  %v3430_v10 = vadd.f32 %v8343_v39, %v3429_v4  ;;  %v3112_v13 = vpop.f32.mrf.mxu1  ;;  %v2793_v22 = vadd.f32 %v8343_v39, %v2792_v12 }
  0xfe   : > { %v3750_v11 = vadd.f32 %v8343_v39, %v3749_v5  ;;  %v3113_v23 = vadd.f32 %v8343_v39, %v3112_v13 }
  0xff   : > { %v7342_v16 = vpack.c.bf16 %v3430_v10, %v3428_v8  ;;  %6169 = vmatmul.msk.bf16.gmra.mxu0 %vm1979_vm0, %v6427_v6 }
 0x100   : > { %v7662_v17 = vpack.c.bf16 %v3750_v11, %v3748_v9  ;;  %6233 = vmatmul.msk.bf16.gmra.mxu1 %vm1979_vm0, %v6491_v7 }
 0x101   : > { %8082 = vst [vmem:[%s8354_s25 + $0x430] sm:$0xff] %v7342_v16   ;;  %6297 = vmatmul.msk.bf16.gmra.mxu2 %vm1979_vm0, %v6555_v14  ;;  %v6494_v16 = vld [vmem:[%s8266_s20 + $0x290] sm:$0xff] }
 0x102   : > { %6361 = vmatmul.msk.bf16.gmra.mxu3 %vm1979_vm0, %v6619_v15  ;;  %8146 = vst [vmem:[%s8354_s25 + $0x630] sm:$0xff] %v7662_v17   ;;  %v6430_v15 = vld [vmem:[%s8266_s20 + $0x90] sm:$0xff] }
 0x104   : > { %v3432_v18 = vpop.f32.mrf.mxu2  ;;  %v2794_v20 = vpop.f32.mrf.mxu0 }
 0x105   : > { %v3752_v19 = vpop.f32.mrf.mxu3  ;;  %v3114_v21 = vpop.f32.mrf.mxu1  ;;  %v2795_v24 = vadd.f32 %v8343_v39, %v2794_v20  ;;  %v3433_v32 = vadd.f32 %v8343_v39, %v3432_v18 }
 0x106   : > { %v3115_v25 = vadd.f32 %v8343_v39, %v3114_v21  ;;  %v3753_v33 = vadd.f32 %v8343_v39, %v3752_v19 }
 0x107   : > { %v6707_v26 = vpack.c.bf16 %v2795_v24, %v2793_v22  ;;  %v6622_v24 = vld [vmem:[%s8266_s20 + $0x690] sm:$0xff] }
 0x108   : > { %v7027_v27 = vpack.c.bf16 %v3115_v25, %v3113_v23  ;;  %v6558_v23 = vld [vmem:[%s8266_s20 + $0x490] sm:$0xff] }
 0x109   : > { %7955 = vst [vmem:[%s8354_s25 + $0x38] sm:$0xff] %v6707_v26  }
 0x10a   : > { %8019 = vst [vmem:[%s8354_s25 + $0x238] sm:$0xff] %v7027_v27  }
 0x10c   : > { %v3434_v28 = vpop.f32.mrf.mxu2  ;;  %v2797_v36 = vpop.f32.mrf.mxu0 }
 0x10d   : > { %v3754_v29 = vpop.f32.mrf.mxu3  ;;  %v3435_v34 = vadd.f32 %v8343_v39, %v3434_v28  ;;  %v3117_v37 = vpop.f32.mrf.mxu1  ;;  %v2798_v47 = vadd.f32 %v8343_v39, %v2797_v36 }
 0x10e   : > { %v3755_v35 = vadd.f32 %v8343_v39, %v3754_v29  ;;  %v3118_v48 = vadd.f32 %v8343_v39, %v3117_v37 }
 0x10f   : > { %v7347_v41 = vpack.c.bf16 %v3435_v34, %v3433_v32  ;;  %6170 = vmatmul.msk.bf16.gmra.mxu0 %vm1979_vm0, %v6428_v30 }
 0x110   : > { %v7667_v42 = vpack.c.bf16 %v3755_v35, %v3753_v33  ;;  %6234 = vmatmul.msk.bf16.gmra.mxu1 %vm1979_vm0, %v6492_v31 }
 0x111   : > { %8083 = vst [vmem:[%s8354_s25 + $0x438] sm:$0xff] %v7347_v41   ;;  %6298 = vmatmul.msk.bf16.gmra.mxu2 %vm1979_vm0, %v6556_v38  ;;  %v6495_v41 = vld [vmem:[%s8266_s20 + $0x298] sm:$0xff] }
 0x112   : > { %6362 = vmatmul.msk.bf16.gmra.mxu3 %vm1979_vm0, %v6620_v40  ;;  %8147 = vst [vmem:[%s8354_s25 + $0x638] sm:$0xff] %v7667_v42   ;;  %v6431_v40 = vld [vmem:[%s8266_s20 + $0x98] sm:$0xff] }
 0x114   : > { %v3437_v43 = vpop.f32.mrf.mxu2  ;;  %v2799_v45 = vpop.f32.mrf.mxu0 }
 0x115   : > { %v3757_v44 = vpop.f32.mrf.mxu3  ;;  %v3119_v46 = vpop.f32.mrf.mxu1  ;;  %v2800_v49 = vadd.f32 %v8343_v39, %v2799_v45  ;;  %v3438_v57 = vadd.f32 %v8343_v39, %v3437_v43 }
 0x116   : > { %v3120_v50 = vadd.f32 %v8343_v39, %v3119_v46  ;;  %v3758_v58 = vadd.f32 %v8343_v39, %v3757_v44 }
 0x117   : > { %v6712_v51 = vpack.c.bf16 %v2800_v49, %v2798_v47  ;;  %v6623_v49 = vld [vmem:[%s8266_s20 + $0x698] sm:$0xff] }
 0x118   : > { %v7032_v52 = vpack.c.bf16 %v3120_v50, %v3118_v48  ;;  %v6559_v48 = vld [vmem:[%s8266_s20 + $0x498] sm:$0xff] }
 0x119   : > { %7956 = vst [vmem:[%s8354_s25 + $0x40] sm:$0xff] %v6712_v51  }
 0x11a   : > { %8020 = vst [vmem:[%s8354_s25 + $0x240] sm:$0xff] %v7032_v52  }
 0x11c   : > { %v3439_v53 = vpop.f32.mrf.mxu2  ;;  %v2802_v61 = vpop.f32.mrf.mxu0 }
 0x11d   : > { %v3759_v54 = vpop.f32.mrf.mxu3  ;;  %v3440_v59 = vadd.f32 %v8343_v39, %v3439_v53  ;;  %v3122_v62 = vpop.f32.mrf.mxu1  ;;  %v2803_v7 = vadd.f32 %v8343_v39, %v2802_v61 }
 0x11e   : > { %v3760_v60 = vadd.f32 %v8343_v39, %v3759_v54  ;;  %v3123_v8 = vadd.f32 %v8343_v39, %v3122_v62 }
 0x11f   : > { %v7352_v1 = vpack.c.bf16 %v3440_v59, %v3438_v57  ;;  %6171 = vmatmul.msk.bf16.gmra.mxu0 %vm1979_vm0, %v6429_v55 }
 0x120   : > { %v7672_v2 = vpack.c.bf16 %v3760_v60, %v3758_v58  ;;  %6235 = vmatmul.msk.bf16.gmra.mxu1 %vm1979_vm0, %v6493_v56 }
 0x121   : > { %8084 = vst [vmem:[%s8354_s25 + $0x440] sm:$0xff] %v7352_v1   ;;  %6299 = vmatmul.msk.bf16.gmra.mxu2 %vm1979_vm0, %v6557_v63  ;;  %v6496_v1 = vld [vmem:[%s8266_s20 + $0x2a0] sm:$0xff] }
 0x122   : > { %6363 = vmatmul.msk.bf16.gmra.mxu3 %vm1979_vm0, %v6621_v0  ;;  %8148 = vst [vmem:[%s8354_s25 + $0x640] sm:$0xff] %v7672_v2   ;;  %v6432_v0 = vld [vmem:[%s8266_s20 + $0xa0] sm:$0xff] }
 0x124   : > { %v3442_v3 = vpop.f32.mrf.mxu2  ;;  %v2804_v5 = vpop.f32.mrf.mxu0 }
 0x125   : > { %v3762_v4 = vpop.f32.mrf.mxu3  ;;  %v3124_v6 = vpop.f32.mrf.mxu1  ;;  %v2805_v9 = vadd.f32 %v8343_v39, %v2804_v5  ;;  %v3443_v17 = vadd.f32 %v8343_v39, %v3442_v3 }
 0x126   : > { %v3125_v10 = vadd.f32 %v8343_v39, %v3124_v6  ;;  %v3763_v18 = vadd.f32 %v8343_v39, %v3762_v4 }
 0x127   : > { %v6717_v11 = vpack.c.bf16 %v2805_v9, %v2803_v7  ;;  %v6624_v9 = vld [vmem:[%s8266_s20 + $0x6a0] sm:$0xff] }
 0x128   : > { %v7037_v12 = vpack.c.bf16 %v3125_v10, %v3123_v8  ;;  %v6560_v8 = vld [vmem:[%s8266_s20 + $0x4a0] sm:$0xff] }
 0x129   : > { %7957 = vst [vmem:[%s8354_s25 + $0x48] sm:$0xff] %v6717_v11  }
 0x12a   : > { %8021 = vst [vmem:[%s8354_s25 + $0x248] sm:$0xff] %v7037_v12  }
 0x12c   : > { %v3444_v13 = vpop.f32.mrf.mxu2  ;;  %v2807_v21 = vpop.f32.mrf.mxu0 }
 0x12d   : > { %v3764_v14 = vpop.f32.mrf.mxu3  ;;  %v3445_v19 = vadd.f32 %v8343_v39, %v3444_v13  ;;  %v3127_v22 = vpop.f32.mrf.mxu1  ;;  %v2808_v31 = vadd.f32 %v8343_v39, %v2807_v21 }
 0x12e   : > { %v3765_v20 = vadd.f32 %v8343_v39, %v3764_v14  ;;  %v3128_v32 = vadd.f32 %v8343_v39, %v3127_v22 }
 0x12f   : > { %v7357_v25 = vpack.c.bf16 %v3445_v19, %v3443_v17  ;;  %6172 = vmatmul.msk.bf16.gmra.mxu0 %vm1979_vm0, %v6430_v15 }
 0x130   : > { %v7677_v26 = vpack.c.bf16 %v3765_v20, %v3763_v18  ;;  %6236 = vmatmul.msk.bf16.gmra.mxu1 %vm1979_vm0, %v6494_v16 }
 0x131   : > { %8085 = vst [vmem:[%s8354_s25 + $0x448] sm:$0xff] %v7357_v25   ;;  %6300 = vmatmul.msk.bf16.gmra.mxu2 %vm1979_vm0, %v6558_v23  ;;  %v6497_v25 = vld [vmem:[%s8266_s20 + $0x2a8] sm:$0xff] }
 0x132   : > { %6364 = vmatmul.msk.bf16.gmra.mxu3 %vm1979_vm0, %v6622_v24  ;;  %8149 = vst [vmem:[%s8354_s25 + $0x648] sm:$0xff] %v7677_v26   ;;  %v6433_v24 = vld [vmem:[%s8266_s20 + $0xa8] sm:$0xff] }
 0x134   : > { %v3447_v27 = vpop.f32.mrf.mxu2  ;;  %v2809_v29 = vpop.f32.mrf.mxu0 }
 0x135   : > { %v3767_v28 = vpop.f32.mrf.mxu3  ;;  %v3129_v30 = vpop.f32.mrf.mxu1  ;;  %v2810_v33 = vadd.f32 %v8343_v39, %v2809_v29  ;;  %v3448_v42 = vadd.f32 %v8343_v39, %v3447_v27 }
 0x136   : > { %v3130_v34 = vadd.f32 %v8343_v39, %v3129_v30  ;;  %v3768_v43 = vadd.f32 %v8343_v39, %v3767_v28 }
 0x137   : > { %v6722_v35 = vpack.c.bf16 %v2810_v33, %v2808_v31  ;;  %v6625_v33 = vld [vmem:[%s8266_s20 + $0x6a8] sm:$0xff] }
 0x138   : > { %v7042_v36 = vpack.c.bf16 %v3130_v34, %v3128_v32  ;;  %v6561_v32 = vld [vmem:[%s8266_s20 + $0x4a8] sm:$0xff] }
 0x139   : > { %7958 = vst [vmem:[%s8354_s25 + $0x50] sm:$0xff] %v6722_v35  }
 0x13a   : > { %8022 = vst [vmem:[%s8354_s25 + $0x250] sm:$0xff] %v7042_v36  }
 0x13c   : > { %v3449_v37 = vpop.f32.mrf.mxu2  ;;  %v2812_v46 = vpop.f32.mrf.mxu0 }
 0x13d   : > { %v3769_v38 = vpop.f32.mrf.mxu3  ;;  %v3450_v44 = vadd.f32 %v8343_v39, %v3449_v37  ;;  %v3132_v47 = vpop.f32.mrf.mxu1  ;;  %v2813_v56 = vadd.f32 %v8343_v39, %v2812_v46 }
 0x13e   : > { %v3770_v45 = vadd.f32 %v8343_v39, %v3769_v38  ;;  %v3133_v57 = vadd.f32 %v8343_v39, %v3132_v47 }
 0x13f   : > { %v7362_v50 = vpack.c.bf16 %v3450_v44, %v3448_v42  ;;  %6173 = vmatmul.msk.bf16.gmra.mxu0 %vm1979_vm0, %v6431_v40 }
 0x140   : > { %v7682_v51 = vpack.c.bf16 %v3770_v45, %v3768_v43  ;;  %6237 = vmatmul.msk.bf16.gmra.mxu1 %vm1979_vm0, %v6495_v41 }
 0x141   : > { %8086 = vst [vmem:[%s8354_s25 + $0x450] sm:$0xff] %v7362_v50   ;;  %6301 = vmatmul.msk.bf16.gmra.mxu2 %vm1979_vm0, %v6559_v48  ;;  %v6498_v50 = vld [vmem:[%s8266_s20 + $0x2b0] sm:$0xff] }
 0x142   : > { %6365 = vmatmul.msk.bf16.gmra.mxu3 %vm1979_vm0, %v6623_v49  ;;  %8150 = vst [vmem:[%s8354_s25 + $0x650] sm:$0xff] %v7682_v51   ;;  %v6434_v49 = vld [vmem:[%s8266_s20 + $0xb0] sm:$0xff] }
 0x144   : > { %v3452_v52 = vpop.f32.mrf.mxu2  ;;  %v2814_v54 = vpop.f32.mrf.mxu0 }
 0x145   : > { %v3772_v53 = vpop.f32.mrf.mxu3  ;;  %v3134_v55 = vpop.f32.mrf.mxu1  ;;  %v2815_v58 = vadd.f32 %v8343_v39, %v2814_v54  ;;  %v3453_v2 = vadd.f32 %v8343_v39, %v3452_v52 }
 0x146   : > { %v3135_v59 = vadd.f32 %v8343_v39, %v3134_v55  ;;  %v3773_v3 = vadd.f32 %v8343_v39, %v3772_v53 }
 0x147   : > { %v6727_v60 = vpack.c.bf16 %v2815_v58, %v2813_v56  ;;  %v6626_v58 = vld [vmem:[%s8266_s20 + $0x6b0] sm:$0xff] }
 0x148   : > { %v7047_v61 = vpack.c.bf16 %v3135_v59, %v3133_v57  ;;  %v6562_v57 = vld [vmem:[%s8266_s20 + $0x4b0] sm:$0xff] }
 0x149   : > { %7959 = vst [vmem:[%s8354_s25 + $0x58] sm:$0xff] %v6727_v60  }
 0x14a   : > { %8023 = vst [vmem:[%s8354_s25 + $0x258] sm:$0xff] %v7047_v61  }
 0x14c   : > { %v3454_v62 = vpop.f32.mrf.mxu2  ;;  %v2817_v6 = vpop.f32.mrf.mxu0 }
 0x14d   : > { %v3774_v63 = vpop.f32.mrf.mxu3  ;;  %v3455_v4 = vadd.f32 %v8343_v39, %v3454_v62  ;;  %v3137_v7 = vpop.f32.mrf.mxu1  ;;  %v2818_v16 = vadd.f32 %v8343_v39, %v2817_v6 }
 0x14e   : > { %v3775_v5 = vadd.f32 %v8343_v39, %v3774_v63  ;;  %v3138_v17 = vadd.f32 %v8343_v39, %v3137_v7 }
 0x14f   : > { %v7367_v10 = vpack.c.bf16 %v3455_v4, %v3453_v2  ;;  %6174 = vmatmul.msk.bf16.gmra.mxu0 %vm1979_vm0, %v6432_v0 }
 0x150   : > { %v7687_v11 = vpack.c.bf16 %v3775_v5, %v3773_v3  ;;  %6238 = vmatmul.msk.bf16.gmra.mxu1 %vm1979_vm0, %v6496_v1 }
 0x151   : > { %8087 = vst [vmem:[%s8354_s25 + $0x458] sm:$0xff] %v7367_v10   ;;  %6302 = vmatmul.msk.bf16.gmra.mxu2 %vm1979_vm0, %v6560_v8  ;;  %v6499_v10 = vld [vmem:[%s8266_s20 + $0x2b8] sm:$0xff] }
 0x152   : > { %6366 = vmatmul.msk.bf16.gmra.mxu3 %vm1979_vm0, %v6624_v9  ;;  %8151 = vst [vmem:[%s8354_s25 + $0x658] sm:$0xff] %v7687_v11   ;;  %v6435_v9 = vld [vmem:[%s8266_s20 + $0xb8] sm:$0xff] }
 0x154   : > { %v3457_v12 = vpop.f32.mrf.mxu2  ;;  %v2819_v14 = vpop.f32.mrf.mxu0 }
 0x155   : > { %v3777_v13 = vpop.f32.mrf.mxu3  ;;  %v3139_v15 = vpop.f32.mrf.mxu1  ;;  %v2820_v18 = vadd.f32 %v8343_v39, %v2819_v14  ;;  %v3458_v26 = vadd.f32 %v8343_v39, %v3457_v12 }
 0x156   : > { %v3140_v19 = vadd.f32 %v8343_v39, %v3139_v15  ;;  %v3778_v27 = vadd.f32 %v8343_v39, %v3777_v13 }
 0x157   : > { %v6732_v20 = vpack.c.bf16 %v2820_v18, %v2818_v16  ;;  %v6627_v18 = vld [vmem:[%s8266_s20 + $0x6b8] sm:$0xff] }
 0x158   : > { %v7052_v21 = vpack.c.bf16 %v3140_v19, %v3138_v17  ;;  %v6563_v17 = vld [vmem:[%s8266_s20 + $0x4b8] sm:$0xff] }
 0x159   : > { %7960 = vst [vmem:[%s8354_s25 + $0x60] sm:$0xff] %v6732_v20  }
 0x15a   : > { %8024 = vst [vmem:[%s8354_s25 + $0x260] sm:$0xff] %v7052_v21  }
 0x15c   : > { %v3459_v22 = vpop.f32.mrf.mxu2  ;;  %v2822_v30 = vpop.f32.mrf.mxu0 }
 0x15d   : > { %v3779_v23 = vpop.f32.mrf.mxu3  ;;  %v3460_v28 = vadd.f32 %v8343_v39, %v3459_v22  ;;  %v3142_v31 = vpop.f32.mrf.mxu1  ;;  %v2823_v41 = vadd.f32 %v8343_v39, %v2822_v30 }
 0x15e   : > { %v3780_v29 = vadd.f32 %v8343_v39, %v3779_v23  ;;  %v3143_v42 = vadd.f32 %v8343_v39, %v3142_v31 }
 0x15f   : > { %v7372_v34 = vpack.c.bf16 %v3460_v28, %v3458_v26  ;;  %6175 = vmatmul.msk.bf16.gmra.mxu0 %vm1979_vm0, %v6433_v24 }
 0x160   : > { %v7692_v35 = vpack.c.bf16 %v3780_v29, %v3778_v27  ;;  %6239 = vmatmul.msk.bf16.gmra.mxu1 %vm1979_vm0, %v6497_v25 }
 0x161   : > { %8088 = vst [vmem:[%s8354_s25 + $0x460] sm:$0xff] %v7372_v34   ;;  %6303 = vmatmul.msk.bf16.gmra.mxu2 %vm1979_vm0, %v6561_v32  ;;  %v6500_v34 = vld [vmem:[%s8266_s20 + $0x2c0] sm:$0xff] }
 0x162   : > { %6367 = vmatmul.msk.bf16.gmra.mxu3 %vm1979_vm0, %v6625_v33  ;;  %8152 = vst [vmem:[%s8354_s25 + $0x660] sm:$0xff] %v7692_v35   ;;  %v6436_v33 = vld [vmem:[%s8266_s20 + $0xc0] sm:$0xff] }
 0x164   : > { %v3462_v36 = vpop.f32.mrf.mxu2  ;;  %v2824_v38 = vpop.f32.mrf.mxu0 }
 0x165   : > { %v3782_v37 = vpop.f32.mrf.mxu3  ;;  %v3144_v40 = vpop.f32.mrf.mxu1  ;;  %v2825_v43 = vadd.f32 %v8343_v39, %v2824_v38  ;;  %v3463_v51 = vadd.f32 %v8343_v39, %v3462_v36 }
 0x166   : > { %v3145_v44 = vadd.f32 %v8343_v39, %v3144_v40  ;;  %v3783_v52 = vadd.f32 %v8343_v39, %v3782_v37 }
 0x167   : > { %v6737_v45 = vpack.c.bf16 %v2825_v43, %v2823_v41  ;;  %v6628_v43 = vld [vmem:[%s8266_s20 + $0x6c0] sm:$0xff] }
 0x168   : > { %v7057_v46 = vpack.c.bf16 %v3145_v44, %v3143_v42  ;;  %v6564_v42 = vld [vmem:[%s8266_s20 + $0x4c0] sm:$0xff] }
 0x169   : > { %7961 = vst [vmem:[%s8354_s25 + $0x68] sm:$0xff] %v6737_v45  }
 0x16a   : > { %8025 = vst [vmem:[%s8354_s25 + $0x268] sm:$0xff] %v7057_v46  }
 0x16c   : > { %v3464_v47 = vpop.f32.mrf.mxu2  ;;  %v2827_v55 = vpop.f32.mrf.mxu0 }
 0x16d   : > { %v3784_v48 = vpop.f32.mrf.mxu3  ;;  %v3465_v53 = vadd.f32 %v8343_v39, %v3464_v47  ;;  %v3147_v56 = vpop.f32.mrf.mxu1  ;;  %v2828_v1 = vadd.f32 %v8343_v39, %v2827_v55 }
 0x16e   : > { %v3785_v54 = vadd.f32 %v8343_v39, %v3784_v48  ;;  %v3148_v2 = vadd.f32 %v8343_v39, %v3147_v56 }
 0x16f   : > { %v7377_v59 = vpack.c.bf16 %v3465_v53, %v3463_v51  ;;  %6176 = vmatmul.msk.bf16.gmra.mxu0 %vm1979_vm0, %v6434_v49  ;;  %v8675_v49 = vld [vmem:[%s9580_s2] ss:$0 sm:$0xff] }
 0x170   : > { %v7697_v60 = vpack.c.bf16 %v3785_v54, %v3783_v52  ;;  %6240 = vmatmul.msk.bf16.gmra.mxu1 %vm1979_vm0, %v6498_v50 }
 0x171   : > { %8089 = vst [vmem:[%s8354_s25 + $0x468] sm:$0xff] %v7377_v59   ;;  %6304 = vmatmul.msk.bf16.gmra.mxu2 %vm1979_vm0, %v6562_v57  ;;  %v6501_v59 = vld [vmem:[%s8266_s20 + $0x2c8] sm:$0xff] }
 0x172   : > { %6368 = vmatmul.msk.bf16.gmra.mxu3 %vm1979_vm0, %v6626_v58  ;;  %8153 = vst [vmem:[%s8354_s25 + $0x668] sm:$0xff] %v7697_v60   ;;  %v6437_v58 = vld [vmem:[%s8266_s20 + $0xc8] sm:$0xff] }
 0x174   : > { %v3467_v61 = vpop.f32.mrf.mxu2  ;;  %v2829_v63 = vpop.f32.mrf.mxu0 }
 0x175   : > { %v3787_v62 = vpop.f32.mrf.mxu3  ;;  %v3149_v0 = vpop.f32.mrf.mxu1  ;;  %v2830_v3 = vadd.f32 %v8343_v39, %v2829_v63  ;;  %v3468_v11 = vadd.f32 %v8343_v39, %v3467_v61 }
 0x176   : > { %v3150_v4 = vadd.f32 %v8343_v39, %v3149_v0  ;;  %v3788_v12 = vadd.f32 %v8343_v39, %v3787_v62 }
 0x177   : > { %v6742_v5 = vpack.c.bf16 %v2830_v3, %v2828_v1  ;;  %v6629_v3 = vld [vmem:[%s8266_s20 + $0x6c8] sm:$0xff] }
 0x178   : > { %v7062_v6 = vpack.c.bf16 %v3150_v4, %v3148_v2  ;;  %v6565_v2 = vld [vmem:[%s8266_s20 + $0x4c8] sm:$0xff] }
 0x179   : > { %7962 = vst [vmem:[%s8354_s25 + $0x70] sm:$0xff] %v6742_v5  }
 0x17a   : > { %8026 = vst [vmem:[%s8354_s25 + $0x270] sm:$0xff] %v7062_v6  }
 0x17c   : > { %v3469_v7 = vpop.f32.mrf.mxu2  ;;  %v2832_v15 = vpop.f32.mrf.mxu0 }
 0x17d   : > { %v3789_v8 = vpop.f32.mrf.mxu3  ;;  %v3470_v13 = vadd.f32 %v8343_v39, %v3469_v7  ;;  %v3152_v16 = vpop.f32.mrf.mxu1  ;;  %v2833_v25 = vadd.f32 %v8343_v39, %v2832_v15 }
 0x17e   : > { %v3790_v14 = vadd.f32 %v8343_v39, %v3789_v8  ;;  %v3153_v26 = vadd.f32 %v8343_v39, %v3152_v16 }
 0x17f   : > { %v7382_v19 = vpack.c.bf16 %v3470_v13, %v3468_v11  ;;  %6177 = vmatmul.msk.bf16.gmra.mxu0 %vm1979_vm0, %v6435_v9 }
 0x180   : > { %v7702_v20 = vpack.c.bf16 %v3790_v14, %v3788_v12  ;;  %6241 = vmatmul.msk.bf16.gmra.mxu1 %vm1979_vm0, %v6499_v10 }
 0x181   : > { %8090 = vst [vmem:[%s8354_s25 + $0x470] sm:$0xff] %v7382_v19   ;;  %6305 = vmatmul.msk.bf16.gmra.mxu2 %vm1979_vm0, %v6563_v17  ;;  %v6502_v19 = vld [vmem:[%s8266_s20 + $0x2d0] sm:$0xff] }
 0x182   : > { %6369 = vmatmul.msk.bf16.gmra.mxu3 %vm1979_vm0, %v6627_v18  ;;  %8154 = vst [vmem:[%s8354_s25 + $0x670] sm:$0xff] %v7702_v20   ;;  %v6438_v18 = vld [vmem:[%s8266_s20 + $0xd0] sm:$0xff] }
 0x184   : > { %v3472_v21 = vpop.f32.mrf.mxu2  ;;  %v2834_v23 = vpop.f32.mrf.mxu0 }
 0x185   : > { %v3792_v22 = vpop.f32.mrf.mxu3  ;;  %v3154_v24 = vpop.f32.mrf.mxu1  ;;  %v2835_v27 = vadd.f32 %v8343_v39, %v2834_v23  ;;  %v3473_v35 = vadd.f32 %v8343_v39, %v3472_v21 }
 0x186   : > { %v3155_v28 = vadd.f32 %v8343_v39, %v3154_v24  ;;  %v3793_v36 = vadd.f32 %v8343_v39, %v3792_v22 }
 0x187   : > { %v6747_v29 = vpack.c.bf16 %v2835_v27, %v2833_v25  ;;  %v6630_v27 = vld [vmem:[%s8266_s20 + $0x6d0] sm:$0xff] }
 0x188   : > { %v7067_v30 = vpack.c.bf16 %v3155_v28, %v3153_v26  ;;  %v6566_v26 = vld [vmem:[%s8266_s20 + $0x4d0] sm:$0xff] }
 0x189   : > { %7963 = vst [vmem:[%s8354_s25 + $0x78] sm:$0xff] %v6747_v29  }
 0x18a   : > { %8027 = vst [vmem:[%s8354_s25 + $0x278] sm:$0xff] %v7067_v30  }
 0x18c   : > { %v3474_v31 = vpop.f32.mrf.mxu2  ;;  %v2837_v40 = vpop.f32.mrf.mxu0 }
 0x18d   : > { %v3794_v32 = vpop.f32.mrf.mxu3  ;;  %v3475_v37 = vadd.f32 %v8343_v39, %v3474_v31  ;;  %v3157_v41 = vpop.f32.mrf.mxu1  ;;  %v2838_v50 = vadd.f32 %v8675_v49, %v2837_v40 }
 0x18e   : > { %v3795_v38 = vadd.f32 %v8343_v39, %v3794_v32  ;;  %v3158_v51 = vadd.f32 %v8675_v49, %v3157_v41 }
 0x18f   : > { %v7387_v44 = vpack.c.bf16 %v3475_v37, %v3473_v35  ;;  %6178 = vmatmul.msk.bf16.gmra.mxu0 %vm1979_vm0, %v6436_v33 }
 0x190   : > { %v7707_v45 = vpack.c.bf16 %v3795_v38, %v3793_v36  ;;  %6242 = vmatmul.msk.bf16.gmra.mxu1 %vm1979_vm0, %v6500_v34 }
 0x191   : > { %8091 = vst [vmem:[%s8354_s25 + $0x478] sm:$0xff] %v7387_v44   ;;  %6306 = vmatmul.msk.bf16.gmra.mxu2 %vm1979_vm0, %v6564_v42  ;;  %v6503_v44 = vld [vmem:[%s8266_s20 + $0x2d8] sm:$0xff] }
 0x192   : > { %6370 = vmatmul.msk.bf16.gmra.mxu3 %vm1979_vm0, %v6628_v43  ;;  %8155 = vst [vmem:[%s8354_s25 + $0x678] sm:$0xff] %v7707_v45   ;;  %v6439_v43 = vld [vmem:[%s8266_s20 + $0xd8] sm:$0xff] }
 0x194   : > { %v3477_v39 = vpop.f32.mrf.mxu2  ;;  %v2839_v47 = vpop.f32.mrf.mxu0 }
 0x195   : > { %v3797_v46 = vpop.f32.mrf.mxu3  ;;  %v3159_v48 = vpop.f32.mrf.mxu1  ;;  %v2840_v52 = vadd.f32 %v8675_v49, %v2839_v47  ;;  %v3478_v60 = vadd.f32 %v8675_v49, %v3477_v39 }
 0x196   : > { %v3160_v53 = vadd.f32 %v8675_v49, %v3159_v48  ;;  %v3798_v61 = vadd.f32 %v8675_v49, %v3797_v46 }
 0x197   : > { %v6752_v54 = vpack.c.bf16 %v2840_v52, %v2838_v50  ;;  %v6631_v52 = vld [vmem:[%s8266_s20 + $0x6d8] sm:$0xff] }
 0x198   : > { %v7072_v55 = vpack.c.bf16 %v3160_v53, %v3158_v51  ;;  %v6567_v51 = vld [vmem:[%s8266_s20 + $0x4d8] sm:$0xff] }
 0x199   : > { %7964 = vst [vmem:[%s8354_s25 + $0x80] sm:$0xff] %v6752_v54  }
 0x19a   : > { %8028 = vst [vmem:[%s8354_s25 + $0x280] sm:$0xff] %v7072_v55  }
 0x19c   : > { %v3479_v56 = vpop.f32.mrf.mxu2  ;;  %v2842_v0 = vpop.f32.mrf.mxu0 }
 0x19d   : > { %v3799_v57 = vpop.f32.mrf.mxu3  ;;  %v3480_v62 = vadd.f32 %v8675_v49, %v3479_v56  ;;  %v3162_v1 = vpop.f32.mrf.mxu1  ;;  %v2843_v10 = vadd.f32 %v8675_v49, %v2842_v0 }
 0x19e   : > { %v3800_v63 = vadd.f32 %v8675_v49, %v3799_v57  ;;  %v3163_v11 = vadd.f32 %v8675_v49, %v3162_v1 }
 0x19f   : > { %v7392_v4 = vpack.c.bf16 %v3480_v62, %v3478_v60  ;;  %6179 = vmatmul.msk.bf16.gmra.mxu0 %vm1979_vm0, %v6437_v58 }
 0x1a0   : > { %v7712_v5 = vpack.c.bf16 %v3800_v63, %v3798_v61  ;;  %6243 = vmatmul.msk.bf16.gmra.mxu1 %vm1979_vm0, %v6501_v59 }
 0x1a1   : > { %8092 = vst [vmem:[%s8354_s25 + $0x480] sm:$0xff] %v7392_v4   ;;  %6307 = vmatmul.msk.bf16.gmra.mxu2 %vm1979_vm0, %v6565_v2  ;;  %v6504_v4 = vld [vmem:[%s8266_s20 + $0x2e0] sm:$0xff] }
 0x1a2   : > { %6371 = vmatmul.msk.bf16.gmra.mxu3 %vm1979_vm0, %v6629_v3  ;;  %8156 = vst [vmem:[%s8354_s25 + $0x680] sm:$0xff] %v7712_v5   ;;  %v6440_v3 = vld [vmem:[%s8266_s20 + $0xe0] sm:$0xff] }
 0x1a4   : > { %v3482_v6 = vpop.f32.mrf.mxu2  ;;  %v2844_v8 = vpop.f32.mrf.mxu0 }
 0x1a5   : > { %v3802_v7 = vpop.f32.mrf.mxu3  ;;  %v3164_v9 = vpop.f32.mrf.mxu1  ;;  %v2845_v12 = vadd.f32 %v8675_v49, %v2844_v8  ;;  %v3483_v20 = vadd.f32 %v8675_v49, %v3482_v6 }
 0x1a6   : > { %v3165_v13 = vadd.f32 %v8675_v49, %v3164_v9  ;;  %v3803_v21 = vadd.f32 %v8675_v49, %v3802_v7 }
 0x1a7   : > { %v6757_v14 = vpack.c.bf16 %v2845_v12, %v2843_v10  ;;  %v6632_v12 = vld [vmem:[%s8266_s20 + $0x6e0] sm:$0xff] }
 0x1a8   : > { %v7077_v15 = vpack.c.bf16 %v3165_v13, %v3163_v11  ;;  %v6568_v11 = vld [vmem:[%s8266_s20 + $0x4e0] sm:$0xff] }
 0x1a9   : > { %7965 = vst [vmem:[%s8354_s25 + $0x88] sm:$0xff] %v6757_v14  }
 0x1aa   : > { %8029 = vst [vmem:[%s8354_s25 + $0x288] sm:$0xff] %v7077_v15  }
 0x1ac   : > { %v3484_v16 = vpop.f32.mrf.mxu2  ;;  %v2847_v24 = vpop.f32.mrf.mxu0 }
 0x1ad   : > { %v3804_v17 = vpop.f32.mrf.mxu3  ;;  %v3485_v22 = vadd.f32 %v8675_v49, %v3484_v16  ;;  %v3167_v25 = vpop.f32.mrf.mxu1  ;;  %v2848_v34 = vadd.f32 %v8675_v49, %v2847_v24 }
 0x1ae   : > { %v3805_v23 = vadd.f32 %v8675_v49, %v3804_v17  ;;  %v3168_v35 = vadd.f32 %v8675_v49, %v3167_v25 }
 0x1af   : > { %v7397_v28 = vpack.c.bf16 %v3485_v22, %v3483_v20  ;;  %6180 = vmatmul.msk.bf16.gmra.mxu0 %vm1979_vm0, %v6438_v18 }
 0x1b0   : > { %v7717_v29 = vpack.c.bf16 %v3805_v23, %v3803_v21  ;;  %6244 = vmatmul.msk.bf16.gmra.mxu1 %vm1979_vm0, %v6502_v19 }
 0x1b1   : > { %8093 = vst [vmem:[%s8354_s25 + $0x488] sm:$0xff] %v7397_v28   ;;  %6308 = vmatmul.msk.bf16.gmra.mxu2 %vm1979_vm0, %v6566_v26  ;;  %v6505_v28 = vld [vmem:[%s8266_s20 + $0x2e8] sm:$0xff] }
 0x1b2   : > { %6372 = vmatmul.msk.bf16.gmra.mxu3 %vm1979_vm0, %v6630_v27  ;;  %8157 = vst [vmem:[%s8354_s25 + $0x688] sm:$0xff] %v7717_v29   ;;  %v6441_v27 = vld [vmem:[%s8266_s20 + $0xe8] sm:$0xff] }
 0x1b4   : > { %v3487_v30 = vpop.f32.mrf.mxu2  ;;  %v2849_v32 = vpop.f32.mrf.mxu0 }
 0x1b5   : > { %v3807_v31 = vpop.f32.mrf.mxu3  ;;  %v3169_v33 = vpop.f32.mrf.mxu1  ;;  %v2850_v36 = vadd.f32 %v8675_v49, %v2849_v32  ;;  %v3488_v45 = vadd.f32 %v8675_v49, %v3487_v30 }
 0x1b6   : > { %v3170_v37 = vadd.f32 %v8675_v49, %v3169_v33  ;;  %v3808_v39 = vadd.f32 %v8675_v49, %v3807_v31 }
 0x1b7   : > { %v6762_v38 = vpack.c.bf16 %v2850_v36, %v2848_v34  ;;  %v6633_v36 = vld [vmem:[%s8266_s20 + $0x6e8] sm:$0xff] }
 0x1b8   : > { %v7082_v40 = vpack.c.bf16 %v3170_v37, %v3168_v35  ;;  %v6569_v35 = vld [vmem:[%s8266_s20 + $0x4e8] sm:$0xff] }
 0x1b9   : > { %7966 = vst [vmem:[%s8354_s25 + $0x90] sm:$0xff] %v6762_v38  }
 0x1ba   : > { %8030 = vst [vmem:[%s8354_s25 + $0x290] sm:$0xff] %v7082_v40  }
 0x1bc   : > { %v3489_v41 = vpop.f32.mrf.mxu2  ;;  %v2852_v48 = vpop.f32.mrf.mxu0 }
 0x1bd   : > { %v3809_v42 = vpop.f32.mrf.mxu3  ;;  %v3490_v46 = vadd.f32 %v8675_v49, %v3489_v41  ;;  %v3172_v50 = vpop.f32.mrf.mxu1  ;;  %v2853_v59 = vadd.f32 %v8675_v49, %v2852_v48 }
 0x1be   : > { %v3810_v47 = vadd.f32 %v8675_v49, %v3809_v42  ;;  %v3173_v60 = vadd.f32 %v8675_v49, %v3172_v50 }
 0x1bf   : > { %v7402_v53 = vpack.c.bf16 %v3490_v46, %v3488_v45  ;;  %6181 = vmatmul.msk.bf16.gmra.mxu0 %vm1979_vm0, %v6439_v43 }
 0x1c0   : > { %v7722_v54 = vpack.c.bf16 %v3810_v47, %v3808_v39  ;;  %6245 = vmatmul.msk.bf16.gmra.mxu1 %vm1979_vm0, %v6503_v44 }
 0x1c1   : > { %8094 = vst [vmem:[%s8354_s25 + $0x490] sm:$0xff] %v7402_v53   ;;  %6309 = vmatmul.msk.bf16.gmra.mxu2 %vm1979_vm0, %v6567_v51  ;;  %v6506_v53 = vld [vmem:[%s8266_s20 + $0x2f0] sm:$0xff] }
 0x1c2   : > { %6373 = vmatmul.msk.bf16.gmra.mxu3 %vm1979_vm0, %v6631_v52  ;;  %8158 = vst [vmem:[%s8354_s25 + $0x690] sm:$0xff] %v7722_v54   ;;  %v6442_v52 = vld [vmem:[%s8266_s20 + $0xf0] sm:$0xff] }
 0x1c4   : > { %v3492_v55 = vpop.f32.mrf.mxu2  ;;  %v2854_v57 = vpop.f32.mrf.mxu0 }
 0x1c5   : > { %v3812_v56 = vpop.f32.mrf.mxu3  ;;  %v3174_v58 = vpop.f32.mrf.mxu1  ;;  %v2855_v61 = vadd.f32 %v8675_v49, %v2854_v57  ;;  %v3493_v5 = vadd.f32 %v8675_v49, %v3492_v55 }
 0x1c6   : > { %v3175_v62 = vadd.f32 %v8675_v49, %v3174_v58  ;;  %v3813_v6 = vadd.f32 %v8675_v49, %v3812_v56 }
 0x1c7   : > { %v6767_v63 = vpack.c.bf16 %v2855_v61, %v2853_v59  ;;  %v6634_v61 = vld [vmem:[%s8266_s20 + $0x6f0] sm:$0xff] }
 0x1c8   : > { %v7087_v0 = vpack.c.bf16 %v3175_v62, %v3173_v60  ;;  %v6570_v60 = vld [vmem:[%s8266_s20 + $0x4f0] sm:$0xff] }
 0x1c9   : > { %7967 = vst [vmem:[%s8354_s25 + $0x98] sm:$0xff] %v6767_v63  }
 0x1ca   : > { %8031 = vst [vmem:[%s8354_s25 + $0x298] sm:$0xff] %v7087_v0  }
 0x1cc   : > { %v3494_v1 = vpop.f32.mrf.mxu2  ;;  %v2857_v9 = vpop.f32.mrf.mxu0 }
 0x1cd   : > { %v3814_v2 = vpop.f32.mrf.mxu3  ;;  %v3495_v7 = vadd.f32 %v8675_v49, %v3494_v1  ;;  %v3177_v10 = vpop.f32.mrf.mxu1  ;;  %v2858_v19 = vadd.f32 %v8675_v49, %v2857_v9 }
 0x1ce   : > { %v3815_v8 = vadd.f32 %v8675_v49, %v3814_v2  ;;  %v3178_v20 = vadd.f32 %v8675_v49, %v3177_v10 }
 0x1cf   : > { %v7407_v13 = vpack.c.bf16 %v3495_v7, %v3493_v5  ;;  %6182 = vmatmul.msk.bf16.gmra.mxu0 %vm1979_vm0, %v6440_v3 }
 0x1d0   : > { %v7727_v14 = vpack.c.bf16 %v3815_v8, %v3813_v6  ;;  %6246 = vmatmul.msk.bf16.gmra.mxu1 %vm1979_vm0, %v6504_v4 }
 0x1d1   : > { %8095 = vst [vmem:[%s8354_s25 + $0x498] sm:$0xff] %v7407_v13   ;;  %6310 = vmatmul.msk.bf16.gmra.mxu2 %vm1979_vm0, %v6568_v11  ;;  %v6507_v13 = vld [vmem:[%s8266_s20 + $0x2f8] sm:$0xff] }
 0x1d2   : > { %6374 = vmatmul.msk.bf16.gmra.mxu3 %vm1979_vm0, %v6632_v12  ;;  %8159 = vst [vmem:[%s8354_s25 + $0x698] sm:$0xff] %v7727_v14   ;;  %v6443_v12 = vld [vmem:[%s8266_s20 + $0xf8] sm:$0xff] }
 0x1d4   : > { %v3497_v15 = vpop.f32.mrf.mxu2  ;;  %v2859_v17 = vpop.f32.mrf.mxu0 }
 0x1d5   : > { %v3817_v16 = vpop.f32.mrf.mxu3  ;;  %v3179_v18 = vpop.f32.mrf.mxu1  ;;  %v2860_v21 = vadd.f32 %v8675_v49, %v2859_v17  ;;  %v3498_v29 = vadd.f32 %v8675_v49, %v3497_v15 }
 0x1d6   : > { %v3180_v22 = vadd.f32 %v8675_v49, %v3179_v18  ;;  %v3818_v30 = vadd.f32 %v8675_v49, %v3817_v16 }
 0x1d7   : > { %v6772_v23 = vpack.c.bf16 %v2860_v21, %v2858_v19  ;;  %v6635_v21 = vld [vmem:[%s8266_s20 + $0x6f8] sm:$0xff] }
 0x1d8   : > { %v7092_v24 = vpack.c.bf16 %v3180_v22, %v3178_v20  ;;  %v6571_v20 = vld [vmem:[%s8266_s20 + $0x4f8] sm:$0xff] }
 0x1d9   : > { %7968 = vst [vmem:[%s8354_s25 + $0xa0] sm:$0xff] %v6772_v23  }
 0x1da   : > { %8032 = vst [vmem:[%s8354_s25 + $0x2a0] sm:$0xff] %v7092_v24  }
 0x1dc   : > { %v3499_v25 = vpop.f32.mrf.mxu2  ;;  %v2862_v33 = vpop.f32.mrf.mxu0 }
 0x1dd   : > { %v3819_v26 = vpop.f32.mrf.mxu3  ;;  %v3500_v31 = vadd.f32 %v8675_v49, %v3499_v25  ;;  %v3182_v34 = vpop.f32.mrf.mxu1  ;;  %v2863_v44 = vadd.f32 %v8675_v49, %v2862_v33 }
 0x1de   : > { %v3820_v32 = vadd.f32 %v8675_v49, %v3819_v26  ;;  %v3183_v45 = vadd.f32 %v8675_v49, %v3182_v34 }
 0x1df   : > { %v7412_v37 = vpack.c.bf16 %v3500_v31, %v3498_v29  ;;  %6183 = vmatmul.msk.bf16.gmra.mxu0 %vm1979_vm0, %v6441_v27 }
 0x1e0   : > { %v7732_v38 = vpack.c.bf16 %v3820_v32, %v3818_v30  ;;  %6247 = vmatmul.msk.bf16.gmra.mxu1 %vm1979_vm0, %v6505_v28 }
 0x1e1   : > { %8096 = vst [vmem:[%s8354_s25 + $0x4a0] sm:$0xff] %v7412_v37   ;;  %6311 = vmatmul.msk.bf16.gmra.mxu2 %vm1979_vm0, %v6569_v35  ;;  %v6508_v37 = vld [vmem:[%s8266_s20 + $0x300] sm:$0xff] }
 0x1e2   : > { %6375 = vmatmul.msk.bf16.gmra.mxu3 %vm1979_vm0, %v6633_v36  ;;  %8160 = vst [vmem:[%s8354_s25 + $0x6a0] sm:$0xff] %v7732_v38   ;;  %v6444_v36 = vld [vmem:[%s8266_s20 + $0x100] sm:$0xff] }
 0x1e4   : > { %v3502_v40 = vpop.f32.mrf.mxu2  ;;  %v2864_v42 = vpop.f32.mrf.mxu0 }
 0x1e5   : > { %v3822_v41 = vpop.f32.mrf.mxu3  ;;  %v3184_v43 = vpop.f32.mrf.mxu1  ;;  %v2865_v39 = vadd.f32 %v8675_v49, %v2864_v42  ;;  %v3503_v54 = vadd.f32 %v8675_v49, %v3502_v40 }
 0x1e6   : > { %v3185_v46 = vadd.f32 %v8675_v49, %v3184_v43  ;;  %v3823_v55 = vadd.f32 %v8675_v49, %v3822_v41 }
 0x1e7   : > { %v6777_v47 = vpack.c.bf16 %v2865_v39, %v2863_v44  ;;  %v6636_v39 = vld [vmem:[%s8266_s20 + $0x700] sm:$0xff] }
 0x1e8   : > { %v7097_v48 = vpack.c.bf16 %v3185_v46, %v3183_v45  ;;  %v6572_v45 = vld [vmem:[%s8266_s20 + $0x500] sm:$0xff] }
 0x1e9   : > { %7969 = vst [vmem:[%s8354_s25 + $0xa8] sm:$0xff] %v6777_v47  }
 0x1ea   : > { %8033 = vst [vmem:[%s8354_s25 + $0x2a8] sm:$0xff] %v7097_v48  }
 0x1ec   : > { %v3504_v50 = vpop.f32.mrf.mxu2  ;;  %v2867_v58 = vpop.f32.mrf.mxu0 }
 0x1ed   : > { %v3824_v51 = vpop.f32.mrf.mxu3  ;;  %v3505_v56 = vadd.f32 %v8675_v49, %v3504_v50  ;;  %v3187_v59 = vpop.f32.mrf.mxu1  ;;  %v2868_v4 = vadd.f32 %v8675_v49, %v2867_v58 }
 0x1ee   : > { %v3825_v57 = vadd.f32 %v8675_v49, %v3824_v51  ;;  %v3188_v5 = vadd.f32 %v8675_v49, %v3187_v59 }
 0x1ef   : > { %v7417_v62 = vpack.c.bf16 %v3505_v56, %v3503_v54  ;;  %6184 = vmatmul.msk.bf16.gmra.mxu0 %vm1979_vm0, %v6442_v52 }
 0x1f0   : > { %v7737_v63 = vpack.c.bf16 %v3825_v57, %v3823_v55  ;;  %6248 = vmatmul.msk.bf16.gmra.mxu1 %vm1979_vm0, %v6506_v53 }
 0x1f1   : > { %8097 = vst [vmem:[%s8354_s25 + $0x4a8] sm:$0xff] %v7417_v62   ;;  %6312 = vmatmul.msk.bf16.gmra.mxu2 %vm1979_vm0, %v6570_v60  ;;  %v6509_v62 = vld [vmem:[%s8266_s20 + $0x308] sm:$0xff] }
 0x1f2   : > { %6376 = vmatmul.msk.bf16.gmra.mxu3 %vm1979_vm0, %v6634_v61  ;;  %8161 = vst [vmem:[%s8354_s25 + $0x6a8] sm:$0xff] %v7737_v63   ;;  %v6445_v61 = vld [vmem:[%s8266_s20 + $0x108] sm:$0xff] }
 0x1f4   : > { %v3507_v0 = vpop.f32.mrf.mxu2  ;;  %v2869_v2 = vpop.f32.mrf.mxu0 }
 0x1f5   : > { %v3827_v1 = vpop.f32.mrf.mxu3  ;;  %v3189_v3 = vpop.f32.mrf.mxu1  ;;  %v2870_v6 = vadd.f32 %v8675_v49, %v2869_v2  ;;  %v3508_v14 = vadd.f32 %v8675_v49, %v3507_v0 }
 0x1f6   : > { %v3190_v7 = vadd.f32 %v8675_v49, %v3189_v3  ;;  %v3828_v15 = vadd.f32 %v8675_v49, %v3827_v1 }
 0x1f7   : > { %v6782_v8 = vpack.c.bf16 %v2870_v6, %v2868_v4  ;;  %v6637_v6 = vld [vmem:[%s8266_s20 + $0x708] sm:$0xff] }
 0x1f8   : > { %v7102_v9 = vpack.c.bf16 %v3190_v7, %v3188_v5  ;;  %v6573_v5 = vld [vmem:[%s8266_s20 + $0x508] sm:$0xff] }
 0x1f9   : > { %7970 = vst [vmem:[%s8354_s25 + $0xb0] sm:$0xff] %v6782_v8  }
 0x1fa   : > { %8034 = vst [vmem:[%s8354_s25 + $0x2b0] sm:$0xff] %v7102_v9  }
 0x1fc   : > { %v3509_v10 = vpop.f32.mrf.mxu2  ;;  %v2872_v18 = vpop.f32.mrf.mxu0 }
 0x1fd   : > { %v3829_v11 = vpop.f32.mrf.mxu3  ;;  %v3510_v16 = vadd.f32 %v8675_v49, %v3509_v10  ;;  %v3192_v19 = vpop.f32.mrf.mxu1  ;;  %v2873_v28 = vadd.f32 %v8675_v49, %v2872_v18 }
 0x1fe   : > { %v3830_v17 = vadd.f32 %v8675_v49, %v3829_v11  ;;  %v3193_v29 = vadd.f32 %v8675_v49, %v3192_v19 }
 0x1ff   : > { %v7422_v22 = vpack.c.bf16 %v3510_v16, %v3508_v14  ;;  %6185 = vmatmul.msk.bf16.gmra.mxu0 %vm1979_vm0, %v6443_v12 }
 0x200   : > { %v7742_v23 = vpack.c.bf16 %v3830_v17, %v3828_v15  ;;  %6249 = vmatmul.msk.bf16.gmra.mxu1 %vm1979_vm0, %v6507_v13 }
 0x201   : > { %8098 = vst [vmem:[%s8354_s25 + $0x4b0] sm:$0xff] %v7422_v22   ;;  %6313 = vmatmul.msk.bf16.gmra.mxu2 %vm1979_vm0, %v6571_v20  ;;  %v6510_v22 = vld [vmem:[%s8266_s20 + $0x310] sm:$0xff] }
 0x202   : > { %6377 = vmatmul.msk.bf16.gmra.mxu3 %vm1979_vm0, %v6635_v21  ;;  %8162 = vst [vmem:[%s8354_s25 + $0x6b0] sm:$0xff] %v7742_v23   ;;  %v6446_v21 = vld [vmem:[%s8266_s20 + $0x110] sm:$0xff] }
 0x204   : > { %v3512_v24 = vpop.f32.mrf.mxu2  ;;  %v2874_v26 = vpop.f32.mrf.mxu0 }
 0x205   : > { %v3832_v25 = vpop.f32.mrf.mxu3  ;;  %v3194_v27 = vpop.f32.mrf.mxu1  ;;  %v2875_v30 = vadd.f32 %v8675_v49, %v2874_v26  ;;  %v3513_v38 = vadd.f32 %v8675_v49, %v3512_v24 }
 0x206   : > { %v3195_v31 = vadd.f32 %v8675_v49, %v3194_v27  ;;  %v3833_v40 = vadd.f32 %v8675_v49, %v3832_v25 }
 0x207   : > { %v6787_v32 = vpack.c.bf16 %v2875_v30, %v2873_v28  ;;  %v6638_v30 = vld [vmem:[%s8266_s20 + $0x710] sm:$0xff] }
 0x208   : > { %v7107_v33 = vpack.c.bf16 %v3195_v31, %v3193_v29  ;;  %v6574_v29 = vld [vmem:[%s8266_s20 + $0x510] sm:$0xff] }
 0x209   : > { %7971 = vst [vmem:[%s8354_s25 + $0xb8] sm:$0xff] %v6787_v32  }
 0x20a   : > { %8035 = vst [vmem:[%s8354_s25 + $0x2b8] sm:$0xff] %v7107_v33  }
 0x20c   : > { %v3514_v34 = vpop.f32.mrf.mxu2  ;;  %v2877_v43 = vpop.f32.mrf.mxu0 }
 0x20d   : > { %v3834_v35 = vpop.f32.mrf.mxu3  ;;  %v3515_v41 = vadd.f32 %v8675_v49, %v3514_v34  ;;  %v3197_v44 = vpop.f32.mrf.mxu1  ;;  %v2878_v53 = vadd.f32 %v8675_v49, %v2877_v43 }
 0x20e   : > { %v3835_v42 = vadd.f32 %v8675_v49, %v3834_v35  ;;  %v3198_v54 = vadd.f32 %v8675_v49, %v3197_v44 }
 0x20f   : > { %v7427_v46 = vpack.c.bf16 %v3515_v41, %v3513_v38  ;;  %6186 = vmatmul.msk.bf16.gmra.mxu0 %vm1979_vm0, %v6444_v36 }
 0x210   : > { %v7747_v47 = vpack.c.bf16 %v3835_v42, %v3833_v40  ;;  %6250 = vmatmul.msk.bf16.gmra.mxu1 %vm1979_vm0, %v6508_v37 }
 0x211   : > { %8099 = vst [vmem:[%s8354_s25 + $0x4b8] sm:$0xff] %v7427_v46   ;;  %6314 = vmatmul.msk.bf16.gmra.mxu2 %vm1979_vm0, %v6572_v45  ;;  %v6511_v46 = vld [vmem:[%s8266_s20 + $0x318] sm:$0xff] }
 0x212   : > { %6378 = vmatmul.msk.bf16.gmra.mxu3 %vm1979_vm0, %v6636_v39  ;;  %8163 = vst [vmem:[%s8354_s25 + $0x6b8] sm:$0xff] %v7747_v47   ;;  %v6447_v39 = vld [vmem:[%s8266_s20 + $0x118] sm:$0xff] }
 0x214   : > { %v3517_v48 = vpop.f32.mrf.mxu2  ;;  %v2879_v51 = vpop.f32.mrf.mxu0 }
 0x215   : > { %v3837_v50 = vpop.f32.mrf.mxu3  ;;  %v3199_v52 = vpop.f32.mrf.mxu1  ;;  %v2880_v55 = vadd.f32 %v8675_v49, %v2879_v51  ;;  %v3518_v63 = vadd.f32 %v8675_v49, %v3517_v48 }
 0x216   : > { %v3200_v56 = vadd.f32 %v8675_v49, %v3199_v52  ;;  %v3838_v0 = vadd.f32 %v8675_v49, %v3837_v50 }
 0x217   : > { %v6792_v57 = vpack.c.bf16 %v2880_v55, %v2878_v53  ;;  %v6639_v55 = vld [vmem:[%s8266_s20 + $0x718] sm:$0xff] }
 0x218   : > { %v7112_v58 = vpack.c.bf16 %v3200_v56, %v3198_v54  ;;  %v6575_v54 = vld [vmem:[%s8266_s20 + $0x518] sm:$0xff] }
 0x219   : > { %7972 = vst [vmem:[%s8354_s25 + $0xc0] sm:$0xff] %v6792_v57  }
 0x21a   : > { %8036 = vst [vmem:[%s8354_s25 + $0x2c0] sm:$0xff] %v7112_v58  }
 0x21c   : > { %v3519_v59 = vpop.f32.mrf.mxu2  ;;  %v2882_v3 = vpop.f32.mrf.mxu0 }
 0x21d   : > { %v3839_v60 = vpop.f32.mrf.mxu3  ;;  %v3520_v1 = vadd.f32 %v8675_v49, %v3519_v59  ;;  %v3202_v4 = vpop.f32.mrf.mxu1  ;;  %v2883_v13 = vadd.f32 %v8675_v49, %v2882_v3 }
 0x21e   : > { %v3840_v2 = vadd.f32 %v8675_v49, %v3839_v60  ;;  %v3203_v14 = vadd.f32 %v8675_v49, %v3202_v4 }
 0x21f   : > { %v7432_v7 = vpack.c.bf16 %v3520_v1, %v3518_v63  ;;  %6187 = vmatmul.msk.bf16.gmra.mxu0 %vm1979_vm0, %v6445_v61 }
 0x220   : > { %v7752_v8 = vpack.c.bf16 %v3840_v2, %v3838_v0  ;;  %6251 = vmatmul.msk.bf16.gmra.mxu1 %vm1979_vm0, %v6509_v62 }
 0x221   : > { %8100 = vst [vmem:[%s8354_s25 + $0x4c0] sm:$0xff] %v7432_v7   ;;  %6315 = vmatmul.msk.bf16.gmra.mxu2 %vm1979_vm0, %v6573_v5  ;;  %v6512_v7 = vld [vmem:[%s8266_s20 + $0x320] sm:$0xff] }
 0x222   : > { %6379 = vmatmul.msk.bf16.gmra.mxu3 %vm1979_vm0, %v6637_v6  ;;  %8164 = vst [vmem:[%s8354_s25 + $0x6c0] sm:$0xff] %v7752_v8   ;;  %v6448_v6 = vld [vmem:[%s8266_s20 + $0x120] sm:$0xff] }
 0x224   : > { %v3522_v9 = vpop.f32.mrf.mxu2  ;;  %v2884_v11 = vpop.f32.mrf.mxu0 }
 0x225   : > { %v3842_v10 = vpop.f32.mrf.mxu3  ;;  %v3204_v12 = vpop.f32.mrf.mxu1  ;;  %v2885_v15 = vadd.f32 %v8675_v49, %v2884_v11  ;;  %v3523_v23 = vadd.f32 %v8675_v49, %v3522_v9 }
 0x226   : > { %v3205_v16 = vadd.f32 %v8675_v49, %v3204_v12  ;;  %v3843_v24 = vadd.f32 %v8675_v49, %v3842_v10 }
 0x227   : > { %v6797_v17 = vpack.c.bf16 %v2885_v15, %v2883_v13  ;;  %v6640_v15 = vld [vmem:[%s8266_s20 + $0x720] sm:$0xff] }
 0x228   : > { %v7117_v18 = vpack.c.bf16 %v3205_v16, %v3203_v14  ;;  %v6576_v14 = vld [vmem:[%s8266_s20 + $0x520] sm:$0xff] }
 0x229   : > { %7973 = vst [vmem:[%s8354_s25 + $0xc8] sm:$0xff] %v6797_v17  }
 0x22a   : > { %8037 = vst [vmem:[%s8354_s25 + $0x2c8] sm:$0xff] %v7117_v18  }
 0x22c   : > { %v3524_v19 = vpop.f32.mrf.mxu2  ;;  %v2887_v27 = vpop.f32.mrf.mxu0 }
 0x22d   : > { %v3844_v20 = vpop.f32.mrf.mxu3  ;;  %v3525_v25 = vadd.f32 %v8675_v49, %v3524_v19  ;;  %v3207_v28 = vpop.f32.mrf.mxu1  ;;  %v2888_v37 = vadd.f32 %v8675_v49, %v2887_v27 }
 0x22e   : > { %v3845_v26 = vadd.f32 %v8675_v49, %v3844_v20  ;;  %v3208_v38 = vadd.f32 %v8675_v49, %v3207_v28 }
 0x22f   : > { %v7437_v31 = vpack.c.bf16 %v3525_v25, %v3523_v23  ;;  %6188 = vmatmul.msk.bf16.gmra.mxu0 %vm1979_vm0, %v6446_v21 }
 0x230   : > { %v7757_v32 = vpack.c.bf16 %v3845_v26, %v3843_v24  ;;  %6252 = vmatmul.msk.bf16.gmra.mxu1 %vm1979_vm0, %v6510_v22 }
 0x231   : > { %8101 = vst [vmem:[%s8354_s25 + $0x4c8] sm:$0xff] %v7437_v31   ;;  %6316 = vmatmul.msk.bf16.gmra.mxu2 %vm1979_vm0, %v6574_v29  ;;  %v6513_v31 = vld [vmem:[%s8266_s20 + $0x328] sm:$0xff] }
 0x232   : > { %6380 = vmatmul.msk.bf16.gmra.mxu3 %vm1979_vm0, %v6638_v30  ;;  %8165 = vst [vmem:[%s8354_s25 + $0x6c8] sm:$0xff] %v7757_v32   ;;  %v6449_v30 = vld [vmem:[%s8266_s20 + $0x128] sm:$0xff] }
 0x234   : > { %v3527_v33 = vpop.f32.mrf.mxu2  ;;  %v2889_v35 = vpop.f32.mrf.mxu0 }
 0x235   : > { %v3847_v34 = vpop.f32.mrf.mxu3  ;;  %v3209_v36 = vpop.f32.mrf.mxu1  ;;  %v2890_v40 = vadd.f32 %v8675_v49, %v2889_v35  ;;  %v3528_v47 = vadd.f32 %v8675_v49, %v3527_v33 }
 0x236   : > { %v3210_v41 = vadd.f32 %v8675_v49, %v3209_v36  ;;  %v3848_v48 = vadd.f32 %v8675_v49, %v3847_v34 }
 0x237   : > { %v6802_v42 = vpack.c.bf16 %v2890_v40, %v2888_v37  ;;  %v6641_v40 = vld [vmem:[%s8266_s20 + $0x728] sm:$0xff] }
 0x238   : > { %v7122_v43 = vpack.c.bf16 %v3210_v41, %v3208_v38  ;;  %v6577_v38 = vld [vmem:[%s8266_s20 + $0x528] sm:$0xff] }
 0x239   : > { %7974 = vst [vmem:[%s8354_s25 + $0xd0] sm:$0xff] %v6802_v42  }
 0x23a   : > { %8038 = vst [vmem:[%s8354_s25 + $0x2d0] sm:$0xff] %v7122_v43  }
 0x23c   : > { %v3529_v44 = vpop.f32.mrf.mxu2  ;;  %v2892_v52 = vpop.f32.mrf.mxu0 }
 0x23d   : > { %v3849_v45 = vpop.f32.mrf.mxu3  ;;  %v3530_v50 = vadd.f32 %v8675_v49, %v3529_v44  ;;  %v3212_v53 = vpop.f32.mrf.mxu1  ;;  %v2893_v62 = vadd.f32 %v8675_v49, %v2892_v52 }
 0x23e   : > { %v3850_v51 = vadd.f32 %v8675_v49, %v3849_v45  ;;  %v3213_v63 = vadd.f32 %v8675_v49, %v3212_v53 }
 0x23f   : > { %v7442_v56 = vpack.c.bf16 %v3530_v50, %v3528_v47  ;;  %6189 = vmatmul.msk.bf16.gmra.mxu0 %vm1979_vm0, %v6447_v39 }
 0x240   : > { %v7762_v57 = vpack.c.bf16 %v3850_v51, %v3848_v48  ;;  %6253 = vmatmul.msk.bf16.gmra.mxu1 %vm1979_vm0, %v6511_v46 }
 0x241   : > { %8102 = vst [vmem:[%s8354_s25 + $0x4d0] sm:$0xff] %v7442_v56   ;;  %6317 = vmatmul.msk.bf16.gmra.mxu2 %vm1979_vm0, %v6575_v54  ;;  %v6514_v56 = vld [vmem:[%s8266_s20 + $0x330] sm:$0xff] }
 0x242   : > { %6381 = vmatmul.msk.bf16.gmra.mxu3 %vm1979_vm0, %v6639_v55  ;;  %8166 = vst [vmem:[%s8354_s25 + $0x6d0] sm:$0xff] %v7762_v57   ;;  %v6450_v55 = vld [vmem:[%s8266_s20 + $0x130] sm:$0xff] }
 0x244   : > { %v3532_v58 = vpop.f32.mrf.mxu2  ;;  %v2894_v60 = vpop.f32.mrf.mxu0 }
 0x245   : > { %v3852_v59 = vpop.f32.mrf.mxu3  ;;  %v3214_v61 = vpop.f32.mrf.mxu1  ;;  %v2895_v0 = vadd.f32 %v8675_v49, %v2894_v60  ;;  %v3533_v8 = vadd.f32 %v8675_v49, %v3532_v58 }
 0x246   : > { %v3215_v1 = vadd.f32 %v8675_v49, %v3214_v61  ;;  %v3853_v9 = vadd.f32 %v8675_v49, %v3852_v59 }
 0x247   : > { %v6807_v2 = vpack.c.bf16 %v2895_v0, %v2893_v62  ;;  %v6642_v0 = vld [vmem:[%s8266_s20 + $0x730] sm:$0xff] }
 0x248   : > { %v7127_v3 = vpack.c.bf16 %v3215_v1, %v3213_v63  ;;  %v6578_v63 = vld [vmem:[%s8266_s20 + $0x530] sm:$0xff] }
 0x249   : > { %7975 = vst [vmem:[%s8354_s25 + $0xd8] sm:$0xff] %v6807_v2  }
 0x24a   : > { %8039 = vst [vmem:[%s8354_s25 + $0x2d8] sm:$0xff] %v7127_v3  }
 0x24c   : > { %v3534_v4 = vpop.f32.mrf.mxu2  ;;  %v2897_v12 = vpop.f32.mrf.mxu0 }
 0x24d   : > { %v3854_v5 = vpop.f32.mrf.mxu3  ;;  %v3535_v10 = vadd.f32 %v8675_v49, %v3534_v4  ;;  %v3217_v13 = vpop.f32.mrf.mxu1  ;;  %v2898_v22 = vadd.f32 %v8675_v49, %v2897_v12 }
 0x24e   : > { %v3855_v11 = vadd.f32 %v8675_v49, %v3854_v5  ;;  %v3218_v23 = vadd.f32 %v8675_v49, %v3217_v13 }
 0x24f   : > { %v7447_v16 = vpack.c.bf16 %v3535_v10, %v3533_v8  ;;  %6190 = vmatmul.msk.bf16.gmra.mxu0 %vm1979_vm0, %v6448_v6 }
 0x250   : > { %v7767_v17 = vpack.c.bf16 %v3855_v11, %v3853_v9  ;;  %6254 = vmatmul.msk.bf16.gmra.mxu1 %vm1979_vm0, %v6512_v7 }
 0x251   : > { %8103 = vst [vmem:[%s8354_s25 + $0x4d8] sm:$0xff] %v7447_v16   ;;  %6318 = vmatmul.msk.bf16.gmra.mxu2 %vm1979_vm0, %v6576_v14  ;;  %v6515_v16 = vld [vmem:[%s8266_s20 + $0x338] sm:$0xff] }
 0x252   : > { %6382 = vmatmul.msk.bf16.gmra.mxu3 %vm1979_vm0, %v6640_v15  ;;  %8167 = vst [vmem:[%s8354_s25 + $0x6d8] sm:$0xff] %v7767_v17   ;;  %v6451_v15 = vld [vmem:[%s8266_s20 + $0x138] sm:$0xff] }
 0x254   : > { %v3537_v18 = vpop.f32.mrf.mxu2  ;;  %v2899_v20 = vpop.f32.mrf.mxu0 }
 0x255   : > { %v3857_v19 = vpop.f32.mrf.mxu3  ;;  %v3219_v21 = vpop.f32.mrf.mxu1  ;;  %v2900_v24 = vadd.f32 %v8675_v49, %v2899_v20  ;;  %v3538_v32 = vadd.f32 %v8675_v49, %v3537_v18 }
 0x256   : > { %v3220_v25 = vadd.f32 %v8675_v49, %v3219_v21  ;;  %v3858_v33 = vadd.f32 %v8675_v49, %v3857_v19 }
 0x257   : > { %v6812_v26 = vpack.c.bf16 %v2900_v24, %v2898_v22  ;;  %v6643_v24 = vld [vmem:[%s8266_s20 + $0x738] sm:$0xff] }
 0x258   : > { %v7132_v27 = vpack.c.bf16 %v3220_v25, %v3218_v23  ;;  %v6579_v23 = vld [vmem:[%s8266_s20 + $0x538] sm:$0xff] }
 0x259   : > { %7976 = vst [vmem:[%s8354_s25 + $0xe0] sm:$0xff] %v6812_v26  }
 0x25a   : > { %8040 = vst [vmem:[%s8354_s25 + $0x2e0] sm:$0xff] %v7132_v27  }
 0x25c   : > { %v3539_v28 = vpop.f32.mrf.mxu2  ;;  %v2902_v36 = vpop.f32.mrf.mxu0 }
 0x25d   : > { %v3859_v29 = vpop.f32.mrf.mxu3  ;;  %v3540_v34 = vadd.f32 %v8675_v49, %v3539_v28  ;;  %v3222_v37 = vpop.f32.mrf.mxu1  ;;  %v2903_v46 = vadd.f32 %v8675_v49, %v2902_v36 }
 0x25e   : > { %v3860_v35 = vadd.f32 %v8675_v49, %v3859_v29  ;;  %v3223_v47 = vadd.f32 %v8675_v49, %v3222_v37 }
 0x25f   : > { %v7452_v41 = vpack.c.bf16 %v3540_v34, %v3538_v32  ;;  %6191 = vmatmul.msk.bf16.gmra.mxu0 %vm1979_vm0, %v6449_v30 }
 0x260   : > { %v7772_v42 = vpack.c.bf16 %v3860_v35, %v3858_v33  ;;  %6255 = vmatmul.msk.bf16.gmra.mxu1 %vm1979_vm0, %v6513_v31 }
 0x261   : > { %8104 = vst [vmem:[%s8354_s25 + $0x4e0] sm:$0xff] %v7452_v41   ;;  %6319 = vmatmul.msk.bf16.gmra.mxu2 %vm1979_vm0, %v6577_v38  ;;  %v6516_v41 = vld [vmem:[%s8266_s20 + $0x340] sm:$0xff] }
 0x262   : > { %6383 = vmatmul.msk.bf16.gmra.mxu3 %vm1979_vm0, %v6641_v40  ;;  %8168 = vst [vmem:[%s8354_s25 + $0x6e0] sm:$0xff] %v7772_v42   ;;  %v6452_v40 = vld [vmem:[%s8266_s20 + $0x140] sm:$0xff] }
 0x264   : > { %v3542_v43 = vpop.f32.mrf.mxu2  ;;  %v2904_v45 = vpop.f32.mrf.mxu0 }
 0x265   : > { %v3862_v44 = vpop.f32.mrf.mxu3  ;;  %v3224_v39 = vpop.f32.mrf.mxu1  ;;  %v2905_v48 = vadd.f32 %v8675_v49, %v2904_v45  ;;  %v3543_v57 = vadd.f32 %v8675_v49, %v3542_v43 }
 0x266   : > { %v3225_v50 = vadd.f32 %v8675_v49, %v3224_v39  ;;  %v3863_v58 = vadd.f32 %v8675_v49, %v3862_v44 }
 0x267   : > { %v6817_v51 = vpack.c.bf16 %v2905_v48, %v2903_v46  ;;  %v6644_v48 = vld [vmem:[%s8266_s20 + $0x740] sm:$0xff] }
 0x268   : > { %v7137_v52 = vpack.c.bf16 %v3225_v50, %v3223_v47  ;;  %v6580_v47 = vld [vmem:[%s8266_s20 + $0x540] sm:$0xff] }
 0x269   : > { %7977 = vst [vmem:[%s8354_s25 + $0xe8] sm:$0xff] %v6817_v51  }
 0x26a   : > { %8041 = vst [vmem:[%s8354_s25 + $0x2e8] sm:$0xff] %v7137_v52  }
 0x26c   : > { %v3544_v53 = vpop.f32.mrf.mxu2  ;;  %v2907_v61 = vpop.f32.mrf.mxu0 }
 0x26d   : > { %v3864_v54 = vpop.f32.mrf.mxu3  ;;  %v3545_v59 = vadd.f32 %v8675_v49, %v3544_v53  ;;  %v3227_v62 = vpop.f32.mrf.mxu1  ;;  %v2908_v7 = vadd.f32 %v8675_v49, %v2907_v61 }
 0x26e   : > { %v3865_v60 = vadd.f32 %v8675_v49, %v3864_v54  ;;  %v3228_v8 = vadd.f32 %v8675_v49, %v3227_v62 }
 0x26f   : > { %v7457_v1 = vpack.c.bf16 %v3545_v59, %v3543_v57  ;;  %6192 = vmatmul.msk.bf16.gmra.mxu0 %vm1979_vm0, %v6450_v55  ;;  %v9000_v55 = vld [vmem:[%s9580_s2] ss:$0 sm:$0xff] }
 0x270   : > { %v7777_v2 = vpack.c.bf16 %v3865_v60, %v3863_v58  ;;  %6256 = vmatmul.msk.bf16.gmra.mxu1 %vm1979_vm0, %v6514_v56 }
 0x271   : > { %8105 = vst [vmem:[%s8354_s25 + $0x4e8] sm:$0xff] %v7457_v1   ;;  %6320 = vmatmul.msk.bf16.gmra.mxu2 %vm1979_vm0, %v6578_v63  ;;  %v6517_v1 = vld [vmem:[%s8266_s20 + $0x348] sm:$0xff] }
 0x272   : > { %6384 = vmatmul.msk.bf16.gmra.mxu3 %vm1979_vm0, %v6642_v0  ;;  %8169 = vst [vmem:[%s8354_s25 + $0x6e8] sm:$0xff] %v7777_v2   ;;  %v6453_v0 = vld [vmem:[%s8266_s20 + $0x148] sm:$0xff] }
 0x274   : > { %v3547_v3 = vpop.f32.mrf.mxu2  ;;  %v2909_v5 = vpop.f32.mrf.mxu0 }
 0x275   : > { %v3867_v4 = vpop.f32.mrf.mxu3  ;;  %v3229_v6 = vpop.f32.mrf.mxu1  ;;  %v2910_v9 = vadd.f32 %v8675_v49, %v2909_v5  ;;  %v3548_v17 = vadd.f32 %v8675_v49, %v3547_v3 }
 0x276   : > { %v3230_v10 = vadd.f32 %v8675_v49, %v3229_v6  ;;  %v3868_v18 = vadd.f32 %v8675_v49, %v3867_v4 }
 0x277   : > { %v6822_v11 = vpack.c.bf16 %v2910_v9, %v2908_v7  ;;  %v6645_v9 = vld [vmem:[%s8266_s20 + $0x748] sm:$0xff] }
 0x278   : > { %v7142_v12 = vpack.c.bf16 %v3230_v10, %v3228_v8  ;;  %v6581_v8 = vld [vmem:[%s8266_s20 + $0x548] sm:$0xff] }
 0x279   : > { %7978 = vst [vmem:[%s8354_s25 + $0xf0] sm:$0xff] %v6822_v11  }
 0x27a   : > { %8042 = vst [vmem:[%s8354_s25 + $0x2f0] sm:$0xff] %v7142_v12  }
 0x27c   : > { %v3549_v13 = vpop.f32.mrf.mxu2  ;;  %v2912_v21 = vpop.f32.mrf.mxu0 }
 0x27d   : > { %v3869_v14 = vpop.f32.mrf.mxu3  ;;  %v3550_v19 = vadd.f32 %v8675_v49, %v3549_v13  ;;  %v3232_v22 = vpop.f32.mrf.mxu1  ;;  %v2913_v31 = vadd.f32 %v8675_v49, %v2912_v21 }
 0x27e   : > { %v3870_v20 = vadd.f32 %v8675_v49, %v3869_v14  ;;  %v3233_v32 = vadd.f32 %v8675_v49, %v3232_v22 }
 0x27f   : > { %v7462_v25 = vpack.c.bf16 %v3550_v19, %v3548_v17  ;;  %6193 = vmatmul.msk.bf16.gmra.mxu0 %vm1979_vm0, %v6451_v15 }
 0x280   : > { %v7782_v26 = vpack.c.bf16 %v3870_v20, %v3868_v18  ;;  %6257 = vmatmul.msk.bf16.gmra.mxu1 %vm1979_vm0, %v6515_v16 }
 0x281   : > { %8106 = vst [vmem:[%s8354_s25 + $0x4f0] sm:$0xff] %v7462_v25   ;;  %6321 = vmatmul.msk.bf16.gmra.mxu2 %vm1979_vm0, %v6579_v23  ;;  %v6518_v25 = vld [vmem:[%s8266_s20 + $0x350] sm:$0xff] }
 0x282   : > { %6385 = vmatmul.msk.bf16.gmra.mxu3 %vm1979_vm0, %v6643_v24  ;;  %8170 = vst [vmem:[%s8354_s25 + $0x6f0] sm:$0xff] %v7782_v26   ;;  %v6454_v24 = vld [vmem:[%s8266_s20 + $0x150] sm:$0xff] }
 0x284   : > { %v3552_v27 = vpop.f32.mrf.mxu2  ;;  %v2914_v29 = vpop.f32.mrf.mxu0 }
 0x285   : > { %v3872_v28 = vpop.f32.mrf.mxu3  ;;  %v3234_v30 = vpop.f32.mrf.mxu1  ;;  %v2915_v33 = vadd.f32 %v8675_v49, %v2914_v29  ;;  %v3553_v42 = vadd.f32 %v8675_v49, %v3552_v27 }
 0x286   : > { %v3235_v34 = vadd.f32 %v8675_v49, %v3234_v30  ;;  %v3873_v43 = vadd.f32 %v8675_v49, %v3872_v28 }
 0x287   : > { %v6827_v35 = vpack.c.bf16 %v2915_v33, %v2913_v31  ;;  %v6646_v33 = vld [vmem:[%s8266_s20 + $0x750] sm:$0xff] }
 0x288   : > { %v7147_v36 = vpack.c.bf16 %v3235_v34, %v3233_v32  ;;  %v6582_v32 = vld [vmem:[%s8266_s20 + $0x550] sm:$0xff] }
 0x289   : > { %7979 = vst [vmem:[%s8354_s25 + $0xf8] sm:$0xff] %v6827_v35  }
 0x28a   : > { %8043 = vst [vmem:[%s8354_s25 + $0x2f8] sm:$0xff] %v7147_v36  }
 0x28c   : > { %v3554_v37 = vpop.f32.mrf.mxu2  ;;  %v2917_v39 = vpop.f32.mrf.mxu0 }
 0x28d   : > { %v3874_v38 = vpop.f32.mrf.mxu3  ;;  %v3555_v44 = vadd.f32 %v8675_v49, %v3554_v37  ;;  %v3237_v46 = vpop.f32.mrf.mxu1  ;;  %v2918_v56 = vadd.f32 %v9000_v55, %v2917_v39 }
 0x28e   : > { %v3875_v45 = vadd.f32 %v8675_v49, %v3874_v38  ;;  %v3238_v57 = vadd.f32 %v9000_v55, %v3237_v46 }
 0x28f   : > { %v7467_v50 = vpack.c.bf16 %v3555_v44, %v3553_v42  ;;  %6194 = vmatmul.msk.bf16.gmra.mxu0 %vm1979_vm0, %v6452_v40 }
 0x290   : > { %v7787_v51 = vpack.c.bf16 %v3875_v45, %v3873_v43  ;;  %6258 = vmatmul.msk.bf16.gmra.mxu1 %vm1979_vm0, %v6516_v41 }
 0x291   : > { %8107 = vst [vmem:[%s8354_s25 + $0x4f8] sm:$0xff] %v7467_v50   ;;  %6322 = vmatmul.msk.bf16.gmra.mxu2 %vm1979_vm0, %v6580_v47  ;;  %v6519_v50 = vld [vmem:[%s8266_s20 + $0x358] sm:$0xff] }
 0x292   : > { %6386 = vmatmul.msk.bf16.gmra.mxu3 %vm1979_vm0, %v6644_v48  ;;  %8171 = vst [vmem:[%s8354_s25 + $0x6f8] sm:$0xff] %v7787_v51   ;;  %v6455_v48 = vld [vmem:[%s8266_s20 + $0x158] sm:$0xff] }
 0x294   : > { %v3557_v49 = vpop.f32.mrf.mxu2  ;;  %v2919_v53 = vpop.f32.mrf.mxu0 }
 0x295   : > { %v3877_v52 = vpop.f32.mrf.mxu3  ;;  %v3239_v54 = vpop.f32.mrf.mxu1  ;;  %v2920_v58 = vadd.f32 %v9000_v55, %v2919_v53  ;;  %v3558_v2 = vadd.f32 %v9000_v55, %v3557_v49 }
 0x296   : > { %v3240_v59 = vadd.f32 %v9000_v55, %v3239_v54  ;;  %v3878_v3 = vadd.f32 %v9000_v55, %v3877_v52 }
 0x297   : > { %v6832_v60 = vpack.c.bf16 %v2920_v58, %v2918_v56  ;;  %v6647_v58 = vld [vmem:[%s8266_s20 + $0x758] sm:$0xff] }
 0x298   : > { %v7152_v61 = vpack.c.bf16 %v3240_v59, %v3238_v57  ;;  %v6583_v57 = vld [vmem:[%s8266_s20 + $0x558] sm:$0xff] }
 0x299   : > { %7980 = vst [vmem:[%s8354_s25 + $0x100] sm:$0xff] %v6832_v60  }
 0x29a   : > { %8044 = vst [vmem:[%s8354_s25 + $0x300] sm:$0xff] %v7152_v61  }
 0x29c   : > { %v3559_v62 = vpop.f32.mrf.mxu2  ;;  %v2922_v6 = vpop.f32.mrf.mxu0 }
 0x29d   : > { %v3879_v63 = vpop.f32.mrf.mxu3  ;;  %v3560_v4 = vadd.f32 %v9000_v55, %v3559_v62  ;;  %v3242_v7 = vpop.f32.mrf.mxu1  ;;  %v2923_v16 = vadd.f32 %v9000_v55, %v2922_v6 }
 0x29e   : > { %v3880_v5 = vadd.f32 %v9000_v55, %v3879_v63  ;;  %v3243_v17 = vadd.f32 %v9000_v55, %v3242_v7 }
 0x29f   : > { %v7472_v10 = vpack.c.bf16 %v3560_v4, %v3558_v2  ;;  %6195 = vmatmul.msk.bf16.gmra.mxu0 %vm1979_vm0, %v6453_v0 }
 0x2a0   : > { %v7792_v11 = vpack.c.bf16 %v3880_v5, %v3878_v3  ;;  %6259 = vmatmul.msk.bf16.gmra.mxu1 %vm1979_vm0, %v6517_v1 }
 0x2a1   : > { %8108 = vst [vmem:[%s8354_s25 + $0x500] sm:$0xff] %v7472_v10   ;;  %6323 = vmatmul.msk.bf16.gmra.mxu2 %vm1979_vm0, %v6581_v8  ;;  %v6520_v10 = vld [vmem:[%s8266_s20 + $0x360] sm:$0xff] }
 0x2a2   : > { %6387 = vmatmul.msk.bf16.gmra.mxu3 %vm1979_vm0, %v6645_v9  ;;  %8172 = vst [vmem:[%s8354_s25 + $0x700] sm:$0xff] %v7792_v11   ;;  %v6456_v9 = vld [vmem:[%s8266_s20 + $0x160] sm:$0xff] }
 0x2a4   : > { %v3562_v12 = vpop.f32.mrf.mxu2  ;;  %v2924_v14 = vpop.f32.mrf.mxu0 }
 0x2a5   : > { %v3882_v13 = vpop.f32.mrf.mxu3  ;;  %v3244_v15 = vpop.f32.mrf.mxu1  ;;  %v2925_v18 = vadd.f32 %v9000_v55, %v2924_v14  ;;  %v3563_v26 = vadd.f32 %v9000_v55, %v3562_v12 }
 0x2a6   : > { %v3245_v19 = vadd.f32 %v9000_v55, %v3244_v15  ;;  %v3883_v27 = vadd.f32 %v9000_v55, %v3882_v13 }
 0x2a7   : > { %v6837_v20 = vpack.c.bf16 %v2925_v18, %v2923_v16  ;;  %v6648_v18 = vld [vmem:[%s8266_s20 + $0x760] sm:$0xff] }
 0x2a8   : > { %v7157_v21 = vpack.c.bf16 %v3245_v19, %v3243_v17  ;;  %v6584_v17 = vld [vmem:[%s8266_s20 + $0x560] sm:$0xff] }
 0x2a9   : > { %7981 = vst [vmem:[%s8354_s25 + $0x108] sm:$0xff] %v6837_v20  }
 0x2aa   : > { %8045 = vst [vmem:[%s8354_s25 + $0x308] sm:$0xff] %v7157_v21  }
 0x2ac   : > { %v3564_v22 = vpop.f32.mrf.mxu2  ;;  %v2927_v30 = vpop.f32.mrf.mxu0 }
 0x2ad   : > { %v3884_v23 = vpop.f32.mrf.mxu3  ;;  %v3565_v28 = vadd.f32 %v9000_v55, %v3564_v22  ;;  %v3247_v31 = vpop.f32.mrf.mxu1  ;;  %v2928_v41 = vadd.f32 %v9000_v55, %v2927_v30 }
 0x2ae   : > { %v3885_v29 = vadd.f32 %v9000_v55, %v3884_v23  ;;  %v3248_v42 = vadd.f32 %v9000_v55, %v3247_v31 }
 0x2af   : > { %v7477_v34 = vpack.c.bf16 %v3565_v28, %v3563_v26  ;;  %6196 = vmatmul.msk.bf16.gmra.mxu0 %vm1979_vm0, %v6454_v24 }
 0x2b0   : > { %v7797_v35 = vpack.c.bf16 %v3885_v29, %v3883_v27  ;;  %6260 = vmatmul.msk.bf16.gmra.mxu1 %vm1979_vm0, %v6518_v25 }
 0x2b1   : > { %8109 = vst [vmem:[%s8354_s25 + $0x508] sm:$0xff] %v7477_v34   ;;  %6324 = vmatmul.msk.bf16.gmra.mxu2 %vm1979_vm0, %v6582_v32  ;;  %v6521_v34 = vld [vmem:[%s8266_s20 + $0x368] sm:$0xff] }
 0x2b2   : > { %6388 = vmatmul.msk.bf16.gmra.mxu3 %vm1979_vm0, %v6646_v33  ;;  %8173 = vst [vmem:[%s8354_s25 + $0x708] sm:$0xff] %v7797_v35   ;;  %v6457_v33 = vld [vmem:[%s8266_s20 + $0x168] sm:$0xff] }
 0x2b4   : > { %v3567_v36 = vpop.f32.mrf.mxu2  ;;  %v2929_v38 = vpop.f32.mrf.mxu0 }
 0x2b5   : > { %v3887_v37 = vpop.f32.mrf.mxu3  ;;  %v3249_v40 = vpop.f32.mrf.mxu1  ;;  %v2930_v43 = vadd.f32 %v9000_v55, %v2929_v38  ;;  %v3568_v51 = vadd.f32 %v9000_v55, %v3567_v36 }
 0x2b6   : > { %v3250_v44 = vadd.f32 %v9000_v55, %v3249_v40  ;;  %v3888_v49 = vadd.f32 %v9000_v55, %v3887_v37 }
 0x2b7   : > { %v6842_v45 = vpack.c.bf16 %v2930_v43, %v2928_v41  ;;  %v6649_v43 = vld [vmem:[%s8266_s20 + $0x768] sm:$0xff] }
 0x2b8   : > { %v7162_v39 = vpack.c.bf16 %v3250_v44, %v3248_v42  ;;  %v6585_v42 = vld [vmem:[%s8266_s20 + $0x568] sm:$0xff] }
 0x2b9   : > { %7982 = vst [vmem:[%s8354_s25 + $0x110] sm:$0xff] %v6842_v45  }
 0x2ba   : > { %8046 = vst [vmem:[%s8354_s25 + $0x310] sm:$0xff] %v7162_v39  }
 0x2bc   : > { %v3569_v46 = vpop.f32.mrf.mxu2  ;;  %v2932_v54 = vpop.f32.mrf.mxu0 }
 0x2bd   : > { %v3889_v47 = vpop.f32.mrf.mxu3  ;;  %v3570_v52 = vadd.f32 %v9000_v55, %v3569_v46  ;;  %v3252_v56 = vpop.f32.mrf.mxu1  ;;  %v2933_v1 = vadd.f32 %v9000_v55, %v2932_v54 }
 0x2be   : > { %v3890_v53 = vadd.f32 %v9000_v55, %v3889_v47  ;;  %v3253_v2 = vadd.f32 %v9000_v55, %v3252_v56 }
 0x2bf   : > { %v7482_v59 = vpack.c.bf16 %v3570_v52, %v3568_v51  ;;  %6197 = vmatmul.msk.bf16.gmra.mxu0 %vm1979_vm0, %v6455_v48 }
 0x2c0   : > { %v7802_v60 = vpack.c.bf16 %v3890_v53, %v3888_v49  ;;  %6261 = vmatmul.msk.bf16.gmra.mxu1 %vm1979_vm0, %v6519_v50 }
 0x2c1   : > { %8110 = vst [vmem:[%s8354_s25 + $0x510] sm:$0xff] %v7482_v59   ;;  %6325 = vmatmul.msk.bf16.gmra.mxu2 %vm1979_vm0, %v6583_v57  ;;  %v6522_v59 = vld [vmem:[%s8266_s20 + $0x370] sm:$0xff] }
 0x2c2   : > { %6389 = vmatmul.msk.bf16.gmra.mxu3 %vm1979_vm0, %v6647_v58  ;;  %8174 = vst [vmem:[%s8354_s25 + $0x710] sm:$0xff] %v7802_v60   ;;  %v6458_v58 = vld [vmem:[%s8266_s20 + $0x170] sm:$0xff] }
 0x2c4   : > { %v3572_v61 = vpop.f32.mrf.mxu2  ;;  %v2934_v63 = vpop.f32.mrf.mxu0 }
 0x2c5   : > { %v3892_v62 = vpop.f32.mrf.mxu3  ;;  %v3254_v0 = vpop.f32.mrf.mxu1  ;;  %v2935_v3 = vadd.f32 %v9000_v55, %v2934_v63  ;;  %v3573_v11 = vadd.f32 %v9000_v55, %v3572_v61 }
 0x2c6   : > { %v3255_v4 = vadd.f32 %v9000_v55, %v3254_v0  ;;  %v3893_v12 = vadd.f32 %v9000_v55, %v3892_v62 }
 0x2c7   : > { %v6847_v5 = vpack.c.bf16 %v2935_v3, %v2933_v1  ;;  %v6650_v3 = vld [vmem:[%s8266_s20 + $0x770] sm:$0xff] }
 0x2c8   : > { %v7167_v6 = vpack.c.bf16 %v3255_v4, %v3253_v2  ;;  %v6586_v2 = vld [vmem:[%s8266_s20 + $0x570] sm:$0xff] }
 0x2c9   : > { %7983 = vst [vmem:[%s8354_s25 + $0x118] sm:$0xff] %v6847_v5  }
 0x2ca   : > { %8047 = vst [vmem:[%s8354_s25 + $0x318] sm:$0xff] %v7167_v6  }
 0x2cc   : > { %v3574_v7 = vpop.f32.mrf.mxu2  ;;  %v2937_v15 = vpop.f32.mrf.mxu0 }
 0x2cd   : > { %v3894_v8 = vpop.f32.mrf.mxu3  ;;  %v3575_v13 = vadd.f32 %v9000_v55, %v3574_v7  ;;  %v3257_v16 = vpop.f32.mrf.mxu1  ;;  %v2938_v25 = vadd.f32 %v9000_v55, %v2937_v15 }
 0x2ce   : > { %v3895_v14 = vadd.f32 %v9000_v55, %v3894_v8  ;;  %v3258_v26 = vadd.f32 %v9000_v55, %v3257_v16 }
 0x2cf   : > { %v7487_v19 = vpack.c.bf16 %v3575_v13, %v3573_v11  ;;  %6198 = vmatmul.msk.bf16.gmra.mxu0 %vm1979_vm0, %v6456_v9 }
 0x2d0   : > { %v7807_v20 = vpack.c.bf16 %v3895_v14, %v3893_v12  ;;  %6262 = vmatmul.msk.bf16.gmra.mxu1 %vm1979_vm0, %v6520_v10 }
 0x2d1   : > { %8111 = vst [vmem:[%s8354_s25 + $0x518] sm:$0xff] %v7487_v19   ;;  %6326 = vmatmul.msk.bf16.gmra.mxu2 %vm1979_vm0, %v6584_v17  ;;  %v6523_v19 = vld [vmem:[%s8266_s20 + $0x378] sm:$0xff] }
 0x2d2   : > { %6390 = vmatmul.msk.bf16.gmra.mxu3 %vm1979_vm0, %v6648_v18  ;;  %8175 = vst [vmem:[%s8354_s25 + $0x718] sm:$0xff] %v7807_v20   ;;  %v6459_v18 = vld [vmem:[%s8266_s20 + $0x178] sm:$0xff] }
 0x2d4   : > { %v3577_v21 = vpop.f32.mrf.mxu2  ;;  %v2939_v23 = vpop.f32.mrf.mxu0 }
 0x2d5   : > { %v3897_v22 = vpop.f32.mrf.mxu3  ;;  %v3259_v24 = vpop.f32.mrf.mxu1  ;;  %v2940_v27 = vadd.f32 %v9000_v55, %v2939_v23  ;;  %v3578_v35 = vadd.f32 %v9000_v55, %v3577_v21 }
 0x2d6   : > { %v3260_v28 = vadd.f32 %v9000_v55, %v3259_v24  ;;  %v3898_v36 = vadd.f32 %v9000_v55, %v3897_v22 }
 0x2d7   : > { %v6852_v29 = vpack.c.bf16 %v2940_v27, %v2938_v25  ;;  %v6651_v27 = vld [vmem:[%s8266_s20 + $0x778] sm:$0xff] }
 0x2d8   : > { %v7172_v30 = vpack.c.bf16 %v3260_v28, %v3258_v26  ;;  %v6587_v26 = vld [vmem:[%s8266_s20 + $0x578] sm:$0xff] }
 0x2d9   : > { %7984 = vst [vmem:[%s8354_s25 + $0x120] sm:$0xff] %v6852_v29  }
 0x2da   : > { %8048 = vst [vmem:[%s8354_s25 + $0x320] sm:$0xff] %v7172_v30  }
 0x2dc   : > { %v3579_v31 = vpop.f32.mrf.mxu2  ;;  %v2942_v40 = vpop.f32.mrf.mxu0 }
 0x2dd   : > { %v3899_v32 = vpop.f32.mrf.mxu3  ;;  %v3580_v37 = vadd.f32 %v9000_v55, %v3579_v31  ;;  %v3262_v41 = vpop.f32.mrf.mxu1  ;;  %v2943_v50 = vadd.f32 %v9000_v55, %v2942_v40 }
 0x2de   : > { %v3900_v38 = vadd.f32 %v9000_v55, %v3899_v32  ;;  %v3263_v51 = vadd.f32 %v9000_v55, %v3262_v41 }
 0x2df   : > { %v7492_v44 = vpack.c.bf16 %v3580_v37, %v3578_v35  ;;  %6199 = vmatmul.msk.bf16.gmra.mxu0 %vm1979_vm0, %v6457_v33 }
 0x2e0   : > { %v7812_v45 = vpack.c.bf16 %v3900_v38, %v3898_v36  ;;  %6263 = vmatmul.msk.bf16.gmra.mxu1 %vm1979_vm0, %v6521_v34 }
 0x2e1   : > { %8112 = vst [vmem:[%s8354_s25 + $0x520] sm:$0xff] %v7492_v44   ;;  %6327 = vmatmul.msk.bf16.gmra.mxu2 %vm1979_vm0, %v6585_v42  ;;  %v6524_v44 = vld [vmem:[%s8266_s20 + $0x380] sm:$0xff] }
 0x2e2   : > { %6391 = vmatmul.msk.bf16.gmra.mxu3 %vm1979_vm0, %v6649_v43  ;;  %8176 = vst [vmem:[%s8354_s25 + $0x720] sm:$0xff] %v7812_v45   ;;  %v6460_v43 = vld [vmem:[%s8266_s20 + $0x180] sm:$0xff] }
 0x2e4   : > { %v3582_v39 = vpop.f32.mrf.mxu2  ;;  %v2944_v47 = vpop.f32.mrf.mxu0 }
 0x2e5   : > { %v3902_v46 = vpop.f32.mrf.mxu3  ;;  %v3264_v48 = vpop.f32.mrf.mxu1  ;;  %v2945_v49 = vadd.f32 %v9000_v55, %v2944_v47  ;;  %v3583_v60 = vadd.f32 %v9000_v55, %v3582_v39 }
 0x2e6   : > { %v3265_v52 = vadd.f32 %v9000_v55, %v3264_v48  ;;  %v3903_v61 = vadd.f32 %v9000_v55, %v3902_v46 }
 0x2e7   : > { %v6857_v53 = vpack.c.bf16 %v2945_v49, %v2943_v50  ;;  %v6652_v49 = vld [vmem:[%s8266_s20 + $0x780] sm:$0xff] }
 0x2e8   : > { %v7177_v54 = vpack.c.bf16 %v3265_v52, %v3263_v51  ;;  %v6588_v51 = vld [vmem:[%s8266_s20 + $0x580] sm:$0xff] }
 0x2e9   : > { %7985 = vst [vmem:[%s8354_s25 + $0x128] sm:$0xff] %v6857_v53  }
 0x2ea   : > { %8049 = vst [vmem:[%s8354_s25 + $0x328] sm:$0xff] %v7177_v54  }
 0x2ec   : > { %v3584_v56 = vpop.f32.mrf.mxu2  ;;  %v2947_v0 = vpop.f32.mrf.mxu0 }
 0x2ed   : > { %v3904_v57 = vpop.f32.mrf.mxu3  ;;  %v3585_v62 = vadd.f32 %v9000_v55, %v3584_v56  ;;  %v3267_v1 = vpop.f32.mrf.mxu1  ;;  %v2948_v10 = vadd.f32 %v9000_v55, %v2947_v0 }
 0x2ee   : > { %v3905_v63 = vadd.f32 %v9000_v55, %v3904_v57  ;;  %v3268_v11 = vadd.f32 %v9000_v55, %v3267_v1 }
 0x2ef   : > { %v7497_v4 = vpack.c.bf16 %v3585_v62, %v3583_v60  ;;  %6200 = vmatmul.msk.bf16.gmra.mxu0 %vm1979_vm0, %v6458_v58 }
 0x2f0   : > { %v7817_v5 = vpack.c.bf16 %v3905_v63, %v3903_v61  ;;  %6264 = vmatmul.msk.bf16.gmra.mxu1 %vm1979_vm0, %v6522_v59 }
 0x2f1   : > { %8113 = vst [vmem:[%s8354_s25 + $0x528] sm:$0xff] %v7497_v4   ;;  %6328 = vmatmul.msk.bf16.gmra.mxu2 %vm1979_vm0, %v6586_v2  ;;  %v6525_v4 = vld [vmem:[%s8266_s20 + $0x388] sm:$0xff] }
 0x2f2   : > { %6392 = vmatmul.msk.bf16.gmra.mxu3 %vm1979_vm0, %v6650_v3  ;;  %8177 = vst [vmem:[%s8354_s25 + $0x728] sm:$0xff] %v7817_v5   ;;  %v6461_v3 = vld [vmem:[%s8266_s20 + $0x188] sm:$0xff] }
 0x2f4   : > { %v3587_v6 = vpop.f32.mrf.mxu2  ;;  %v2949_v8 = vpop.f32.mrf.mxu0 }
 0x2f5   : > { %v3907_v7 = vpop.f32.mrf.mxu3  ;;  %v3269_v9 = vpop.f32.mrf.mxu1  ;;  %v2950_v12 = vadd.f32 %v9000_v55, %v2949_v8  ;;  %v3588_v20 = vadd.f32 %v9000_v55, %v3587_v6 }
 0x2f6   : > { %v3270_v13 = vadd.f32 %v9000_v55, %v3269_v9  ;;  %v3908_v21 = vadd.f32 %v9000_v55, %v3907_v7 }
 0x2f7   : > { %v6862_v14 = vpack.c.bf16 %v2950_v12, %v2948_v10  ;;  %v6653_v12 = vld [vmem:[%s8266_s20 + $0x788] sm:$0xff] }
 0x2f8   : > { %v7182_v15 = vpack.c.bf16 %v3270_v13, %v3268_v11  ;;  %v6589_v11 = vld [vmem:[%s8266_s20 + $0x588] sm:$0xff] }
 0x2f9   : > { %7986 = vst [vmem:[%s8354_s25 + $0x130] sm:$0xff] %v6862_v14  }
 0x2fa   : > { %8050 = vst [vmem:[%s8354_s25 + $0x330] sm:$0xff] %v7182_v15  }
 0x2fc   : > { %v3589_v16 = vpop.f32.mrf.mxu2  ;;  %v2952_v24 = vpop.f32.mrf.mxu0 }
 0x2fd   : > { %v3909_v17 = vpop.f32.mrf.mxu3  ;;  %v3590_v22 = vadd.f32 %v9000_v55, %v3589_v16  ;;  %v3272_v25 = vpop.f32.mrf.mxu1  ;;  %v2953_v34 = vadd.f32 %v9000_v55, %v2952_v24 }
 0x2fe   : > { %v3910_v23 = vadd.f32 %v9000_v55, %v3909_v17  ;;  %v3273_v35 = vadd.f32 %v9000_v55, %v3272_v25 }
 0x2ff   : > { %v7502_v28 = vpack.c.bf16 %v3590_v22, %v3588_v20  ;;  %6201 = vmatmul.msk.bf16.gmra.mxu0 %vm1979_vm0, %v6459_v18 }
 0x300   : > { %v7822_v29 = vpack.c.bf16 %v3910_v23, %v3908_v21  ;;  %6265 = vmatmul.msk.bf16.gmra.mxu1 %vm1979_vm0, %v6523_v19 }
 0x301   : > { %8114 = vst [vmem:[%s8354_s25 + $0x530] sm:$0xff] %v7502_v28   ;;  %6329 = vmatmul.msk.bf16.gmra.mxu2 %vm1979_vm0, %v6587_v26  ;;  %v6526_v28 = vld [vmem:[%s8266_s20 + $0x390] sm:$0xff] }
 0x302   : > { %6393 = vmatmul.msk.bf16.gmra.mxu3 %vm1979_vm0, %v6651_v27  ;;  %8178 = vst [vmem:[%s8354_s25 + $0x730] sm:$0xff] %v7822_v29   ;;  %v6462_v27 = vld [vmem:[%s8266_s20 + $0x190] sm:$0xff] }
 0x304   : > { %v3592_v30 = vpop.f32.mrf.mxu2  ;;  %v2954_v32 = vpop.f32.mrf.mxu0 }
 0x305   : > { %v3912_v31 = vpop.f32.mrf.mxu3  ;;  %v3274_v33 = vpop.f32.mrf.mxu1  ;;  %v2955_v36 = vadd.f32 %v9000_v55, %v2954_v32  ;;  %v3593_v45 = vadd.f32 %v9000_v55, %v3592_v30 }
 0x306   : > { %v3275_v37 = vadd.f32 %v9000_v55, %v3274_v33  ;;  %v3913_v39 = vadd.f32 %v9000_v55, %v3912_v31 }
 0x307   : > { %v6867_v38 = vpack.c.bf16 %v2955_v36, %v2953_v34  ;;  %v6654_v36 = vld [vmem:[%s8266_s20 + $0x790] sm:$0xff] }
 0x308   : > { %v7187_v40 = vpack.c.bf16 %v3275_v37, %v3273_v35  ;;  %v6590_v35 = vld [vmem:[%s8266_s20 + $0x590] sm:$0xff] }
 0x309   : > { %7987 = vst [vmem:[%s8354_s25 + $0x138] sm:$0xff] %v6867_v38  }
 0x30a   : > { %8051 = vst [vmem:[%s8354_s25 + $0x338] sm:$0xff] %v7187_v40  }
 0x30c   : > { %v3594_v41 = vpop.f32.mrf.mxu2  ;;  %v2957_v48 = vpop.f32.mrf.mxu0 }
 0x30d   : > { %v3914_v42 = vpop.f32.mrf.mxu3  ;;  %v3595_v46 = vadd.f32 %v9000_v55, %v3594_v41  ;;  %v3277_v50 = vpop.f32.mrf.mxu1  ;;  %v2958_v59 = vadd.f32 %v9000_v55, %v2957_v48 }
 0x30e   : > { %v3915_v47 = vadd.f32 %v9000_v55, %v3914_v42  ;;  %v3278_v60 = vadd.f32 %v9000_v55, %v3277_v50 }
 0x30f   : > { %v7507_v52 = vpack.c.bf16 %v3595_v46, %v3593_v45  ;;  %6202 = vmatmul.msk.bf16.gmra.mxu0 %vm1979_vm0, %v6460_v43 }
 0x310   : > { %v7827_v53 = vpack.c.bf16 %v3915_v47, %v3913_v39  ;;  %6266 = vmatmul.msk.bf16.gmra.mxu1 %vm1979_vm0, %v6524_v44 }
 0x311   : > { %8115 = vst [vmem:[%s8354_s25 + $0x538] sm:$0xff] %v7507_v52   ;;  %6330 = vmatmul.msk.bf16.gmra.mxu2 %vm1979_vm0, %v6588_v51  ;;  %v6527_v52 = vld [vmem:[%s8266_s20 + $0x398] sm:$0xff] }
 0x312   : > { %6394 = vmatmul.msk.bf16.gmra.mxu3 %vm1979_vm0, %v6652_v49  ;;  %8179 = vst [vmem:[%s8354_s25 + $0x738] sm:$0xff] %v7827_v53   ;;  %v6463_v49 = vld [vmem:[%s8266_s20 + $0x198] sm:$0xff] }
 0x314   : > { %v3597_v54 = vpop.f32.mrf.mxu2  ;;  %v2959_v57 = vpop.f32.mrf.mxu0 }
 0x315   : > { %v3917_v56 = vpop.f32.mrf.mxu3  ;;  %v3279_v58 = vpop.f32.mrf.mxu1  ;;  %v2960_v61 = vadd.f32 %v9000_v55, %v2959_v57  ;;  %v3598_v5 = vadd.f32 %v9000_v55, %v3597_v54 }
 0x316   : > { %v3280_v62 = vadd.f32 %v9000_v55, %v3279_v58  ;;  %v3918_v6 = vadd.f32 %v9000_v55, %v3917_v56 }
 0x317   : > { %v6872_v63 = vpack.c.bf16 %v2960_v61, %v2958_v59  ;;  %v6655_v61 = vld [vmem:[%s8266_s20 + $0x798] sm:$0xff] }
 0x318   : > { %v7192_v0 = vpack.c.bf16 %v3280_v62, %v3278_v60  ;;  %v6591_v60 = vld [vmem:[%s8266_s20 + $0x598] sm:$0xff] }
 0x319   : > { %7988 = vst [vmem:[%s8354_s25 + $0x140] sm:$0xff] %v6872_v63  }
 0x31a   : > { %8052 = vst [vmem:[%s8354_s25 + $0x340] sm:$0xff] %v7192_v0  }
 0x31c   : > { %v3599_v1 = vpop.f32.mrf.mxu2  ;;  %v2962_v9 = vpop.f32.mrf.mxu0 }
 0x31d   : > { %v3919_v2 = vpop.f32.mrf.mxu3  ;;  %v3600_v7 = vadd.f32 %v9000_v55, %v3599_v1  ;;  %v3282_v10 = vpop.f32.mrf.mxu1  ;;  %v2963_v19 = vadd.f32 %v9000_v55, %v2962_v9 }
 0x31e   : > { %v3920_v8 = vadd.f32 %v9000_v55, %v3919_v2  ;;  %v3283_v20 = vadd.f32 %v9000_v55, %v3282_v10 }
 0x31f   : > { %v7512_v13 = vpack.c.bf16 %v3600_v7, %v3598_v5  ;;  %6203 = vmatmul.msk.bf16.gmra.mxu0 %vm1979_vm0, %v6461_v3 }
 0x320   : > { %v7832_v14 = vpack.c.bf16 %v3920_v8, %v3918_v6  ;;  %6267 = vmatmul.msk.bf16.gmra.mxu1 %vm1979_vm0, %v6525_v4 }
 0x321   : > { %8116 = vst [vmem:[%s8354_s25 + $0x540] sm:$0xff] %v7512_v13   ;;  %6331 = vmatmul.msk.bf16.gmra.mxu2 %vm1979_vm0, %v6589_v11  ;;  %v6528_v13 = vld [vmem:[%s8266_s20 + $0x3a0] sm:$0xff] }
 0x322   : > { %6395 = vmatmul.msk.bf16.gmra.mxu3 %vm1979_vm0, %v6653_v12  ;;  %8180 = vst [vmem:[%s8354_s25 + $0x740] sm:$0xff] %v7832_v14   ;;  %v6464_v12 = vld [vmem:[%s8266_s20 + $0x1a0] sm:$0xff] }
 0x324   : > { %v3602_v15 = vpop.f32.mrf.mxu2  ;;  %v2964_v17 = vpop.f32.mrf.mxu0 }
 0x325   : > { %v3922_v16 = vpop.f32.mrf.mxu3  ;;  %v3284_v18 = vpop.f32.mrf.mxu1  ;;  %v2965_v21 = vadd.f32 %v9000_v55, %v2964_v17  ;;  %v3603_v29 = vadd.f32 %v9000_v55, %v3602_v15 }
 0x326   : > { %v3285_v22 = vadd.f32 %v9000_v55, %v3284_v18  ;;  %v3923_v30 = vadd.f32 %v9000_v55, %v3922_v16 }
 0x327   : > { %v6877_v23 = vpack.c.bf16 %v2965_v21, %v2963_v19  ;;  %v6656_v21 = vld [vmem:[%s8266_s20 + $0x7a0] sm:$0xff] }
 0x328   : > { %v7197_v24 = vpack.c.bf16 %v3285_v22, %v3283_v20  ;;  %v6592_v20 = vld [vmem:[%s8266_s20 + $0x5a0] sm:$0xff] }
 0x329   : > { %7989 = vst [vmem:[%s8354_s25 + $0x148] sm:$0xff] %v6877_v23  }
 0x32a   : > { %8053 = vst [vmem:[%s8354_s25 + $0x348] sm:$0xff] %v7197_v24  }
 0x32c   : > { %v3604_v25 = vpop.f32.mrf.mxu2  ;;  %v2967_v33 = vpop.f32.mrf.mxu0 }
 0x32d   : > { %v3924_v26 = vpop.f32.mrf.mxu3  ;;  %v3605_v31 = vadd.f32 %v9000_v55, %v3604_v25  ;;  %v3287_v34 = vpop.f32.mrf.mxu1  ;;  %v2968_v44 = vadd.f32 %v9000_v55, %v2967_v33 }
 0x32e   : > { %v3925_v32 = vadd.f32 %v9000_v55, %v3924_v26  ;;  %v3288_v45 = vadd.f32 %v9000_v55, %v3287_v34 }
 0x32f   : > { %v7517_v37 = vpack.c.bf16 %v3605_v31, %v3603_v29  ;;  %6204 = vmatmul.msk.bf16.gmra.mxu0 %vm1979_vm0, %v6462_v27 }
 0x330   : > { %v7837_v38 = vpack.c.bf16 %v3925_v32, %v3923_v30  ;;  %6268 = vmatmul.msk.bf16.gmra.mxu1 %vm1979_vm0, %v6526_v28 }
 0x331   : > { %8117 = vst [vmem:[%s8354_s25 + $0x548] sm:$0xff] %v7517_v37   ;;  %6332 = vmatmul.msk.bf16.gmra.mxu2 %vm1979_vm0, %v6590_v35  ;;  %v6529_v37 = vld [vmem:[%s8266_s20 + $0x3a8] sm:$0xff] }
 0x332   : > { %6396 = vmatmul.msk.bf16.gmra.mxu3 %vm1979_vm0, %v6654_v36  ;;  %8181 = vst [vmem:[%s8354_s25 + $0x748] sm:$0xff] %v7837_v38   ;;  %v6465_v36 = vld [vmem:[%s8266_s20 + $0x1a8] sm:$0xff] }
 0x334   : > { %v3607_v40 = vpop.f32.mrf.mxu2  ;;  %v2969_v42 = vpop.f32.mrf.mxu0 }
 0x335   : > { %v3927_v41 = vpop.f32.mrf.mxu3  ;;  %v3289_v43 = vpop.f32.mrf.mxu1  ;;  %v2970_v39 = vadd.f32 %v9000_v55, %v2969_v42  ;;  %v3608_v53 = vadd.f32 %v9000_v55, %v3607_v40 }
 0x336   : > { %v3290_v46 = vadd.f32 %v9000_v55, %v3289_v43  ;;  %v3928_v54 = vadd.f32 %v9000_v55, %v3927_v41 }
 0x337   : > { %v6882_v47 = vpack.c.bf16 %v2970_v39, %v2968_v44  ;;  %v6657_v39 = vld [vmem:[%s8266_s20 + $0x7a8] sm:$0xff] }
 0x338   : > { %v7202_v48 = vpack.c.bf16 %v3290_v46, %v3288_v45  ;;  %v6593_v45 = vld [vmem:[%s8266_s20 + $0x5a8] sm:$0xff] }
 0x339   : > { %7990 = vst [vmem:[%s8354_s25 + $0x150] sm:$0xff] %v6882_v47  }
 0x33a   : > { %8054 = vst [vmem:[%s8354_s25 + $0x350] sm:$0xff] %v7202_v48  }
 0x33c   : > { %v3609_v50 = vpop.f32.mrf.mxu2  ;;  %v2972_v58 = vpop.f32.mrf.mxu0 }
 0x33d   : > { %v3929_v51 = vpop.f32.mrf.mxu3  ;;  %v3610_v56 = vadd.f32 %v9000_v55, %v3609_v50  ;;  %v3292_v59 = vpop.f32.mrf.mxu1  ;;  %v2973_v4 = vadd.f32 %v9000_v55, %v2972_v58 }
 0x33e   : > { %v3930_v57 = vadd.f32 %v9000_v55, %v3929_v51  ;;  %v3293_v5 = vadd.f32 %v9000_v55, %v3292_v59 }
 0x33f   : > { %v7522_v62 = vpack.c.bf16 %v3610_v56, %v3608_v53  ;;  %6205 = vmatmul.msk.bf16.gmra.mxu0 %vm1979_vm0, %v6463_v49 }
 0x340   : > { %v7842_v63 = vpack.c.bf16 %v3930_v57, %v3928_v54  ;;  %6269 = vmatmul.msk.bf16.gmra.mxu1 %vm1979_vm0, %v6527_v52 }
 0x341   : > { %8118 = vst [vmem:[%s8354_s25 + $0x550] sm:$0xff] %v7522_v62   ;;  %6333 = vmatmul.msk.bf16.gmra.mxu2 %vm1979_vm0, %v6591_v60  ;;  %v6530_v62 = vld [vmem:[%s8266_s20 + $0x3b0] sm:$0xff] }
 0x342   : > { %6397 = vmatmul.msk.bf16.gmra.mxu3 %vm1979_vm0, %v6655_v61  ;;  %8182 = vst [vmem:[%s8354_s25 + $0x750] sm:$0xff] %v7842_v63   ;;  %v6466_v61 = vld [vmem:[%s8266_s20 + $0x1b0] sm:$0xff] }
 0x344   : > { %v3612_v0 = vpop.f32.mrf.mxu2  ;;  %v2974_v2 = vpop.f32.mrf.mxu0 }
 0x345   : > { %v3932_v1 = vpop.f32.mrf.mxu3  ;;  %v3294_v3 = vpop.f32.mrf.mxu1  ;;  %v2975_v6 = vadd.f32 %v9000_v55, %v2974_v2  ;;  %v3613_v14 = vadd.f32 %v9000_v55, %v3612_v0 }
 0x346   : > { %v3295_v7 = vadd.f32 %v9000_v55, %v3294_v3  ;;  %v3933_v15 = vadd.f32 %v9000_v55, %v3932_v1 }
 0x347   : > { %v6887_v8 = vpack.c.bf16 %v2975_v6, %v2973_v4  ;;  %v6658_v6 = vld [vmem:[%s8266_s20 + $0x7b0] sm:$0xff] }
 0x348   : > { %v7207_v9 = vpack.c.bf16 %v3295_v7, %v3293_v5  ;;  %v6594_v5 = vld [vmem:[%s8266_s20 + $0x5b0] sm:$0xff] }
 0x349   : > { %7991 = vst [vmem:[%s8354_s25 + $0x158] sm:$0xff] %v6887_v8  }
 0x34a   : > { %8055 = vst [vmem:[%s8354_s25 + $0x358] sm:$0xff] %v7207_v9  }
 0x34c   : > { %v3614_v10 = vpop.f32.mrf.mxu2  ;;  %v2977_v18 = vpop.f32.mrf.mxu0 }
 0x34d   : > { %v3934_v11 = vpop.f32.mrf.mxu3  ;;  %v3615_v16 = vadd.f32 %v9000_v55, %v3614_v10  ;;  %v3297_v19 = vpop.f32.mrf.mxu1  ;;  %v2978_v28 = vadd.f32 %v9000_v55, %v2977_v18 }
 0x34e   : > { %v3935_v17 = vadd.f32 %v9000_v55, %v3934_v11  ;;  %v3298_v29 = vadd.f32 %v9000_v55, %v3297_v19 }
 0x34f   : > { %v7527_v22 = vpack.c.bf16 %v3615_v16, %v3613_v14  ;;  %6206 = vmatmul.msk.bf16.gmra.mxu0 %vm1979_vm0, %v6464_v12 }
 0x350   : > { %v7847_v23 = vpack.c.bf16 %v3935_v17, %v3933_v15  ;;  %6270 = vmatmul.msk.bf16.gmra.mxu1 %vm1979_vm0, %v6528_v13 }
 0x351   : > { %8119 = vst [vmem:[%s8354_s25 + $0x558] sm:$0xff] %v7527_v22   ;;  %6334 = vmatmul.msk.bf16.gmra.mxu2 %vm1979_vm0, %v6592_v20  ;;  %v6531_v22 = vld [vmem:[%s8266_s20 + $0x3b8] sm:$0xff] }
 0x352   : > { %6398 = vmatmul.msk.bf16.gmra.mxu3 %vm1979_vm0, %v6656_v21  ;;  %8183 = vst [vmem:[%s8354_s25 + $0x758] sm:$0xff] %v7847_v23   ;;  %v6467_v21 = vld [vmem:[%s8266_s20 + $0x1b8] sm:$0xff] }
 0x354   : > { %v3617_v24 = vpop.f32.mrf.mxu2  ;;  %v2979_v26 = vpop.f32.mrf.mxu0 }
 0x355   : > { %v3937_v25 = vpop.f32.mrf.mxu3  ;;  %v3299_v27 = vpop.f32.mrf.mxu1  ;;  %v2980_v30 = vadd.f32 %v9000_v55, %v2979_v26  ;;  %v3618_v38 = vadd.f32 %v9000_v55, %v3617_v24 }
 0x356   : > { %v3300_v31 = vadd.f32 %v9000_v55, %v3299_v27  ;;  %v3938_v40 = vadd.f32 %v9000_v55, %v3937_v25 }
 0x357   : > { %v6892_v32 = vpack.c.bf16 %v2980_v30, %v2978_v28  ;;  %v6659_v30 = vld [vmem:[%s8266_s20 + $0x7b8] sm:$0xff] }
 0x358   : > { %v7212_v33 = vpack.c.bf16 %v3300_v31, %v3298_v29  ;;  %v6595_v29 = vld [vmem:[%s8266_s20 + $0x5b8] sm:$0xff] }
 0x359   : > { %7992 = vst [vmem:[%s8354_s25 + $0x160] sm:$0xff] %v6892_v32  }
 0x35a   : > { %8056 = vst [vmem:[%s8354_s25 + $0x360] sm:$0xff] %v7212_v33  }
 0x35c   : > { %v3619_v34 = vpop.f32.mrf.mxu2  ;;  %v2982_v43 = vpop.f32.mrf.mxu0 }
 0x35d   : > { %v3939_v35 = vpop.f32.mrf.mxu3  ;;  %v3620_v41 = vadd.f32 %v9000_v55, %v3619_v34  ;;  %v3302_v44 = vpop.f32.mrf.mxu1  ;;  %v2983_v52 = vadd.f32 %v9000_v55, %v2982_v43 }
 0x35e   : > { %v3940_v42 = vadd.f32 %v9000_v55, %v3939_v35  ;;  %v3303_v53 = vadd.f32 %v9000_v55, %v3302_v44 }
 0x35f   : > { %v7532_v46 = vpack.c.bf16 %v3620_v41, %v3618_v38  ;;  %6207 = vmatmul.msk.bf16.gmra.mxu0 %vm1979_vm0, %v6465_v36 }
 0x360   : > { %v7852_v47 = vpack.c.bf16 %v3940_v42, %v3938_v40  ;;  %6271 = vmatmul.msk.bf16.gmra.mxu1 %vm1979_vm0, %v6529_v37 }
 0x361   : > { %8120 = vst [vmem:[%s8354_s25 + $0x560] sm:$0xff] %v7532_v46   ;;  %6335 = vmatmul.msk.bf16.gmra.mxu2 %vm1979_vm0, %v6593_v45  ;;  %v6532_v46 = vld [vmem:[%s8266_s20 + $0x3c0] sm:$0xff] }
 0x362   : > { %6399 = vmatmul.msk.bf16.gmra.mxu3 %vm1979_vm0, %v6657_v39  ;;  %8184 = vst [vmem:[%s8354_s25 + $0x760] sm:$0xff] %v7852_v47   ;;  %v6468_v39 = vld [vmem:[%s8266_s20 + $0x1c0] sm:$0xff] }
 0x364   : > { %v3622_v48 = vpop.f32.mrf.mxu2  ;;  %v2984_v51 = vpop.f32.mrf.mxu0 }
 0x365   : > { %v3942_v50 = vpop.f32.mrf.mxu3  ;;  %v3304_v49 = vpop.f32.mrf.mxu1  ;;  %v2985_v54 = vadd.f32 %v9000_v55, %v2984_v51  ;;  %v3623_v63 = vadd.f32 %v9000_v55, %v3622_v48 }
 0x366   : > { %v3305_v56 = vadd.f32 %v9000_v55, %v3304_v49  ;;  %v3943_v0 = vadd.f32 %v9000_v55, %v3942_v50 }
 0x367   : > { %v6897_v57 = vpack.c.bf16 %v2985_v54, %v2983_v52  ;;  %v6660_v54 = vld [vmem:[%s8266_s20 + $0x7c0] sm:$0xff] }
 0x368   : > { %v7217_v58 = vpack.c.bf16 %v3305_v56, %v3303_v53  ;;  %v6596_v53 = vld [vmem:[%s8266_s20 + $0x5c0] sm:$0xff] }
 0x369   : > { %7993 = vst [vmem:[%s8354_s25 + $0x168] sm:$0xff] %v6897_v57  }
 0x36a   : > { %8057 = vst [vmem:[%s8354_s25 + $0x368] sm:$0xff] %v7217_v58  }
 0x36c   : > { %v3624_v59 = vpop.f32.mrf.mxu2  ;;  %v2987_v3 = vpop.f32.mrf.mxu0 }
 0x36d   : > { %v3944_v60 = vpop.f32.mrf.mxu3  ;;  %v3625_v1 = vadd.f32 %v9000_v55, %v3624_v59  ;;  %v3307_v4 = vpop.f32.mrf.mxu1  ;;  %v2988_v13 = vadd.f32 %v9000_v55, %v2987_v3 }
 0x36e   : > { %v3945_v2 = vadd.f32 %v9000_v55, %v3944_v60  ;;  %v3308_v14 = vadd.f32 %v9000_v55, %v3307_v4 }
 0x36f   : > { %v7537_v7 = vpack.c.bf16 %v3625_v1, %v3623_v63  ;;  %6208 = vmatmul.msk.bf16.gmra.mxu0 %vm1979_vm0, %v6466_v61  ;;  %v9325_v61 = vld [vmem:[%s9580_s2] ss:$0 sm:$0xff] }
 0x370   : > { %v7857_v8 = vpack.c.bf16 %v3945_v2, %v3943_v0  ;;  %6272 = vmatmul.msk.bf16.gmra.mxu1 %vm1979_vm0, %v6530_v62 }
 0x371   : > { %8121 = vst [vmem:[%s8354_s25 + $0x568] sm:$0xff] %v7537_v7   ;;  %6336 = vmatmul.msk.bf16.gmra.mxu2 %vm1979_vm0, %v6594_v5  ;;  %v6533_v7 = vld [vmem:[%s8266_s20 + $0x3c8] sm:$0xff] }
 0x372   : > { %6400 = vmatmul.msk.bf16.gmra.mxu3 %vm1979_vm0, %v6658_v6  ;;  %8185 = vst [vmem:[%s8354_s25 + $0x768] sm:$0xff] %v7857_v8   ;;  %v6469_v6 = vld [vmem:[%s8266_s20 + $0x1c8] sm:$0xff] }
 0x374   : > { %v3627_v9 = vpop.f32.mrf.mxu2  ;;  %v2989_v11 = vpop.f32.mrf.mxu0 }
 0x375   : > { %v3947_v10 = vpop.f32.mrf.mxu3  ;;  %v3309_v12 = vpop.f32.mrf.mxu1  ;;  %v2990_v15 = vadd.f32 %v9000_v55, %v2989_v11  ;;  %v3628_v23 = vadd.f32 %v9000_v55, %v3627_v9 }
 0x376   : > { %v3310_v16 = vadd.f32 %v9000_v55, %v3309_v12  ;;  %v3948_v24 = vadd.f32 %v9000_v55, %v3947_v10 }
 0x377   : > { %v6902_v17 = vpack.c.bf16 %v2990_v15, %v2988_v13  ;;  %v6661_v15 = vld [vmem:[%s8266_s20 + $0x7c8] sm:$0xff] }
 0x378   : > { %v7222_v18 = vpack.c.bf16 %v3310_v16, %v3308_v14  ;;  %v6597_v14 = vld [vmem:[%s8266_s20 + $0x5c8] sm:$0xff] }
 0x379   : > { %7994 = vst [vmem:[%s8354_s25 + $0x170] sm:$0xff] %v6902_v17  }
 0x37a   : > { %8058 = vst [vmem:[%s8354_s25 + $0x370] sm:$0xff] %v7222_v18  }
 0x37c   : > { %v3629_v19 = vpop.f32.mrf.mxu2  ;;  %v2992_v27 = vpop.f32.mrf.mxu0 }
 0x37d   : > { %v3949_v20 = vpop.f32.mrf.mxu3  ;;  %v3630_v25 = vadd.f32 %v9000_v55, %v3629_v19  ;;  %v3312_v28 = vpop.f32.mrf.mxu1  ;;  %v2993_v37 = vadd.f32 %v9000_v55, %v2992_v27 }
 0x37e   : > { %v3950_v26 = vadd.f32 %v9000_v55, %v3949_v20  ;;  %v3313_v38 = vadd.f32 %v9000_v55, %v3312_v28 }
 0x37f   : > { %v7542_v31 = vpack.c.bf16 %v3630_v25, %v3628_v23  ;;  %6209 = vmatmul.msk.bf16.gmra.mxu0 %vm1979_vm0, %v6467_v21 }
 0x380   : > { %v7862_v32 = vpack.c.bf16 %v3950_v26, %v3948_v24  ;;  %6273 = vmatmul.msk.bf16.gmra.mxu1 %vm1979_vm0, %v6531_v22 }
 0x381   : > { %8122 = vst [vmem:[%s8354_s25 + $0x570] sm:$0xff] %v7542_v31   ;;  %6337 = vmatmul.msk.bf16.gmra.mxu2 %vm1979_vm0, %v6595_v29  ;;  %v6534_v31 = vld [vmem:[%s8266_s20 + $0x3d0] sm:$0xff] }
 0x382   : > { %6401 = vmatmul.msk.bf16.gmra.mxu3 %vm1979_vm0, %v6659_v30  ;;  %8186 = vst [vmem:[%s8354_s25 + $0x770] sm:$0xff] %v7862_v32   ;;  %v6470_v30 = vld [vmem:[%s8266_s20 + $0x1d0] sm:$0xff] }
 0x384   : > { %v3632_v33 = vpop.f32.mrf.mxu2  ;;  %v2994_v35 = vpop.f32.mrf.mxu0 }
 0x385   : > { %v3952_v34 = vpop.f32.mrf.mxu3  ;;  %v3314_v36 = vpop.f32.mrf.mxu1  ;;  %v2995_v40 = vadd.f32 %v9000_v55, %v2994_v35  ;;  %v3633_v47 = vadd.f32 %v9000_v55, %v3632_v33 }
 0x386   : > { %v3315_v41 = vadd.f32 %v9000_v55, %v3314_v36  ;;  %v3953_v48 = vadd.f32 %v9000_v55, %v3952_v34 }
 0x387   : > { %v6907_v42 = vpack.c.bf16 %v2995_v40, %v2993_v37  ;;  %v6662_v40 = vld [vmem:[%s8266_s20 + $0x7d0] sm:$0xff] }
 0x388   : > { %v7227_v43 = vpack.c.bf16 %v3315_v41, %v3313_v38  ;;  %v6598_v38 = vld [vmem:[%s8266_s20 + $0x5d0] sm:$0xff] }
 0x389   : > { %7995 = vst [vmem:[%s8354_s25 + $0x178] sm:$0xff] %v6907_v42  }
 0x38a   : > { %8059 = vst [vmem:[%s8354_s25 + $0x378] sm:$0xff] %v7227_v43  }
 0x38c   : > { %v3634_v44 = vpop.f32.mrf.mxu2  ;;  %v2997_v49 = vpop.f32.mrf.mxu0 }
 0x38d   : > { %v3954_v45 = vpop.f32.mrf.mxu3  ;;  %v3635_v50 = vadd.f32 %v9000_v55, %v3634_v44  ;;  %v3317_v52 = vpop.f32.mrf.mxu1  ;;  %v2998_v62 = vadd.f32 %v9325_v61, %v2997_v49 }
 0x38e   : > { %v3955_v51 = vadd.f32 %v9000_v55, %v3954_v45  ;;  %v3318_v63 = vadd.f32 %v9325_v61, %v3317_v52 }
 0x38f   : > { %v7547_v56 = vpack.c.bf16 %v3635_v50, %v3633_v47  ;;  %6210 = vmatmul.msk.bf16.gmra.mxu0 %vm1979_vm0, %v6468_v39 }
 0x390   : > { %v7867_v57 = vpack.c.bf16 %v3955_v51, %v3953_v48  ;;  %6274 = vmatmul.msk.bf16.gmra.mxu1 %vm1979_vm0, %v6532_v46 }
 0x391   : > { %8123 = vst [vmem:[%s8354_s25 + $0x578] sm:$0xff] %v7547_v56   ;;  %6338 = vmatmul.msk.bf16.gmra.mxu2 %vm1979_vm0, %v6596_v53  ;;  %v6535_v56 = vld [vmem:[%s8266_s20 + $0x3d8] sm:$0xff] }
 0x392   : > { %6402 = vmatmul.msk.bf16.gmra.mxu3 %vm1979_vm0, %v6660_v54  ;;  %8187 = vst [vmem:[%s8354_s25 + $0x778] sm:$0xff] %v7867_v57   ;;  %v6471_v54 = vld [vmem:[%s8266_s20 + $0x1d8] sm:$0xff] }
 0x394   : > { %v3637_v55 = vpop.f32.mrf.mxu2  ;;  %v2999_v59 = vpop.f32.mrf.mxu0 }
 0x395   : > { %v3957_v58 = vpop.f32.mrf.mxu3  ;;  %v3319_v60 = vpop.f32.mrf.mxu1  ;;  %v3000_v0 = vadd.f32 %v9325_v61, %v2999_v59  ;;  %v3638_v8 = vadd.f32 %v9325_v61, %v3637_v55 }
 0x396   : > { %v3320_v1 = vadd.f32 %v9325_v61, %v3319_v60  ;;  %v3958_v9 = vadd.f32 %v9325_v61, %v3957_v58 }
 0x397   : > { %v6912_v2 = vpack.c.bf16 %v3000_v0, %v2998_v62  ;;  %v6663_v0 = vld [vmem:[%s8266_s20 + $0x7d8] sm:$0xff] }
 0x398   : > { %v7232_v3 = vpack.c.bf16 %v3320_v1, %v3318_v63  ;;  %v6599_v63 = vld [vmem:[%s8266_s20 + $0x5d8] sm:$0xff] }
 0x399   : > { %7996 = vst [vmem:[%s8354_s25 + $0x180] sm:$0xff] %v6912_v2  }
 0x39a   : > { %8060 = vst [vmem:[%s8354_s25 + $0x380] sm:$0xff] %v7232_v3  }
 0x39c   : > { %v3639_v4 = vpop.f32.mrf.mxu2  ;;  %v3002_v12 = vpop.f32.mrf.mxu0 }
 0x39d   : > { %v3959_v5 = vpop.f32.mrf.mxu3  ;;  %v3640_v10 = vadd.f32 %v9325_v61, %v3639_v4  ;;  %v3322_v13 = vpop.f32.mrf.mxu1  ;;  %v3003_v22 = vadd.f32 %v9325_v61, %v3002_v12 }
 0x39e   : > { %v3960_v11 = vadd.f32 %v9325_v61, %v3959_v5  ;;  %v3323_v23 = vadd.f32 %v9325_v61, %v3322_v13 }
 0x39f   : > { %v7552_v16 = vpack.c.bf16 %v3640_v10, %v3638_v8  ;;  %6211 = vmatmul.msk.bf16.gmra.mxu0 %vm1979_vm0, %v6469_v6 }
 0x3a0   : > { %v7872_v17 = vpack.c.bf16 %v3960_v11, %v3958_v9  ;;  %6275 = vmatmul.msk.bf16.gmra.mxu1 %vm1979_vm0, %v6533_v7 }
 0x3a1   : > { %8124 = vst [vmem:[%s8354_s25 + $0x580] sm:$0xff] %v7552_v16   ;;  %6339 = vmatmul.msk.bf16.gmra.mxu2 %vm1979_vm0, %v6597_v14  ;;  %v6536_v16 = vld [vmem:[%s8266_s20 + $0x3e0] sm:$0xff] }
 0x3a2   : > { %6403 = vmatmul.msk.bf16.gmra.mxu3 %vm1979_vm0, %v6661_v15  ;;  %8188 = vst [vmem:[%s8354_s25 + $0x780] sm:$0xff] %v7872_v17   ;;  %v6472_v15 = vld [vmem:[%s8266_s20 + $0x1e0] sm:$0xff] }
 0x3a4   : > { %v3642_v18 = vpop.f32.mrf.mxu2  ;;  %v3004_v20 = vpop.f32.mrf.mxu0 }
 0x3a5   : > { %v3962_v19 = vpop.f32.mrf.mxu3  ;;  %v3324_v21 = vpop.f32.mrf.mxu1  ;;  %v3005_v24 = vadd.f32 %v9325_v61, %v3004_v20  ;;  %v3643_v32 = vadd.f32 %v9325_v61, %v3642_v18 }
 0x3a6   : > { %v3325_v25 = vadd.f32 %v9325_v61, %v3324_v21  ;;  %v3963_v33 = vadd.f32 %v9325_v61, %v3962_v19 }
 0x3a7   : > { %v6917_v26 = vpack.c.bf16 %v3005_v24, %v3003_v22  ;;  %v6664_v24 = vld [vmem:[%s8266_s20 + $0x7e0] sm:$0xff] }
 0x3a8   : > { %v7237_v27 = vpack.c.bf16 %v3325_v25, %v3323_v23  ;;  %v6600_v23 = vld [vmem:[%s8266_s20 + $0x5e0] sm:$0xff] }
 0x3a9   : > { %7997 = vst [vmem:[%s8354_s25 + $0x188] sm:$0xff] %v6917_v26  }
 0x3aa   : > { %8061 = vst [vmem:[%s8354_s25 + $0x388] sm:$0xff] %v7237_v27  }
 0x3ac   : > { %v3644_v28 = vpop.f32.mrf.mxu2  ;;  %v3007_v36 = vpop.f32.mrf.mxu0 }
 0x3ad   : > { %v3964_v29 = vpop.f32.mrf.mxu3  ;;  %v3645_v34 = vadd.f32 %v9325_v61, %v3644_v28  ;;  %v3327_v37 = vpop.f32.mrf.mxu1  ;;  %v3008_v46 = vadd.f32 %v9325_v61, %v3007_v36 }
 0x3ae   : > { %v3965_v35 = vadd.f32 %v9325_v61, %v3964_v29  ;;  %v3328_v47 = vadd.f32 %v9325_v61, %v3327_v37 }
 0x3af   : > { %v7557_v41 = vpack.c.bf16 %v3645_v34, %v3643_v32  ;;  %6212 = vmatmul.msk.bf16.gmra.mxu0 %vm1979_vm0, %v6470_v30 }
 0x3b0   : > { %v7877_v42 = vpack.c.bf16 %v3965_v35, %v3963_v33  ;;  %6276 = vmatmul.msk.bf16.gmra.mxu1 %vm1979_vm0, %v6534_v31 }
 0x3b1   : > { %8125 = vst [vmem:[%s8354_s25 + $0x588] sm:$0xff] %v7557_v41   ;;  %6340 = vmatmul.msk.bf16.gmra.mxu2 %vm1979_vm0, %v6598_v38  ;;  %v6537_v41 = vld [vmem:[%s8266_s20 + $0x3e8] sm:$0xff] }
 0x3b2   : > { %6404 = vmatmul.msk.bf16.gmra.mxu3 %vm1979_vm0, %v6662_v40  ;;  %8189 = vst [vmem:[%s8354_s25 + $0x788] sm:$0xff] %v7877_v42   ;;  %v6473_v40 = vld [vmem:[%s8266_s20 + $0x1e8] sm:$0xff] }
 0x3b4   : > { %v3647_v43 = vpop.f32.mrf.mxu2  ;;  %v3009_v45 = vpop.f32.mrf.mxu0 }
 0x3b5   : > { %v3967_v44 = vpop.f32.mrf.mxu3  ;;  %v3329_v39 = vpop.f32.mrf.mxu1  ;;  %v3010_v48 = vadd.f32 %v9325_v61, %v3009_v45  ;;  %v3648_v57 = vadd.f32 %v9325_v61, %v3647_v43 }
 0x3b6   : > { %v3330_v50 = vadd.f32 %v9325_v61, %v3329_v39  ;;  %v3968_v55 = vadd.f32 %v9325_v61, %v3967_v44 }
 0x3b7   : > { %v6922_v51 = vpack.c.bf16 %v3010_v48, %v3008_v46  ;;  %v6665_v48 = vld [vmem:[%s8266_s20 + $0x7e8] sm:$0xff] }
 0x3b8   : > { %v7242_v49 = vpack.c.bf16 %v3330_v50, %v3328_v47  ;;  %v6601_v47 = vld [vmem:[%s8266_s20 + $0x5e8] sm:$0xff] }
 0x3b9   : > { %7998 = vst [vmem:[%s8354_s25 + $0x190] sm:$0xff] %v6922_v51  }
 0x3ba   : > { %8062 = vst [vmem:[%s8354_s25 + $0x390] sm:$0xff] %v7242_v49  }
 0x3bc   : > { %v3649_v52 = vpop.f32.mrf.mxu2  ;;  %v3012_v60 = vpop.f32.mrf.mxu0 }
 0x3bd   : > { %v3969_v53 = vpop.f32.mrf.mxu3  ;;  %v3650_v58 = vadd.f32 %v9325_v61, %v3649_v52  ;;  %v3332_v62 = vpop.f32.mrf.mxu1  ;;  %v3013_v7 = vadd.f32 %v9325_v61, %v3012_v60 }
 0x3be   : > { %v3970_v59 = vadd.f32 %v9325_v61, %v3969_v53  ;;  %v3333_v8 = vadd.f32 %v9325_v61, %v3332_v62 }
 0x3bf   : > { %v7562_v1 = vpack.c.bf16 %v3650_v58, %v3648_v57  ;;  %6213 = vmatmul.msk.bf16.gmra.mxu0 %vm1979_vm0, %v6471_v54 }
 0x3c0   : > { %v7882_v2 = vpack.c.bf16 %v3970_v59, %v3968_v55  ;;  %6277 = vmatmul.msk.bf16.gmra.mxu1 %vm1979_vm0, %v6535_v56 }
 0x3c1   : > { %8126 = vst [vmem:[%s8354_s25 + $0x590] sm:$0xff] %v7562_v1   ;;  %6341 = vmatmul.msk.bf16.gmra.mxu2 %vm1979_vm0, %v6599_v63  ;;  %v6538_v1 = vld [vmem:[%s8266_s20 + $0x3f0] sm:$0xff] }
 0x3c2   : > { %6405 = vmatmul.msk.bf16.gmra.mxu3 %vm1979_vm0, %v6663_v0  ;;  %8190 = vst [vmem:[%s8354_s25 + $0x790] sm:$0xff] %v7882_v2   ;;  %v6474_v0 = vld [vmem:[%s8266_s20 + $0x1f0] sm:$0xff] }
 0x3c4   : > { %v3652_v3 = vpop.f32.mrf.mxu2  ;;  %v3014_v5 = vpop.f32.mrf.mxu0 }
 0x3c5   : > { %v3972_v4 = vpop.f32.mrf.mxu3  ;;  %v3334_v6 = vpop.f32.mrf.mxu1  ;;  %v3015_v9 = vadd.f32 %v9325_v61, %v3014_v5  ;;  %v3653_v17 = vadd.f32 %v9325_v61, %v3652_v3 }
 0x3c6   : > { %v3335_v10 = vadd.f32 %v9325_v61, %v3334_v6  ;;  %v3973_v18 = vadd.f32 %v9325_v61, %v3972_v4 }
 0x3c7   : > { %v6927_v11 = vpack.c.bf16 %v3015_v9, %v3013_v7  ;;  %v6666_v9 = vld [vmem:[%s8266_s20 + $0x7f0] sm:$0xff] }
 0x3c8   : > { %v7247_v12 = vpack.c.bf16 %v3335_v10, %v3333_v8  ;;  %v6602_v8 = vld [vmem:[%s8266_s20 + $0x5f0] sm:$0xff] }
 0x3c9   : > { %7999 = vst [vmem:[%s8354_s25 + $0x198] sm:$0xff] %v6927_v11  }
 0x3ca   : > { %8063 = vst [vmem:[%s8354_s25 + $0x398] sm:$0xff] %v7247_v12  }
 0x3cc   : > { %v3654_v13 = vpop.f32.mrf.mxu2  ;;  %v3017_v21 = vpop.f32.mrf.mxu0 }
 0x3cd   : > { %v3974_v14 = vpop.f32.mrf.mxu3  ;;  %v3655_v19 = vadd.f32 %v9325_v61, %v3654_v13  ;;  %v3337_v22 = vpop.f32.mrf.mxu1  ;;  %v3018_v31 = vadd.f32 %v9325_v61, %v3017_v21 }
 0x3ce   : > { %v3975_v20 = vadd.f32 %v9325_v61, %v3974_v14  ;;  %v3338_v32 = vadd.f32 %v9325_v61, %v3337_v22 }
 0x3cf   : > { %v7567_v25 = vpack.c.bf16 %v3655_v19, %v3653_v17  ;;  %6214 = vmatmul.msk.bf16.gmra.mxu0 %vm1979_vm0, %v6472_v15 }
 0x3d0   : > { %v7887_v26 = vpack.c.bf16 %v3975_v20, %v3973_v18  ;;  %6278 = vmatmul.msk.bf16.gmra.mxu1 %vm1979_vm0, %v6536_v16 }
 0x3d1   : > { %8127 = vst [vmem:[%s8354_s25 + $0x598] sm:$0xff] %v7567_v25   ;;  %6342 = vmatmul.msk.bf16.gmra.mxu2 %vm1979_vm0, %v6600_v23  ;;  %v6539_v25 = vld [vmem:[%s8266_s20 + $0x3f8] sm:$0xff] }
 0x3d2   : > { %6406 = vmatmul.msk.bf16.gmra.mxu3 %vm1979_vm0, %v6664_v24  ;;  %8191 = vst [vmem:[%s8354_s25 + $0x798] sm:$0xff] %v7887_v26   ;;  %v6475_v24 = vld [vmem:[%s8266_s20 + $0x1f8] sm:$0xff] }
 0x3d4   : > { %v3657_v27 = vpop.f32.mrf.mxu2  ;;  %v3019_v29 = vpop.f32.mrf.mxu0 }
 0x3d5   : > { %v3977_v28 = vpop.f32.mrf.mxu3  ;;  %v3339_v30 = vpop.f32.mrf.mxu1  ;;  %v3020_v33 = vadd.f32 %v9325_v61, %v3019_v29  ;;  %v3658_v42 = vadd.f32 %v9325_v61, %v3657_v27 }
 0x3d6   : > { %v3340_v34 = vadd.f32 %v9325_v61, %v3339_v30  ;;  %v3978_v43 = vadd.f32 %v9325_v61, %v3977_v28 }
 0x3d7   : > { %v6932_v35 = vpack.c.bf16 %v3020_v33, %v3018_v31  ;;  %v6667_v33 = vld [vmem:[%s8266_s20 + $0x7f8] sm:$0xff] }
 0x3d8   : > { %v7252_v36 = vpack.c.bf16 %v3340_v34, %v3338_v32  ;;  %v6603_v32 = vld [vmem:[%s8266_s20 + $0x5f8] sm:$0xff] }
 0x3d9   : > { %8000 = vst [vmem:[%s8354_s25 + $0x1a0] sm:$0xff] %v6932_v35  }
 0x3da   : > { %8064 = vst [vmem:[%s8354_s25 + $0x3a0] sm:$0xff] %v7252_v36  }
 0x3dc   : > { %v3659_v37 = vpop.f32.mrf.mxu2  ;;  %v3022_v39 = vpop.f32.mrf.mxu0 }
 0x3dd   : > { %v3979_v38 = vpop.f32.mrf.mxu3  ;;  %v3660_v44 = vadd.f32 %v9325_v61, %v3659_v37  ;;  %v3342_v46 = vpop.f32.mrf.mxu1  ;;  %v3023_v56 = vadd.f32 %v9325_v61, %v3022_v39 }
 0x3de   : > { %v3980_v45 = vadd.f32 %v9325_v61, %v3979_v38  ;;  %v3343_v57 = vadd.f32 %v9325_v61, %v3342_v46 }
 0x3df   : > { %v7572_v50 = vpack.c.bf16 %v3660_v44, %v3658_v42  ;;  %6215 = vmatmul.msk.bf16.gmra.mxu0 %vm1979_vm0, %v6473_v40 }
 0x3e0   : > { %v7892_v51 = vpack.c.bf16 %v3980_v45, %v3978_v43  ;;  %6279 = vmatmul.msk.bf16.gmra.mxu1 %vm1979_vm0, %v6537_v41 }
 0x3e1   : > { %8128 = vst [vmem:[%s8354_s25 + $0x5a0] sm:$0xff] %v7572_v50   ;;  %6343 = vmatmul.msk.bf16.gmra.mxu2 %vm1979_vm0, %v6601_v47 }
 0x3e2   : > { %6407 = vmatmul.msk.bf16.gmra.mxu3 %vm1979_vm0, %v6665_v48  ;;  %8192 = vst [vmem:[%s8354_s25 + $0x7a0] sm:$0xff] %v7892_v51  }
 0x3e4   : > { %v3662_v49 = vpop.f32.mrf.mxu2  ;;  %v3024_v53 = vpop.f32.mrf.mxu0 }
 0x3e5   : > { %v3982_v52 = vpop.f32.mrf.mxu3  ;;  %v3344_v54 = vpop.f32.mrf.mxu1  ;;  %v3025_v55 = vadd.f32 %v9325_v61, %v3024_v53  ;;  %v3663_v2 = vadd.f32 %v9325_v61, %v3662_v49 }
 0x3e6   : > { %v3345_v58 = vadd.f32 %v9325_v61, %v3344_v54  ;;  %v3983_v3 = vadd.f32 %v9325_v61, %v3982_v52 }
 0x3e7   : > { %v6937_v59 = vpack.c.bf16 %v3025_v55, %v3023_v56 }
 0x3e8   : > { %v7257_v60 = vpack.c.bf16 %v3345_v58, %v3343_v57 }
 0x3e9   : > { %8001 = vst [vmem:[%s8354_s25 + $0x1a8] sm:$0xff] %v6937_v59  }
 0x3ea   : > { %8065 = vst [vmem:[%s8354_s25 + $0x3a8] sm:$0xff] %v7257_v60  }
 0x3ec   : > { %v3664_v62 = vpop.f32.mrf.mxu2  ;;  %v3027_v6 = vpop.f32.mrf.mxu0 }
 0x3ed   : > { %v3984_v63 = vpop.f32.mrf.mxu3  ;;  %v3665_v4 = vadd.f32 %v9325_v61, %v3664_v62  ;;  %v3347_v7 = vpop.f32.mrf.mxu1  ;;  %v3028_v16 = vadd.f32 %v9325_v61, %v3027_v6 }
 0x3ee   : > { %v3985_v5 = vadd.f32 %v9325_v61, %v3984_v63  ;;  %v3348_v17 = vadd.f32 %v9325_v61, %v3347_v7 }
 0x3ef   : > { %v7577_v10 = vpack.c.bf16 %v3665_v4, %v3663_v2  ;;  %6216 = vmatmul.msk.bf16.gmra.mxu0 %vm1979_vm0, %v6474_v0 }
 0x3f0   : > { %v7897_v11 = vpack.c.bf16 %v3985_v5, %v3983_v3  ;;  %6280 = vmatmul.msk.bf16.gmra.mxu1 %vm1979_vm0, %v6538_v1 }
 0x3f1   : > { %8129 = vst [vmem:[%s8354_s25 + $0x5a8] sm:$0xff] %v7577_v10   ;;  %6344 = vmatmul.msk.bf16.gmra.mxu2 %vm1979_vm0, %v6602_v8 }
 0x3f2   : > { %6408 = vmatmul.msk.bf16.gmra.mxu3 %vm1979_vm0, %v6666_v9  ;;  %8193 = vst [vmem:[%s8354_s25 + $0x7a8] sm:$0xff] %v7897_v11  }
 0x3f4   : > { %v3667_v12 = vpop.f32.mrf.mxu2  ;;  %v3029_v14 = vpop.f32.mrf.mxu0 }
 0x3f5   : > { %v3987_v13 = vpop.f32.mrf.mxu3  ;;  %v3349_v15 = vpop.f32.mrf.mxu1  ;;  %v3030_v18 = vadd.f32 %v9325_v61, %v3029_v14  ;;  %v3668_v26 = vadd.f32 %v9325_v61, %v3667_v12 }
 0x3f6   : > { %v3350_v19 = vadd.f32 %v9325_v61, %v3349_v15  ;;  %v3988_v27 = vadd.f32 %v9325_v61, %v3987_v13 }
 0x3f7   : > { %v6942_v20 = vpack.c.bf16 %v3030_v18, %v3028_v16 }
 0x3f8   : > { %v7262_v21 = vpack.c.bf16 %v3350_v19, %v3348_v17 }
 0x3f9   : > { %8002 = vst [vmem:[%s8354_s25 + $0x1b0] sm:$0xff] %v6942_v20  }
 0x3fa   : > { %8066 = vst [vmem:[%s8354_s25 + $0x3b0] sm:$0xff] %v7262_v21  }
 0x3fc   : > { %v3669_v22 = vpop.f32.mrf.mxu2  ;;  %v3032_v30 = vpop.f32.mrf.mxu0 }
 0x3fd   : > { %v3989_v23 = vpop.f32.mrf.mxu3  ;;  %v3670_v28 = vadd.f32 %v9325_v61, %v3669_v22  ;;  %v3352_v31 = vpop.f32.mrf.mxu1  ;;  %v3033_v41 = vadd.f32 %v9325_v61, %v3032_v30 }
 0x3fe   : > { %v3990_v29 = vadd.f32 %v9325_v61, %v3989_v23  ;;  %v3353_v42 = vadd.f32 %v9325_v61, %v3352_v31 }
 0x3ff   : > { %v7582_v34 = vpack.c.bf16 %v3670_v28, %v3668_v26  ;;  %6217 = vmatmul.msk.bf16.gmra.mxu0 %vm1979_vm0, %v6475_v24 }
 0x400   : > { %v7902_v35 = vpack.c.bf16 %v3990_v29, %v3988_v27  ;;  %6281 = vmatmul.msk.bf16.gmra.mxu1 %vm1979_vm0, %v6539_v25 }
 0x401   : > { %8130 = vst [vmem:[%s8354_s25 + $0x5b0] sm:$0xff] %v7582_v34   ;;  %6345 = vmatmul.msk.bf16.gmra.mxu2 %vm1979_vm0, %v6603_v32 }
 0x402   : > { %6409 = vmatmul.msk.bf16.gmra.mxu3 %vm1979_vm0, %v6667_v33  ;;  %8194 = vst [vmem:[%s8354_s25 + $0x7b0] sm:$0xff] %v7902_v35  }
 0x404   : > { %v3672_v36 = vpop.f32.mrf.mxu2  ;;  %v3034_v38 = vpop.f32.mrf.mxu0 }
 0x405   : > { %v3992_v37 = vpop.f32.mrf.mxu3  ;;  %v3354_v40 = vpop.f32.mrf.mxu1  ;;  %v3035_v43 = vadd.f32 %v9325_v61, %v3034_v38  ;;  %v3673_v48 = vadd.f32 %v9325_v61, %v3672_v36 }
 0x406   : > { %v3355_v44 = vadd.f32 %v9325_v61, %v3354_v40  ;;  %v3993_v50 = vadd.f32 %v9325_v61, %v3992_v37 }
 0x407   : > { %v6947_v45 = vpack.c.bf16 %v3035_v43, %v3033_v41 }
 0x408   : > { %v7267_v39 = vpack.c.bf16 %v3355_v44, %v3353_v42 }
 0x409   : > { %8003 = vst [vmem:[%s8354_s25 + $0x1b8] sm:$0xff] %v6947_v45  }
 0x40a   : > { %8067 = vst [vmem:[%s8354_s25 + $0x3b8] sm:$0xff] %v7267_v39  }
 0x40c   : > { %v3674_v46 = vpop.f32.mrf.mxu2  ;;  %v3037_v52 = vpop.f32.mrf.mxu0 }
 0x40d   : > { %v3994_v47 = vpop.f32.mrf.mxu3  ;;  %v3675_v51 = vadd.f32 %v9325_v61, %v3674_v46  ;;  %v3357_v53 = vpop.f32.mrf.mxu1  ;;  %v3038_v60 = vadd.f32 %v9325_v61, %v3037_v52 }
 0x40e   : > { %v3995_v49 = vadd.f32 %v9325_v61, %v3994_v47  ;;  %v3358_v62 = vadd.f32 %v9325_v61, %v3357_v53 }
 0x40f   : > { %v7587_v54 = vpack.c.bf16 %v3675_v51, %v3673_v48 }
 0x410   : > { %v7907_v56 = vpack.c.bf16 %v3995_v49, %v3993_v50 }
 0x411   : > { %8131 = vst [vmem:[%s8354_s25 + $0x5b8] sm:$0xff] %v7587_v54  }
 0x412   : > { %8195 = vst [vmem:[%s8354_s25 + $0x7b8] sm:$0xff] %v7907_v56  }
 0x414   : > { %v3677_v57 = vpop.f32.mrf.mxu2  ;;  %v3039_v58 = vpop.f32.mrf.mxu0 }
 0x415   : > { %v3997_v55 = vpop.f32.mrf.mxu3  ;;  %v3359_v59 = vpop.f32.mrf.mxu1  ;;  %v3040_v63 = vadd.f32 %v9325_v61, %v3039_v58  ;;  %v3678_v5 = vadd.f32 %v9325_v61, %v3677_v57 }
 0x416   : > { %v3360_v0 = vadd.f32 %v9325_v61, %v3359_v59  ;;  %v3998_v6 = vadd.f32 %v9325_v61, %v3997_v55 }
 0x417   : > { %v6952_v1 = vpack.c.bf16 %v3040_v63, %v3038_v60 }
 0x418   : > { %v7272_v2 = vpack.c.bf16 %v3360_v0, %v3358_v62 }
 0x419   : > { %8004 = vst [vmem:[%s8354_s25 + $0x1c0] sm:$0xff] %v6952_v1  }
 0x41a   : > { %8068 = vst [vmem:[%s8354_s25 + $0x3c0] sm:$0xff] %v7272_v2  }
 0x41c   : > { %v3679_v3 = vpop.f32.mrf.mxu2  ;;  %v3042_v9 = vpop.f32.mrf.mxu0 }
 0x41d   : > { %v3999_v4 = vpop.f32.mrf.mxu3  ;;  %v3680_v7 = vadd.f32 %v9325_v61, %v3679_v3  ;;  %v3362_v10 = vpop.f32.mrf.mxu1  ;;  %v3043_v17 = vadd.f32 %v9325_v61, %v3042_v9 }
 0x41e   : > { %v4000_v8 = vadd.f32 %v9325_v61, %v3999_v4  ;;  %v3363_v18 = vadd.f32 %v9325_v61, %v3362_v10 }
 0x41f   : > { %v7592_v11 = vpack.c.bf16 %v3680_v7, %v3678_v5 }
 0x420   : > { %v7912_v12 = vpack.c.bf16 %v4000_v8, %v3998_v6 }
 0x421   : > { %8132 = vst [vmem:[%s8354_s25 + $0x5c0] sm:$0xff] %v7592_v11  }
 0x422   : > { %8196 = vst [vmem:[%s8354_s25 + $0x7c0] sm:$0xff] %v7912_v12  }
 0x424   : > { %v3682_v13 = vpop.f32.mrf.mxu2  ;;  %v3044_v15 = vpop.f32.mrf.mxu0 }
 0x425   : > { %v4002_v14 = vpop.f32.mrf.mxu3  ;;  %v3364_v16 = vpop.f32.mrf.mxu1  ;;  %v3045_v19 = vadd.f32 %v9325_v61, %v3044_v15  ;;  %v3683_v25 = vadd.f32 %v9325_v61, %v3682_v13 }
 0x426   : > { %v3365_v20 = vadd.f32 %v9325_v61, %v3364_v16  ;;  %v4003_v26 = vadd.f32 %v9325_v61, %v4002_v14 }
 0x427   : > { %v6957_v21 = vpack.c.bf16 %v3045_v19, %v3043_v17 }
 0x428   : > { %v7277_v22 = vpack.c.bf16 %v3365_v20, %v3363_v18 }
 0x429   : > { %8005 = vst [vmem:[%s8354_s25 + $0x1c8] sm:$0xff] %v6957_v21  }
 0x42a   : > { %8069 = vst [vmem:[%s8354_s25 + $0x3c8] sm:$0xff] %v7277_v22  }
 0x42c   : > { %v3684_v23 = vpop.f32.mrf.mxu2  ;;  %v3047_v29 = vpop.f32.mrf.mxu0 }
 0x42d   : > { %v4004_v24 = vpop.f32.mrf.mxu3  ;;  %v3685_v27 = vadd.f32 %v9325_v61, %v3684_v23  ;;  %v3367_v30 = vpop.f32.mrf.mxu1  ;;  %v3048_v37 = vadd.f32 %v9325_v61, %v3047_v29 }
 0x42e   : > { %v4005_v28 = vadd.f32 %v9325_v61, %v4004_v24  ;;  %v3368_v38 = vadd.f32 %v9325_v61, %v3367_v30 }
 0x42f   : > { %v7597_v31 = vpack.c.bf16 %v3685_v27, %v3683_v25 }
 0x430   : > { %v7917_v32 = vpack.c.bf16 %v4005_v28, %v4003_v26 }
 0x431   : > { %8133 = vst [vmem:[%s8354_s25 + $0x5c8] sm:$0xff] %v7597_v31  }
 0x432   : > { %8197 = vst [vmem:[%s8354_s25 + $0x7c8] sm:$0xff] %v7917_v32  }
 0x434   : > { %v3687_v33 = vpop.f32.mrf.mxu2  ;;  %v3049_v35 = vpop.f32.mrf.mxu0 }
 0x435   : > { %v4007_v34 = vpop.f32.mrf.mxu3  ;;  %v3369_v36 = vpop.f32.mrf.mxu1  ;;  %v3050_v40 = vadd.f32 %v9325_v61, %v3049_v35  ;;  %v3688_v39 = vadd.f32 %v9325_v61, %v3687_v33 }
 0x436   : > { %v3370_v41 = vadd.f32 %v9325_v61, %v3369_v36  ;;  %v4008_v46 = vadd.f32 %v9325_v61, %v4007_v34 }
 0x437   : > { %v6962_v42 = vpack.c.bf16 %v3050_v40, %v3048_v37 }
 0x438   : > { %v7282_v43 = vpack.c.bf16 %v3370_v41, %v3368_v38 }
 0x439   : > { %8006 = vst [vmem:[%s8354_s25 + $0x1d0] sm:$0xff] %v6962_v42  }
 0x43a   : > { %8070 = vst [vmem:[%s8354_s25 + $0x3d0] sm:$0xff] %v7282_v43  }
 0x43c   : > { %v3689_v44 = vpop.f32.mrf.mxu2  ;;  %v3052_v50 = vpop.f32.mrf.mxu0 }
 0x43d   : > { %v4009_v45 = vpop.f32.mrf.mxu3  ;;  %v3690_v47 = vadd.f32 %v9325_v61, %v3689_v44  ;;  %v3372_v51 = vpop.f32.mrf.mxu1  ;;  %v3053_v55 = vadd.f32 %v9325_v61, %v3052_v50 }
 0x43e   : > { %v4010_v48 = vadd.f32 %v9325_v61, %v4009_v45  ;;  %v3373_v58 = vadd.f32 %v9325_v61, %v3372_v51 }
 0x43f   : > { %v7602_v49 = vpack.c.bf16 %v3690_v47, %v3688_v39 }
 0x440   : > { %v7922_v52 = vpack.c.bf16 %v4010_v48, %v4008_v46 }
 0x441   : > { %8134 = vst [vmem:[%s8354_s25 + $0x5d0] sm:$0xff] %v7602_v49  }
 0x442   : > { %8198 = vst [vmem:[%s8354_s25 + $0x7d0] sm:$0xff] %v7922_v52  }
 0x444   : > { %v3692_v53 = vpop.f32.mrf.mxu2  ;;  %v3054_v56 = vpop.f32.mrf.mxu0 }
 0x445   : > { %v4012_v54 = vpop.f32.mrf.mxu3  ;;  %v3374_v57 = vpop.f32.mrf.mxu1  ;;  %v3055_v59 = vadd.f32 %v9325_v61, %v3054_v56  ;;  %v3693_v2 = vadd.f32 %v9325_v61, %v3692_v53 }
 0x446   : > { %v3375_v60 = vadd.f32 %v9325_v61, %v3374_v57  ;;  %v4013_v3 = vadd.f32 %v9325_v61, %v4012_v54 }
 0x447   : > { %v6967_v62 = vpack.c.bf16 %v3055_v59, %v3053_v55 }
 0x448   : > { %v7287_v63 = vpack.c.bf16 %v3375_v60, %v3373_v58 }
 0x449   : > { %8007 = vst [vmem:[%s8354_s25 + $0x1d8] sm:$0xff] %v6967_v62  }
 0x44a   : > { %8071 = vst [vmem:[%s8354_s25 + $0x3d8] sm:$0xff] %v7287_v63  }
 0x44c   : > { %v3694_v0 = vpop.f32.mrf.mxu2  ;;  %v3057_v6 = vpop.f32.mrf.mxu0 }
 0x44d   : > { %v4014_v1 = vpop.f32.mrf.mxu3  ;;  %v3695_v4 = vadd.f32 %v9325_v61, %v3694_v0  ;;  %v3377_v7 = vpop.f32.mrf.mxu1  ;;  %v3058_v14 = vadd.f32 %v9325_v61, %v3057_v6 }
 0x44e   : > { %v4015_v5 = vadd.f32 %v9325_v61, %v4014_v1  ;;  %v3378_v15 = vadd.f32 %v9325_v61, %v3377_v7 }
 0x44f   : > { %v7607_v8 = vpack.c.bf16 %v3695_v4, %v3693_v2 }
 0x450   : > { %v7927_v9 = vpack.c.bf16 %v4015_v5, %v4013_v3 }
 0x451   : > { %8135 = vst [vmem:[%s8354_s25 + $0x5d8] sm:$0xff] %v7607_v8  }
 0x452   : > { %8199 = vst [vmem:[%s8354_s25 + $0x7d8] sm:$0xff] %v7927_v9  }
 0x454   : > { %v3697_v10 = vpop.f32.mrf.mxu2  ;;  %v3059_v12 = vpop.f32.mrf.mxu0 }
 0x455   : > { %v4017_v11 = vpop.f32.mrf.mxu3  ;;  %v3379_v13 = vpop.f32.mrf.mxu1  ;;  %v3060_v16 = vadd.f32 %v9325_v61, %v3059_v12  ;;  %v3698_v22 = vadd.f32 %v9325_v61, %v3697_v10 }
 0x456   : > { %v3380_v17 = vadd.f32 %v9325_v61, %v3379_v13  ;;  %v4018_v23 = vadd.f32 %v9325_v61, %v4017_v11 }
 0x457   : > { %v6972_v18 = vpack.c.bf16 %v3060_v16, %v3058_v14 }
 0x458   : > { %v7292_v19 = vpack.c.bf16 %v3380_v17, %v3378_v15 }
 0x459   : > { %8008 = vst [vmem:[%s8354_s25 + $0x1e0] sm:$0xff] %v6972_v18  }
 0x45a   : > { %8072 = vst [vmem:[%s8354_s25 + $0x3e0] sm:$0xff] %v7292_v19  }
 0x45c   : > { %v3699_v20 = vpop.f32.mrf.mxu2  ;;  %v3062_v26 = vpop.f32.mrf.mxu0 }
 0x45d   : > { %v4019_v21 = vpop.f32.mrf.mxu3  ;;  %v3700_v24 = vadd.f32 %v9325_v61, %v3699_v20  ;;  %v3382_v27 = vpop.f32.mrf.mxu1  ;;  %v3063_v34 = vadd.f32 %v9325_v61, %v3062_v26 }
 0x45e   : > { %v4020_v25 = vadd.f32 %v9325_v61, %v4019_v21  ;;  %v3383_v35 = vadd.f32 %v9325_v61, %v3382_v27 }
 0x45f   : > { %v7612_v28 = vpack.c.bf16 %v3700_v24, %v3698_v22 }
 0x460   : > { %v7932_v29 = vpack.c.bf16 %v4020_v25, %v4018_v23 }
 0x461   : > { %8136 = vst [vmem:[%s8354_s25 + $0x5e0] sm:$0xff] %v7612_v28  }
 0x462   : > { %8200 = vst [vmem:[%s8354_s25 + $0x7e0] sm:$0xff] %v7932_v29  }
 0x464   : > { %v3702_v30 = vpop.f32.mrf.mxu2  ;;  %v3064_v32 = vpop.f32.mrf.mxu0 }
 0x465   : > { %v4022_v31 = vpop.f32.mrf.mxu3  ;;  %v3384_v33 = vpop.f32.mrf.mxu1  ;;  %v3065_v36 = vadd.f32 %v9325_v61, %v3064_v32  ;;  %v3703_v43 = vadd.f32 %v9325_v61, %v3702_v30 }
 0x466   : > { %v3385_v37 = vadd.f32 %v9325_v61, %v3384_v33  ;;  %v4023_v44 = vadd.f32 %v9325_v61, %v4022_v31 }
 0x467   : > { %v6977_v38 = vpack.c.bf16 %v3065_v36, %v3063_v34 }
 0x468   : > { %v7297_v40 = vpack.c.bf16 %v3385_v37, %v3383_v35 }
 0x469   : > { %8009 = vst [vmem:[%s8354_s25 + $0x1e8] sm:$0xff] %v6977_v38  }
 0x46a   : > { %8073 = vst [vmem:[%s8354_s25 + $0x3e8] sm:$0xff] %v7297_v40  }
 0x46c   : > { %v3704_v41 = vpop.f32.mrf.mxu2  ;;  %v3067_v46 = vpop.f32.mrf.mxu0 }
 0x46d   : > { %v4024_v42 = vpop.f32.mrf.mxu3  ;;  %v3705_v45 = vadd.f32 %v9325_v61, %v3704_v41  ;;  %v3387_v47 = vpop.f32.mrf.mxu1  ;;  %v3068_v54 = vadd.f32 %v9325_v61, %v3067_v46 }
 0x46e   : > { %v4025_v39 = vadd.f32 %v9325_v61, %v4024_v42  ;;  %v3388_v56 = vadd.f32 %v9325_v61, %v3387_v47 }
 0x46f   : > { %v7617_v48 = vpack.c.bf16 %v3705_v45, %v3703_v43 }
 0x470   : > { %v7937_v50 = vpack.c.bf16 %v4025_v39, %v4023_v44 }
 0x471   : > { %8137 = vst [vmem:[%s8354_s25 + $0x5e8] sm:$0xff] %v7617_v48  }
 0x472   : > { %8201 = vst [vmem:[%s8354_s25 + $0x7e8] sm:$0xff] %v7937_v50  }
 0x474   : > { %v3707_v51 = vpop.f32.mrf.mxu2  ;;  %v3069_v52 = vpop.f32.mrf.mxu0 }
 0x475   : > { %v4027_v49 = vpop.f32.mrf.mxu3  ;;  %v3389_v53 = vpop.f32.mrf.mxu1  ;;  %v3070_v57 = vadd.f32 %v9325_v61, %v3069_v52  ;;  %v3708_v63 = vadd.f32 %v9325_v61, %v3707_v51 }
 0x476   : > { %v3390_v55 = vadd.f32 %v9325_v61, %v3389_v53  ;;  %v4028_v0 = vadd.f32 %v9325_v61, %v4027_v49 }
 0x477   : > { %v6982_v58 = vpack.c.bf16 %v3070_v57, %v3068_v54 }
 0x478   : > { %v7302_v59 = vpack.c.bf16 %v3390_v55, %v3388_v56 }
 0x479   : > { %8010 = vst [vmem:[%s8354_s25 + $0x1f0] sm:$0xff] %v6982_v58  }
 0x47a   : > { %8074 = vst [vmem:[%s8354_s25 + $0x3f0] sm:$0xff] %v7302_v59  }
 0x47c   : > { %v3709_v60 = vpop.f32.mrf.mxu2  ;;  %v3072_v3 = vpop.f32.mrf.mxu0 }
 0x47d   : > { %v4029_v62 = vpop.f32.mrf.mxu3  ;;  %v3710_v1 = vadd.f32 %v9325_v61, %v3709_v60  ;;  %v3392_v4 = vpop.f32.mrf.mxu1  ;;  %v3073_v11 = vadd.f32 %v9325_v61, %v3072_v3 }
 0x47e   : > { %v4030_v2 = vadd.f32 %v9325_v61, %v4029_v62  ;;  %v3393_v12 = vadd.f32 %v9325_v61, %v3392_v4 }
 0x47f   : > { %v7622_v5 = vpack.c.bf16 %v3710_v1, %v3708_v63 }
 0x480   : > { %v7942_v6 = vpack.c.bf16 %v4030_v2, %v4028_v0 }
 0x481   : > { %8138 = vst [vmem:[%s8354_s25 + $0x5f0] sm:$0xff] %v7622_v5  }
 0x482   : > { %8202 = vst [vmem:[%s8354_s25 + $0x7f0] sm:$0xff] %v7942_v6  }
 0x484   : > { %v3712_v7 = vpop.f32.mrf.mxu2  ;;  %v3074_v9 = vpop.f32.mrf.mxu0 }
 0x485   : > { %v4032_v8 = vpop.f32.mrf.mxu3  ;;  %v3394_v10 = vpop.f32.mrf.mxu1  ;;  %v3075_v13 = vadd.f32 %v9325_v61, %v3074_v9  ;;  %v3713_v19 = vadd.f32 %v9325_v61, %v3712_v7 }
 0x486   : > { %v3395_v14 = vadd.f32 %v9325_v61, %v3394_v10  ;;  %v4033_v20 = vadd.f32 %v9325_v61, %v4032_v8 }
 0x487   : > { %v6987_v15 = vpack.c.bf16 %v3075_v13, %v3073_v11 }
 0x488   : > { %v7307_v16 = vpack.c.bf16 %v3395_v14, %v3393_v12 }
 0x489   : > { %8011 = vst [vmem:[%s8354_s25 + $0x1f8] sm:$0xff] %v6987_v15  }
 0x48a   : > { %8075 = vst [vmem:[%s8354_s25 + $0x3f8] sm:$0xff] %v7307_v16  }
 0x48c   : > { %v3714_v17 = vpop.f32.mrf.mxu2 }
 0x48d   : > { %v4034_v18 = vpop.f32.mrf.mxu3  ;;  %v3715_v21 = vadd.f32 %v9325_v61, %v3714_v17 }
 0x48e   : > { %v4035_v22 = vadd.f32 %v9325_v61, %v4034_v18 }
 0x48f   : > { %v7627_v23 = vpack.c.bf16 %v3715_v21, %v3713_v19 }
 0x490   : > { %v7947_v24 = vpack.c.bf16 %v4035_v22, %v4033_v20 }
 0x491   : > { %8139 = vst [vmem:[%s8354_s25 + $0x5f8] sm:$0xff] %v7627_v23  }
 0x492   : > { %8203 = vst [vmem:[%s8354_s25 + $0x7f8] sm:$0xff] %v7947_v24  }
 0x493 PF: > { %s13_s12 = sadd.s32 1, %s8225_s12  }
 0x494   : > { %p10_p4 = scmp.ge.s32.totalorder %s13_s12, 5  }
 0x496   :  { %12 = sbr.rel (!%p10_p4) target bundleno = 1 (0x1), region = 62 }

</bundles_post_ra>
